<compile_context>
chip_gen: v6e
topology: v6e:2x2x1
jax: 0.10.0
libtpu: 0.0.40
codegen_flags: <defaults>
</compile_context>

<pallas_src>
import functools

import numpy as np

import jax
import jax.numpy as jnp
from jax.experimental import pallas as pl
from jax.experimental.pallas import tpu as pltpu  # noqa: F401  (TPU backend)

INPUT_DIM = 16
N_CLASS = 4
ACTI = "relu"
WP = 10
WF = 10

# packed gate order [i, f, o, g]  ->  PyTorch gate row block order [i, f, g, o]
_PT_GATE = {0: 0, 1: 1, 2: 3, 3: 2}


# ----------------------------- slab layout (shared by packer & kernel) ----------------------

def _layout(D, H):
    G2 = 8 * H      # word-level gate lanes   (2 dirs x 4 gates x H)
    GU = 32 * H     # utterance-level lanes   (2 dirs x 4 gates x 4 virtual rows x H)
    entries = [
        ("wih0", D, G2), ("whh0", 2 * H, G2), ("b0", 1, G2),
        ("wih1", D, G2), ("whh1", 2 * H, G2), ("b1", 1, G2),
        ("w_prev", D, 2 * D), ("w_cur", D, 2 * D), ("b_ec", 1, 2 * D),
        ("m_conf", 2 * D, GU), ("m_conb", 2 * D, GU), ("b_grp", 1, GU),
        ("whh_grp", 8 * H, GU),
        ("wrel", 2 * D, 6 * D), ("b_rg", 1, 2 * D),
        ("w_heads", 2 * D, 256), ("b_heads", 1, 256),
        ("fmask_w", 1, G2), ("fmask_u", 1, GU),
    ]
    lay, off, width = {}, 0, 128
    for name, r, c in entries:
        lay[name] = (off, r, c)
        off += ((r + 7) // 8) * 8          # keep every block sublane-aligned
        width = max(width, c)
    width = ((width + 127) // 128) * 128
    return lay, off, width


# ----------------------------- in-kernel helpers --------------------------------------------

def _act(x, acti):
    if acti == "sigmoid":
        return jax.nn.sigmoid(x)
    if acti == "tanh":
        return jnp.tanh(x)
    return jnp.maximum(x, 0.0)


# ----------------------------- the fused kernel ---------------------------------------------

def _ecpec_kernel(x_ref, ints_ref, w_ref, out_ref, *, T, B, Bp, D, H, C, acti, lay):
    f32 = jnp.float32
    i32 = jnp.int32

    def dot(a, b):
        return jnp.dot(a, b, preferred_element_type=f32)

    def w(name):
        off, r, c = lay[name]
        return w_ref[off:off + r, 0:c]

    ints = ints_ref[...]
    lens = ints[:, 0:1]                    # (Bp, 1) word lengths per utterance
    n_utt = ints[0:1, 1:2]                 # (1, 1)  sum(mask)

    # fused bidirectional LSTM cell; gate lane order [i | f | o | g], each gate `hw` wide,
    # state lanes laid out [fwd | bwd] (or [fwd-group | bwd-group]) matching the gate blocks.
    def cell(gts, h, c, hw, valid):
        sg = jax.nn.sigmoid(gts[:, 0:3 * hw])          # one EUP push for i, f, o
        gg = jnp.tanh(gts[:, 3 * hw:4 * hw])           # one EUP push for g
        c_new = sg[:, hw:2 * hw] * c + sg[:, 0:hw] * gg
        h_new = sg[:, 2 * hw:3 * hw] * jnp.tanh(c_new)
        if valid is None:
            return h_new, c_new, h_new
        return (jnp.where(valid, h_new, h),
                jnp.where(valid, c_new, c),
                jnp.where(valid, h_new, jnp.zeros_like(h_new)))

    # ---------------- word-level 2-layer bidirectional LSTM (wgru) --------------------------
    G2 = 8 * H
    fwd_g2 = w("fmask_w") > 0.5                                    # (1, G2) fwd sub-lanes
    fwd_h2 = jax.lax.broadcasted_iota(i32, (1, 2 * H), 1) < H      # (1, 2H)

    def bi_layer(gx, whh_blk, collect_y):
        h = jnp.zeros((Bp, 2 * H), f32)
        c = jnp.zeros((Bp, 2 * H), f32)
        ys_f = [None] * T
        ys_b = [None] * T
        u = jnp.zeros((Bp, 2 * H), f32)
        for s in range(T):                               # fully unrolled (T small & static)
            tb = T - 1 - s                               # natural time of the reverse dir
            gin = jnp.where(fwd_g2, gx[s * Bp:(s + 1) * Bp, :],
                            gx[tb * Bp:(tb + 1) * Bp, :])
            gts = gin + dot(h, whh_blk)                  # ONE block-diag recurrent matmul
            valid = jnp.logical_or(jnp.logical_and(fwd_h2, lens > s),
                                   jnp.logical_and(jnp.logical_not(fwd_h2), lens > tb))
            h, c, y = cell(gts, h, c, 2 * H, valid)
            if collect_y:
                ys_f[s] = y[:, 0:H]
                ys_b[tb] = y[:, H:2 * H]
            else:
                upd = jnp.logical_or(jnp.logical_and(fwd_h2, lens == s + 1),
                                     jnp.logical_and(jnp.logical_not(fwd_h2), lens == tb + 1))
                u = jnp.where(upd, y, u)
        if collect_y:
            y_all = jnp.concatenate([jnp.concatenate(ys_f, axis=0),
                                     jnp.concatenate(ys_b, axis=0)], axis=1)   # (T*Bp, 2H)
            return y_all, u
        return None, u

    gx0 = dot(x_ref[...], w("wih0")) + w("b0")           # hoisted input projection, layer 0
    y0, _ = bi_layer(gx0, w("whh0"), True)
    gx1 = dot(y0, w("wih1")) + w("b1")                   # hoisted input projection, layer 1
    _, U = bi_layer(gx1, w("whh1"), False)               # (Bp, D) utterance features

    # ---------------- prev-shift / reverse permutations (built in-kernel) --------------------
    r_i = jax.lax.broadcasted_iota(i32, (Bp, Bp), 0)
    c_i = jax.lax.broadcasted_iota(i32, (Bp, Bp), 1)
    row_valid = r_i < B
    s_mat = jnp.where((c_i == jnp.maximum(r_i - 1, 0)) & row_valid, 1.0, 0.0)
    rev_src = jnp.where(r_i < n_utt, n_utt - 1 - r_i, r_i)
    p_mat = jnp.where((c_i == rev_src) & row_valid, 1.0, 0.0)

    u_rev = dot(p_mat, U)
    prevs = dot(s_mat, jnp.concatenate([U, u_rev], axis=1))
    u_prev, u_rev_prev = prevs[:, 0:D], prevs[:, D:2 * D]

    # ---------------- context projections (We for E half, Wc for C half) ---------------------
    w_prev = w("w_prev"); w_cur = w("w_cur"); b_ec = w("b_ec")
    conf = _act(dot(u_prev, w_prev) + dot(U, w_cur) + b_ec, acti)            # (Bp, 2D) [E|C]
    conb = _act(dot(u_rev_prev, w_prev) + dot(u_rev, w_cur) + b_ec, acti)    # (Bp, 2D) [E|C]

    # ---------------- utterance-level LSTMs: all 8 recurrences fused --------------------------
    GU = 32 * H
    HU = 8 * H
    fwd_gu = w("fmask_u") > 0.5                                    # (1, GU) fwd-group lanes
    gx_ctx = dot(conf, w("m_conf")) + dot(conb, w("m_conb")) + w("b_grp")    # (Bp, GU)
    whh_grp = w("whh_grp")                                         # (HU, GU) block-diagonal

    h = jnp.zeros((1, HU), f32)
    cc = jnp.zeros((1, HU), f32)
    outf = [None] * B
    outb = [None] * B
    for s in range(B):                                   # fully unrolled (N utterances)
        p = B - 1 - s
        gin = jnp.where(fwd_gu, gx_ctx[s:s + 1, :], gx_ctx[p:p + 1, :])
        gts = gin + dot(h, whh_grp)                      # ONE block-diag recurrent matmul
        h, cc, _ = cell(gts, h, cc, HU, None)
        outf[s] = h[:, 0:4 * H]
        outb[p] = h[:, 4 * H:HU]

    zpad = [jnp.zeros((Bp - B, 4 * H), f32)] if Bp > B else []
    outf_c = jnp.concatenate(outf + zpad, axis=0)        # (Bp, 4H) fwd-group hiddens
    outb_c = jnp.concatenate(outb + zpad, axis=0)        # (Bp, 4H) bwd-group hiddens
    rout = dot(p_mat, jnp.concatenate([outf_c, outb_c], axis=1))   # re-reverse conb outputs
    routf, routb = rout[:, 0:4 * H], rout[:, 4 * H:8 * H]

    # ConE / ConC node features, E rows then C rows (padded blocks of Bp)
    x_e = jnp.concatenate([outf_c[:, 0:H], outb_c[:, 0:H],
                           routf[:, H:2 * H], routb[:, H:2 * H]], axis=1)
    x_c = jnp.concatenate([outf_c[:, 2 * H:3 * H], outb_c[:, 2 * H:3 * H],
                           routf[:, 3 * H:4 * H], routb[:, 3 * H:4 * H]], axis=1)
    x_all = jnp.concatenate([x_e, x_c], axis=0)          # (2Bp, 2D)

    # ---------------- dense 2-relation RGCN + classifier heads -------------------------------
    # TODO(synk): batch_graphify / MaskedEdgeAttention / RGCNConv sources not provided; dense
    # windowed 2-relation adjacency (no degree norm, attention unused) stands in for conv1.
    N2 = 2 * Bp
    ri = jax.lax.broadcasted_iota(i32, (N2, N2), 0)
    ci = jax.lax.broadcasted_iota(i32, (N2, N2), 1)
    r_hi = ri >= Bp
    c_hi = ci >= Bp
    pos_r = ri - jnp.where(r_hi, Bp, 0)
    pos_c = ci - jnp.where(c_hi, Bp, 0)
    idx_r = pos_r + jnp.where(r_hi, B, 0)
    idx_c = pos_c + jnp.where(c_hi, B, 0)
    diff = idx_r - idx_c
    window = (diff <= WP) & (diff >= -WF)
    vpair = (pos_r < B) & (pos_c < B)
    type1 = (idx_r >= B) & (idx_c < B)
    a1 = jnp.where(window & type1 & vpair, 1.0, 0.0)
    a0 = jnp.where(window & jnp.logical_not(type1) & vpair, 1.0, 0.0)

    m_all = dot(x_all, w("wrel"))                        # (2Bp, 6D) = [m0 | m1 | m_root]
    gcnf = (dot(a0, m_all[:, 0:2 * D]) + dot(a1, m_all[:, 2 * D:4 * D])
            + m_all[:, 4 * D:6 * D] + w("b_rg"))         # (2Bp, 2D)

    logits = dot(gcnf, w("w_heads")) + w("b_heads")      # (2Bp, 256) fused Wsa/Wcd heads

    def log_softmax_c(z):
        lane = jax.lax.broadcasted_iota(i32, z.shape, 1)
        valid = lane < C
        zm = jnp.where(valid, z, jnp.full_like(z, -1e30))
        m = jnp.max(zm, axis=1, keepdims=True)
        se = jnp.sum(jnp.where(valid, jnp.exp(zm - m), 0.0), axis=1, keepdims=True)
        return z - m - jnp.log(se)

    out_ref[0:Bp, :] = log_softmax_c(logits[0:Bp, 0:128])
    out_ref[Bp:2 * Bp, :] = log_softmax_c(logits[Bp:2 * Bp, 128:256])


# ----------------------------- parameter packing (runs once, host-side) ---------------------

def pack_params(params):
    D = int(params["We_w"].shape[0])
    H = D // 2
    C = int(params["Wsa_w"].shape[0])
    lay, rows, width = _layout(D, H)
    slab = np.zeros((rows, width), np.float32)

    def np_(x):
        return np.asarray(x, np.float32)

    def put(name, arr):
        off, r, c = lay[name]
        a = np_(arr)
        assert a.shape == (r, c), (name, a.shape, (r, c))
        slab[off:off + r, 0:c] = a

    # ---- word-level biLSTM layers: gate-interleaved [i|f|o|g] x [fwd|bwd] x H lanes ----
    def pack_word_layer(pf, pb):
        G2 = 8 * H
        wih = np.zeros((D, G2), np.float32)
        whh = np.zeros((2 * H, G2), np.float32)
        b = np.zeros((1, G2), np.float32)
        for d, p in enumerate((pf, pb)):
            w_ih, w_hh, b_ih, b_hh = (np_(t) for t in p)
            wih_t, whh_t = w_ih.T, w_hh.T
            bias = b_ih + b_hh
            for q in range(4):
                g = _PT_GATE[q]
                col = q * 2 * H + d * H
                wih[:, col:col + H] = wih_t[:, g * H:(g + 1) * H]
                whh[d * H:(d + 1) * H, col:col + H] = whh_t[:, g * H:(g + 1) * H]
                b[0, col:col + H] = bias[g * H:(g + 1) * H]
        return wih, whh, b

    wih0, whh0, b0 = pack_word_layer(params["wgru"]["l0_f"], params["wgru"]["l0_b"])
    wih1, whh1, b1 = pack_word_layer(params["wgru"]["l1_f"], params["wgru"]["l1_b"])
    put("wih0", wih0); put("whh0", whh0); put("b0", b0)
    put("wih1", wih1); put("whh1", whh1); put("b1", b1)

    # ---- context projections: conf/conb use We for the E half, Wc for the C half ----
    we_t = np_(params["We_w"]).T
    wc_t = np_(params["Wc_w"]).T
    put("w_prev", np.concatenate([we_t[:D], wc_t[:D]], axis=1))
    put("w_cur", np.concatenate([we_t[D:], wc_t[D:]], axis=1))
    put("b_ec", np.concatenate([np_(params["We_b"]), np_(params["Wc_b"])]).reshape(1, 2 * D))

    # ---- utterance-level 8 recurrences: lane = gate*8H + dir*4H + vrow*H + k ----
    GU = 32 * H
    m_conf = np.zeros((2 * D, GU), np.float32)
    m_conb = np.zeros((2 * D, GU), np.float32)
    b_grp = np.zeros((1, GU), np.float32)
    whh_grp = np.zeros((8 * H, GU), np.float32)
    branch = {"E": (params["egru_f"], params["egru_b"]),
              "C": (params["cgru_f"], params["cgru_b"])}
    rows_def = [(0, "conf", "E"), (1, "conb", "E"), (2, "conf", "C"), (3, "conb", "C")]
    for d in range(2):
        for r, seq, br in rows_def:
            w_ih, w_hh, b_ih, b_hh = (np_(t) for t in branch[br][d])
            wih_t, whh_t = w_ih.T, w_hh.T
            bias = b_ih + b_hh
            in_off = 0 if br == "E" else D
            tgt = m_conf if seq == "conf" else m_conb
            for q in range(4):
                g = _PT_GATE[q]
                col = q * 8 * H + d * 4 * H + r * H
                tgt[in_off:in_off + D, col:col + H] = wih_t[:, g * H:(g + 1) * H]
                whh_grp[d * 4 * H + r * H: d * 4 * H + (r + 1) * H, col:col + H] = \
                    whh_t[:, g * H:(g + 1) * H]
                b_grp[0, col:col + H] = bias[g * H:(g + 1) * H]
    put("m_conf", m_conf); put("m_conb", m_conb); put("b_grp", b_grp); put("whh_grp", whh_grp)

    # ---- RGCN basis contraction + heads ----
    w_rel = np.einsum("rb,bio->rio", np_(params["rgcn_comp"]), np_(params["rgcn_basis"]))
    put("wrel", np.concatenate([w_rel[0], w_rel[1], np_(params["rgcn_root"])], axis=1))
    put("b_rg", np_(params["rgcn_bias"]).reshape(1, 2 * D))

    w_heads = np.zeros((2 * D, 256), np.float32)
    w_heads[:, 0:C] = np_(params["Wsa_w"]).T
    w_heads[:, 128:128 + C] = np_(params["Wcd_w"]).T
    b_heads = np.zeros((1, 256), np.float32)
    b_heads[0, 0:C] = np_(params["Wsa_b"])
    b_heads[0, 128:128 + C] = np_(params["Wcd_b"])
    put("w_heads", w_heads); put("b_heads", b_heads)

    # ---- fwd-lane masks (avoid in-kernel integer mod) ----
    fmask_w = np.zeros((1, 8 * H), np.float32)
    fmask_u = np.zeros((1, GU), np.float32)
    for q in range(4):
        fmask_w[0, q * 2 * H: q * 2 * H + H] = 1.0
        fmask_u[0, q * 8 * H: q * 8 * H + 4 * H] = 1.0
    put("fmask_w", fmask_w); put("fmask_u", fmask_u)

    return jnp.asarray(slab)


# ----------------------------- forward wrapper ----------------------------------------------

def ecpec_forward(slab, x, sen_lengths, mask):
    B, T, D = x.shape
    H = D // 2
    C = N_CLASS
    Bp = ((B + 7) // 8) * 8
    lay, _, _ = _layout(D, H)

    # time-major, batch padded to a sublane multiple, flattened for the hoisted projections
    xt = jnp.transpose(x.astype(jnp.float32), (1, 0, 2))
    xt = jnp.pad(xt, ((0, 0), (0, Bp - B), (0, 0)))
    x2d = xt.reshape(T * Bp, D)

    lens = jnp.pad(sen_lengths.reshape(-1).astype(jnp.int32), (0, Bp - B))
    utt_len = jnp.sum(mask).astype(jnp.int32)
    ints = jnp.stack([lens, jnp.broadcast_to(utt_len, (Bp,))], axis=1).astype(jnp.int32)

    kernel = functools.partial(_ecpec_kernel, T=T, B=B, Bp=Bp, D=D, H=H, C=C,
                               acti=ACTI, lay=lay)
    out = pl.pallas_call(
        kernel,
        out_shape=jax.ShapeDtypeStruct((2 * Bp, 128), jnp.float32),
    )(x2d, ints, slab)

    results_sa = out[0:B, 0:C]
    results_cd = out[Bp:Bp + B, 0:C]
    return results_sa, results_cd


# ----------------------------- deterministic parameter init ----------------------------------

def init_params(key, D, n_class, num_bases=30):
    H = D // 2
    keys = iter(jax.random.split(key, 64))

    def uni(shape, bound):
        return jax.random.uniform(next(keys), shape, jnp.float32, -bound, bound)

    def linear(out_dim, in_dim):
        bound = 1.0 / (in_dim ** 0.5)
        return uni((out_dim, in_dim), bound), uni((out_dim,), bound)

    def lstm_dir(in_dim, hid):
        bound = 1.0 / (hid ** 0.5)
        return (uni((4 * hid, in_dim), bound), uni((4 * hid, hid), bound),
                uni((4 * hid,), bound), uni((4 * hid,), bound))

    we_w, we_b = linear(D, 2 * D)
    wc_w, wc_b = linear(D, 2 * D)
    wsa_w, wsa_b = linear(n_class, 2 * D)
    wcd_w, wcd_b = linear(n_class, 2 * D)

    return {
        "We_w": we_w, "We_b": we_b, "Wc_w": wc_w, "Wc_b": wc_b,
        "Wsa_w": wsa_w, "Wsa_b": wsa_b, "Wcd_w": wcd_w, "Wcd_b": wcd_b,
        "egru_f": lstm_dir(D, H), "egru_b": lstm_dir(D, H),
        "cgru_f": lstm_dir(D, H), "cgru_b": lstm_dir(D, H),
        "wgru": {"l0_f": lstm_dir(D, H), "l0_b": lstm_dir(D, H),
                 "l1_f": lstm_dir(2 * H, H), "l1_b": lstm_dir(2 * H, H)},
        # RGCN (basis decomposition); graph hidden = 2*D so Wsa/Wcd shapes stay valid.
        "rgcn_basis": uni((num_bases, 2 * D, 2 * D), 1.0 / ((2 * D) ** 0.5)),
        "rgcn_comp": uni((2, num_bases), 1.0 / (num_bases ** 0.5)),
        "rgcn_root": uni((2 * D, 2 * D), 1.0 / ((2 * D) ** 0.5)),
        "rgcn_bias": jnp.zeros((2 * D,), jnp.float32),
    }


if __name__ == "__main__":
    key = jax.random.PRNGKey(0)
    k_param, k_x = jax.random.split(key)

    N_UTT, T_WORDS = 6, 5
    params = init_params(k_param, INPUT_DIM, N_CLASS)
    slab = pack_params(params)

    x = jax.random.normal(k_x, (N_UTT, T_WORDS, INPUT_DIM), jnp.float32)
    sen_lengths = jnp.array([[5], [3], [4], [5], [2], [4]], dtype=jnp.int32)
    mask = jnp.ones((1, N_UTT), dtype=jnp.float32)

    fwd = jax.jit(ecpec_forward)
    sa, cd = fwd(slab, x, sen_lengths, mask)
    jax.block_until_ready((sa, cd))

    assert sa.shape == (N_UTT, N_CLASS) and cd.shape == (N_UTT, N_CLASS)
    assert bool(jnp.all(jnp.isfinite(sa))) and bool(jnp.all(jnp.isfinite(cd)))
    assert bool(jnp.allclose(jnp.sum(jnp.exp(sa), axis=1), 1.0, atol=1e-4))
    assert bool(jnp.allclose(jnp.sum(jnp.exp(cd), axis=1), 1.0, atol=1e-4))
    print("KERNEL_OK")
</pallas_src>

<mosaic_0001>
module attributes {stable_mosaic.version = 11 : i64} {
  func.func @_ecpec_kernel(%arg0: memref<40x16xf32, #tpu.memory_space<vmem>>, %arg1: memref<8x2xi32, #tpu.memory_space<vmem>>, %arg2: memref<352x256xf32, #tpu.memory_space<vmem>>, %arg3: memref<16x128xf32, #tpu.memory_space<vmem>>) attributes {dimension_semantics = [], scalar_prefetch = 0 : i64, scratch_operands = 0 : i64, tpu.core_type = #tpu.core_type<tc>} {
    %c0 = arith.constant 0 : index
    %c0_0 = arith.constant 0 : index
    %0 = vector.load %arg1[%c0, %c0_0] : memref<8x2xi32, #tpu.memory_space<vmem>>, vector<8x2xi32>
    %1 = vector.extract_strided_slice %0 {offsets = [0, 0], sizes = [8, 1], strides = [1, 1]} : vector<8x2xi32> to vector<8x1xi32>
    %2 = vector.extract_strided_slice %0 {offsets = [0, 1], sizes = [1, 1], strides = [1, 1]} : vector<8x2xi32> to vector<1x1xi32>
    %c336 = arith.constant 336 : index
    %c0_1 = arith.constant 0 : index
    %3 = vector.load %arg2[%c336, %c0_1] : memref<352x256xf32, #tpu.memory_space<vmem>>, vector<1x64xf32>
    %cst = arith.constant 5.000000e-01 : f32
    %4 = vector.broadcast %cst : f32 to vector<1x64xf32>
    %5 = arith.cmpf ogt, %3, %4 : vector<1x64xf32>
    %6 = tpu.iota {dimensions = array<i32: 1>} : vector<1x16xi32>
    %c8_i32 = arith.constant 8 : i32
    %7 = vector.broadcast %c8_i32 : i32 to vector<1x16xi32>
    %8 = arith.cmpi slt, %6, %7 : vector<1x16xi32>
    %c0_2 = arith.constant 0 : index
    %c0_3 = arith.constant 0 : index
    %9 = vector.load %arg0[%c0_2, %c0_3] : memref<40x16xf32, #tpu.memory_space<vmem>>, vector<40x16xf32>
    %c0_4 = arith.constant 0 : index
    %c0_5 = arith.constant 0 : index
    %10 = vector.load %arg2[%c0_4, %c0_5] : memref<352x256xf32, #tpu.memory_space<vmem>>, vector<16x64xf32>
    %cst_6 = arith.constant dense<0.000000e+00> : vector<40x64xf32>
    %11 = tpu.matmul %9, %10, %cst_6 {dimension_numbers = #tpu.dot_dimension_numbers<[1], [0], [0], [1], [0, 0, 1, 1], [], []>} : vector<40x16xf32>, vector<16x64xf32>, vector<40x64xf32> -> vector<40x64xf32>
    %c32 = arith.constant 32 : index
    %c0_7 = arith.constant 0 : index
    %12 = vector.load %arg2[%c32, %c0_7] : memref<352x256xf32, #tpu.memory_space<vmem>>, vector<1x64xf32>
    %13 = vector.broadcast %12 : vector<1x64xf32> to vector<40x64xf32>
    %14 = arith.addf %11, %13 : vector<40x64xf32>
    %c16 = arith.constant 16 : index
    %c0_8 = arith.constant 0 : index
    %15 = vector.load %arg2[%c16, %c0_8] : memref<352x256xf32, #tpu.memory_space<vmem>>, vector<16x64xf32>
    %cst_9 = arith.constant 0.000000e+00 : f32
    %16 = vector.broadcast %cst_9 : f32 to vector<8x16xf32>
    %cst_10 = arith.constant 0.000000e+00 : f32
    %17 = vector.broadcast %cst_10 : f32 to vector<8x16xf32>
    %18 = vector.extract_strided_slice %14 {offsets = [0, 0], sizes = [8, 64], strides = [1, 1]} : vector<40x64xf32> to vector<8x64xf32>
    %19 = vector.extract_strided_slice %14 {offsets = [32, 0], sizes = [8, 64], strides = [1, 1]} : vector<40x64xf32> to vector<8x64xf32>
    %20 = vector.shape_cast %5 : vector<1x64xi1> to vector<1x64xi1>
    %21 = vector.broadcast %20 : vector<1x64xi1> to vector<8x64xi1>
    %22 = arith.select %21, %18, %19 : vector<8x64xi1>, vector<8x64xf32>
    %cst_11 = arith.constant dense<0.000000e+00> : vector<8x64xf32>
    %23 = tpu.matmul %16, %15, %cst_11 {dimension_numbers = #tpu.dot_dimension_numbers<[1], [0], [0], [1], [0, 0, 1, 1], [], []>} : vector<8x16xf32>, vector<16x64xf32>, vector<8x64xf32> -> vector<8x64xf32>
    %24 = arith.addf %22, %23 : vector<8x64xf32>
    %c0_i32 = arith.constant 0 : i32
    %25 = vector.broadcast %c0_i32 : i32 to vector<8x1xi32>
    %26 = arith.cmpi sgt, %1, %25 : vector<8x1xi32>
    %27 = vector.broadcast %8 : vector<1x16xi1> to vector<8x16xi1>
    %28 = vector.broadcast %26 : vector<8x1xi1> to vector<8x16xi1>
    %29 = arith.andi %27, %28 : vector<8x16xi1>
    %cst_12 = arith.constant dense<true> : vector<1x16xi1>
    %30 = arith.xori %8, %cst_12 : vector<1x16xi1>
    %c4_i32 = arith.constant 4 : i32
    %31 = vector.broadcast %c4_i32 : i32 to vector<8x1xi32>
    %32 = arith.cmpi sgt, %1, %31 : vector<8x1xi32>
    %33 = vector.broadcast %30 : vector<1x16xi1> to vector<8x16xi1>
    %34 = vector.broadcast %32 : vector<8x1xi1> to vector<8x16xi1>
    %35 = arith.andi %33, %34 : vector<8x16xi1>
    %36 = arith.ori %29, %35 : vector<8x16xi1>
    %37 = vector.extract_strided_slice %24 {offsets = [0, 0], sizes = [8, 48], strides = [1, 1]} : vector<8x64xf32> to vector<8x48xf32>
    %38 = arith.negf %37 : vector<8x48xf32>
    %39 = math.exp %38 : vector<8x48xf32>
    %cst_13 = arith.constant 1.000000e+00 : f32
    %40 = vector.broadcast %cst_13 : f32 to vector<8x48xf32>
    %41 = arith.addf %40, %39 : vector<8x48xf32>
    %42 = arith.divf %40, %41 : vector<8x48xf32>
    %43 = vector.extract_strided_slice %24 {offsets = [0, 48], sizes = [8, 16], strides = [1, 1]} : vector<8x64xf32> to vector<8x16xf32>
    %44 = math.tanh %43 : vector<8x16xf32>
    %45 = vector.extract_strided_slice %42 {offsets = [0, 16], sizes = [8, 16], strides = [1, 1]} : vector<8x48xf32> to vector<8x16xf32>
    %46 = arith.mulf %45, %17 : vector<8x16xf32>
    %47 = vector.extract_strided_slice %42 {offsets = [0, 0], sizes = [8, 16], strides = [1, 1]} : vector<8x48xf32> to vector<8x16xf32>
    %48 = arith.mulf %47, %44 : vector<8x16xf32>
    %49 = arith.addf %46, %48 : vector<8x16xf32>
    %50 = vector.extract_strided_slice %42 {offsets = [0, 32], sizes = [8, 16], strides = [1, 1]} : vector<8x48xf32> to vector<8x16xf32>
    %51 = math.tanh %49 : vector<8x16xf32>
    %52 = arith.mulf %50, %51 : vector<8x16xf32>
    %53 = arith.select %36, %52, %16 : vector<8x16xi1>, vector<8x16xf32>
    %54 = arith.select %36, %49, %17 : vector<8x16xi1>, vector<8x16xf32>
    %cst_14 = arith.constant 0.000000e+00 : f32
    %55 = vector.broadcast %cst_14 : f32 to vector<8x16xf32>
    %56 = arith.select %36, %52, %55 : vector<8x16xi1>, vector<8x16xf32>
    %57 = vector.extract_strided_slice %56 {offsets = [0, 0], sizes = [8, 8], strides = [1, 1]} : vector<8x16xf32> to vector<8x8xf32>
    %58 = vector.extract_strided_slice %56 {offsets = [0, 8], sizes = [8, 8], strides = [1, 1]} : vector<8x16xf32> to vector<8x8xf32>
    %59 = vector.extract_strided_slice %14 {offsets = [8, 0], sizes = [8, 64], strides = [1, 1]} : vector<40x64xf32> to vector<8x64xf32>
    %60 = vector.extract_strided_slice %14 {offsets = [24, 0], sizes = [8, 64], strides = [1, 1]} : vector<40x64xf32> to vector<8x64xf32>
    %61 = vector.shape_cast %5 : vector<1x64xi1> to vector<1x64xi1>
    %62 = vector.broadcast %61 : vector<1x64xi1> to vector<8x64xi1>
    %63 = arith.select %62, %59, %60 : vector<8x64xi1>, vector<8x64xf32>
    %cst_15 = arith.constant dense<0.000000e+00> : vector<8x64xf32>
    %64 = tpu.matmul %53, %15, %cst_15 {dimension_numbers = #tpu.dot_dimension_numbers<[1], [0], [0], [1], [0, 0, 1, 1], [], []>} : vector<8x16xf32>, vector<16x64xf32>, vector<8x64xf32> -> vector<8x64xf32>
    %65 = arith.addf %63, %64 : vector<8x64xf32>
    %c1_i32 = arith.constant 1 : i32
    %66 = vector.broadcast %c1_i32 : i32 to vector<8x1xi32>
    %67 = arith.cmpi sgt, %1, %66 : vector<8x1xi32>
    %68 = vector.broadcast %8 : vector<1x16xi1> to vector<8x16xi1>
    %69 = vector.broadcast %67 : vector<8x1xi1> to vector<8x16xi1>
    %70 = arith.andi %68, %69 : vector<8x16xi1>
    %cst_16 = arith.constant dense<true> : vector<1x16xi1>
    %71 = arith.xori %8, %cst_16 : vector<1x16xi1>
    %c3_i32 = arith.constant 3 : i32
    %72 = vector.broadcast %c3_i32 : i32 to vector<8x1xi32>
    %73 = arith.cmpi sgt, %1, %72 : vector<8x1xi32>
    %74 = vector.broadcast %71 : vector<1x16xi1> to vector<8x16xi1>
    %75 = vector.broadcast %73 : vector<8x1xi1> to vector<8x16xi1>
    %76 = arith.andi %74, %75 : vector<8x16xi1>
    %77 = arith.ori %70, %76 : vector<8x16xi1>
    %78 = vector.extract_strided_slice %65 {offsets = [0, 0], sizes = [8, 48], strides = [1, 1]} : vector<8x64xf32> to vector<8x48xf32>
    %79 = arith.negf %78 : vector<8x48xf32>
    %80 = math.exp %79 : vector<8x48xf32>
    %cst_17 = arith.constant 1.000000e+00 : f32
    %81 = vector.broadcast %cst_17 : f32 to vector<8x48xf32>
    %82 = arith.addf %81, %80 : vector<8x48xf32>
    %83 = arith.divf %81, %82 : vector<8x48xf32>
    %84 = vector.extract_strided_slice %65 {offsets = [0, 48], sizes = [8, 16], strides = [1, 1]} : vector<8x64xf32> to vector<8x16xf32>
    %85 = math.tanh %84 : vector<8x16xf32>
    %86 = vector.extract_strided_slice %83 {offsets = [0, 16], sizes = [8, 16], strides = [1, 1]} : vector<8x48xf32> to vector<8x16xf32>
    %87 = arith.mulf %86, %54 : vector<8x16xf32>
    %88 = vector.extract_strided_slice %83 {offsets = [0, 0], sizes = [8, 16], strides = [1, 1]} : vector<8x48xf32> to vector<8x16xf32>
    %89 = arith.mulf %88, %85 : vector<8x16xf32>
    %90 = arith.addf %87, %89 : vector<8x16xf32>
    %91 = vector.extract_strided_slice %83 {offsets = [0, 32], sizes = [8, 16], strides = [1, 1]} : vector<8x48xf32> to vector<8x16xf32>
    %92 = math.tanh %90 : vector<8x16xf32>
    %93 = arith.mulf %91, %92 : vector<8x16xf32>
    %94 = arith.select %77, %93, %53 : vector<8x16xi1>, vector<8x16xf32>
    %95 = arith.select %77, %90, %54 : vector<8x16xi1>, vector<8x16xf32>
    %cst_18 = arith.constant 0.000000e+00 : f32
    %96 = vector.broadcast %cst_18 : f32 to vector<8x16xf32>
    %97 = arith.select %77, %93, %96 : vector<8x16xi1>, vector<8x16xf32>
    %98 = vector.extract_strided_slice %97 {offsets = [0, 0], sizes = [8, 8], strides = [1, 1]} : vector<8x16xf32> to vector<8x8xf32>
    %99 = vector.extract_strided_slice %97 {offsets = [0, 8], sizes = [8, 8], strides = [1, 1]} : vector<8x16xf32> to vector<8x8xf32>
    %100 = vector.extract_strided_slice %14 {offsets = [16, 0], sizes = [8, 64], strides = [1, 1]} : vector<40x64xf32> to vector<8x64xf32>
    %101 = vector.extract_strided_slice %14 {offsets = [16, 0], sizes = [8, 64], strides = [1, 1]} : vector<40x64xf32> to vector<8x64xf32>
    %102 = vector.shape_cast %5 : vector<1x64xi1> to vector<1x64xi1>
    %103 = vector.broadcast %102 : vector<1x64xi1> to vector<8x64xi1>
    %104 = arith.select %103, %100, %101 : vector<8x64xi1>, vector<8x64xf32>
    %cst_19 = arith.constant dense<0.000000e+00> : vector<8x64xf32>
    %105 = tpu.matmul %94, %15, %cst_19 {dimension_numbers = #tpu.dot_dimension_numbers<[1], [0], [0], [1], [0, 0, 1, 1], [], []>} : vector<8x16xf32>, vector<16x64xf32>, vector<8x64xf32> -> vector<8x64xf32>
    %106 = arith.addf %104, %105 : vector<8x64xf32>
    %c2_i32 = arith.constant 2 : i32
    %107 = vector.broadcast %c2_i32 : i32 to vector<8x1xi32>
    %108 = arith.cmpi sgt, %1, %107 : vector<8x1xi32>
    %109 = vector.broadcast %8 : vector<1x16xi1> to vector<8x16xi1>
    %110 = vector.broadcast %108 : vector<8x1xi1> to vector<8x16xi1>
    %111 = arith.andi %109, %110 : vector<8x16xi1>
    %cst_20 = arith.constant dense<true> : vector<1x16xi1>
    %112 = arith.xori %8, %cst_20 : vector<1x16xi1>
    %c2_i32_21 = arith.constant 2 : i32
    %113 = vector.broadcast %c2_i32_21 : i32 to vector<8x1xi32>
    %114 = arith.cmpi sgt, %1, %113 : vector<8x1xi32>
    %115 = vector.broadcast %112 : vector<1x16xi1> to vector<8x16xi1>
    %116 = vector.broadcast %114 : vector<8x1xi1> to vector<8x16xi1>
    %117 = arith.andi %115, %116 : vector<8x16xi1>
    %118 = arith.ori %111, %117 : vector<8x16xi1>
    %119 = vector.extract_strided_slice %106 {offsets = [0, 0], sizes = [8, 48], strides = [1, 1]} : vector<8x64xf32> to vector<8x48xf32>
    %120 = arith.negf %119 : vector<8x48xf32>
    %121 = math.exp %120 : vector<8x48xf32>
    %cst_22 = arith.constant 1.000000e+00 : f32
    %122 = vector.broadcast %cst_22 : f32 to vector<8x48xf32>
    %123 = arith.addf %122, %121 : vector<8x48xf32>
    %124 = arith.divf %122, %123 : vector<8x48xf32>
    %125 = vector.extract_strided_slice %106 {offsets = [0, 48], sizes = [8, 16], strides = [1, 1]} : vector<8x64xf32> to vector<8x16xf32>
    %126 = math.tanh %125 : vector<8x16xf32>
    %127 = vector.extract_strided_slice %124 {offsets = [0, 16], sizes = [8, 16], strides = [1, 1]} : vector<8x48xf32> to vector<8x16xf32>
    %128 = arith.mulf %127, %95 : vector<8x16xf32>
    %129 = vector.extract_strided_slice %124 {offsets = [0, 0], sizes = [8, 16], strides = [1, 1]} : vector<8x48xf32> to vector<8x16xf32>
    %130 = arith.mulf %129, %126 : vector<8x16xf32>
    %131 = arith.addf %128, %130 : vector<8x16xf32>
    %132 = vector.extract_strided_slice %124 {offsets = [0, 32], sizes = [8, 16], strides = [1, 1]} : vector<8x48xf32> to vector<8x16xf32>
    %133 = math.tanh %131 : vector<8x16xf32>
    %134 = arith.mulf %132, %133 : vector<8x16xf32>
    %135 = arith.select %118, %134, %94 : vector<8x16xi1>, vector<8x16xf32>
    %136 = arith.select %118, %131, %95 : vector<8x16xi1>, vector<8x16xf32>
    %cst_23 = arith.constant 0.000000e+00 : f32
    %137 = vector.broadcast %cst_23 : f32 to vector<8x16xf32>
    %138 = arith.select %118, %134, %137 : vector<8x16xi1>, vector<8x16xf32>
    %139 = vector.extract_strided_slice %138 {offsets = [0, 0], sizes = [8, 8], strides = [1, 1]} : vector<8x16xf32> to vector<8x8xf32>
    %140 = vector.extract_strided_slice %138 {offsets = [0, 8], sizes = [8, 8], strides = [1, 1]} : vector<8x16xf32> to vector<8x8xf32>
    %141 = vector.extract_strided_slice %14 {offsets = [24, 0], sizes = [8, 64], strides = [1, 1]} : vector<40x64xf32> to vector<8x64xf32>
    %142 = vector.extract_strided_slice %14 {offsets = [8, 0], sizes = [8, 64], strides = [1, 1]} : vector<40x64xf32> to vector<8x64xf32>
    %143 = vector.shape_cast %5 : vector<1x64xi1> to vector<1x64xi1>
    %144 = vector.broadcast %143 : vector<1x64xi1> to vector<8x64xi1>
    %145 = arith.select %144, %141, %142 : vector<8x64xi1>, vector<8x64xf32>
    %cst_24 = arith.constant dense<0.000000e+00> : vector<8x64xf32>
    %146 = tpu.matmul %135, %15, %cst_24 {dimension_numbers = #tpu.dot_dimension_numbers<[1], [0], [0], [1], [0, 0, 1, 1], [], []>} : vector<8x16xf32>, vector<16x64xf32>, vector<8x64xf32> -> vector<8x64xf32>
    %147 = arith.addf %145, %146 : vector<8x64xf32>
    %c3_i32_25 = arith.constant 3 : i32
    %148 = vector.broadcast %c3_i32_25 : i32 to vector<8x1xi32>
    %149 = arith.cmpi sgt, %1, %148 : vector<8x1xi32>
    %150 = vector.broadcast %8 : vector<1x16xi1> to vector<8x16xi1>
    %151 = vector.broadcast %149 : vector<8x1xi1> to vector<8x16xi1>
    %152 = arith.andi %150, %151 : vector<8x16xi1>
    %cst_26 = arith.constant dense<true> : vector<1x16xi1>
    %153 = arith.xori %8, %cst_26 : vector<1x16xi1>
    %c1_i32_27 = arith.constant 1 : i32
    %154 = vector.broadcast %c1_i32_27 : i32 to vector<8x1xi32>
    %155 = arith.cmpi sgt, %1, %154 : vector<8x1xi32>
    %156 = vector.broadcast %153 : vector<1x16xi1> to vector<8x16xi1>
    %157 = vector.broadcast %155 : vector<8x1xi1> to vector<8x16xi1>
    %158 = arith.andi %156, %157 : vector<8x16xi1>
    %159 = arith.ori %152, %158 : vector<8x16xi1>
    %160 = vector.extract_strided_slice %147 {offsets = [0, 0], sizes = [8, 48], strides = [1, 1]} : vector<8x64xf32> to vector<8x48xf32>
    %161 = arith.negf %160 : vector<8x48xf32>
    %162 = math.exp %161 : vector<8x48xf32>
    %cst_28 = arith.constant 1.000000e+00 : f32
    %163 = vector.broadcast %cst_28 : f32 to vector<8x48xf32>
    %164 = arith.addf %163, %162 : vector<8x48xf32>
    %165 = arith.divf %163, %164 : vector<8x48xf32>
    %166 = vector.extract_strided_slice %147 {offsets = [0, 48], sizes = [8, 16], strides = [1, 1]} : vector<8x64xf32> to vector<8x16xf32>
    %167 = math.tanh %166 : vector<8x16xf32>
    %168 = vector.extract_strided_slice %165 {offsets = [0, 16], sizes = [8, 16], strides = [1, 1]} : vector<8x48xf32> to vector<8x16xf32>
    %169 = arith.mulf %168, %136 : vector<8x16xf32>
    %170 = vector.extract_strided_slice %165 {offsets = [0, 0], sizes = [8, 16], strides = [1, 1]} : vector<8x48xf32> to vector<8x16xf32>
    %171 = arith.mulf %170, %167 : vector<8x16xf32>
    %172 = arith.addf %169, %171 : vector<8x16xf32>
    %173 = vector.extract_strided_slice %165 {offsets = [0, 32], sizes = [8, 16], strides = [1, 1]} : vector<8x48xf32> to vector<8x16xf32>
    %174 = math.tanh %172 : vector<8x16xf32>
    %175 = arith.mulf %173, %174 : vector<8x16xf32>
    %176 = arith.select %159, %175, %135 : vector<8x16xi1>, vector<8x16xf32>
    %177 = arith.select %159, %172, %136 : vector<8x16xi1>, vector<8x16xf32>
    %cst_29 = arith.constant 0.000000e+00 : f32
    %178 = vector.broadcast %cst_29 : f32 to vector<8x16xf32>
    %179 = arith.select %159, %175, %178 : vector<8x16xi1>, vector<8x16xf32>
    %180 = vector.extract_strided_slice %179 {offsets = [0, 0], sizes = [8, 8], strides = [1, 1]} : vector<8x16xf32> to vector<8x8xf32>
    %181 = vector.extract_strided_slice %179 {offsets = [0, 8], sizes = [8, 8], strides = [1, 1]} : vector<8x16xf32> to vector<8x8xf32>
    %182 = vector.extract_strided_slice %14 {offsets = [32, 0], sizes = [8, 64], strides = [1, 1]} : vector<40x64xf32> to vector<8x64xf32>
    %183 = vector.extract_strided_slice %14 {offsets = [0, 0], sizes = [8, 64], strides = [1, 1]} : vector<40x64xf32> to vector<8x64xf32>
    %184 = vector.shape_cast %5 : vector<1x64xi1> to vector<1x64xi1>
    %185 = vector.broadcast %184 : vector<1x64xi1> to vector<8x64xi1>
    %186 = arith.select %185, %182, %183 : vector<8x64xi1>, vector<8x64xf32>
    %cst_30 = arith.constant dense<0.000000e+00> : vector<8x64xf32>
    %187 = tpu.matmul %176, %15, %cst_30 {dimension_numbers = #tpu.dot_dimension_numbers<[1], [0], [0], [1], [0, 0, 1, 1], [], []>} : vector<8x16xf32>, vector<16x64xf32>, vector<8x64xf32> -> vector<8x64xf32>
    %188 = arith.addf %186, %187 : vector<8x64xf32>
    %c4_i32_31 = arith.constant 4 : i32
    %189 = vector.broadcast %c4_i32_31 : i32 to vector<8x1xi32>
    %190 = arith.cmpi sgt, %1, %189 : vector<8x1xi32>
    %191 = vector.broadcast %8 : vector<1x16xi1> to vector<8x16xi1>
    %192 = vector.broadcast %190 : vector<8x1xi1> to vector<8x16xi1>
    %193 = arith.andi %191, %192 : vector<8x16xi1>
    %cst_32 = arith.constant dense<true> : vector<1x16xi1>
    %194 = arith.xori %8, %cst_32 : vector<1x16xi1>
    %c0_i32_33 = arith.constant 0 : i32
    %195 = vector.broadcast %c0_i32_33 : i32 to vector<8x1xi32>
    %196 = arith.cmpi sgt, %1, %195 : vector<8x1xi32>
    %197 = vector.broadcast %194 : vector<1x16xi1> to vector<8x16xi1>
    %198 = vector.broadcast %196 : vector<8x1xi1> to vector<8x16xi1>
    %199 = arith.andi %197, %198 : vector<8x16xi1>
    %200 = arith.ori %193, %199 : vector<8x16xi1>
    %201 = vector.extract_strided_slice %188 {offsets = [0, 0], sizes = [8, 48], strides = [1, 1]} : vector<8x64xf32> to vector<8x48xf32>
    %202 = arith.negf %201 : vector<8x48xf32>
    %203 = math.exp %202 : vector<8x48xf32>
    %cst_34 = arith.constant 1.000000e+00 : f32
    %204 = vector.broadcast %cst_34 : f32 to vector<8x48xf32>
    %205 = arith.addf %204, %203 : vector<8x48xf32>
    %206 = arith.divf %204, %205 : vector<8x48xf32>
    %207 = vector.extract_strided_slice %188 {offsets = [0, 48], sizes = [8, 16], strides = [1, 1]} : vector<8x64xf32> to vector<8x16xf32>
    %208 = math.tanh %207 : vector<8x16xf32>
    %209 = vector.extract_strided_slice %206 {offsets = [0, 16], sizes = [8, 16], strides = [1, 1]} : vector<8x48xf32> to vector<8x16xf32>
    %210 = arith.mulf %209, %177 : vector<8x16xf32>
    %211 = vector.extract_strided_slice %206 {offsets = [0, 0], sizes = [8, 16], strides = [1, 1]} : vector<8x48xf32> to vector<8x16xf32>
    %212 = arith.mulf %211, %208 : vector<8x16xf32>
    %213 = arith.addf %210, %212 : vector<8x16xf32>
    %214 = vector.extract_strided_slice %206 {offsets = [0, 32], sizes = [8, 16], strides = [1, 1]} : vector<8x48xf32> to vector<8x16xf32>
    %215 = math.tanh %213 : vector<8x16xf32>
    %216 = arith.mulf %214, %215 : vector<8x16xf32>
    %cst_35 = arith.constant 0.000000e+00 : f32
    %217 = vector.broadcast %cst_35 : f32 to vector<8x16xf32>
    %218 = arith.select %200, %216, %217 : vector<8x16xi1>, vector<8x16xf32>
    %219 = vector.extract_strided_slice %218 {offsets = [0, 0], sizes = [8, 8], strides = [1, 1]} : vector<8x16xf32> to vector<8x8xf32>
    %220 = vector.extract_strided_slice %218 {offsets = [0, 8], sizes = [8, 8], strides = [1, 1]} : vector<8x16xf32> to vector<8x8xf32>
    %221 = tpu.concatenate %57, %98, %139, %180, %219 in 0 : vector<8x8xf32>, vector<8x8xf32>, vector<8x8xf32>, vector<8x8xf32>, vector<8x8xf32> -> vector<40x8xf32>
    %222 = tpu.concatenate %220, %181, %140, %99, %58 in 0 : vector<8x8xf32>, vector<8x8xf32>, vector<8x8xf32>, vector<8x8xf32>, vector<8x8xf32> -> vector<40x8xf32>
    %223 = tpu.concatenate %221, %222 in 1 : vector<40x8xf32>, vector<40x8xf32> -> vector<40x16xf32>
    %c40 = arith.constant 40 : index
    %c0_36 = arith.constant 0 : index
    %224 = vector.load %arg2[%c40, %c0_36] : memref<352x256xf32, #tpu.memory_space<vmem>>, vector<16x64xf32>
    %cst_37 = arith.constant dense<0.000000e+00> : vector<40x64xf32>
    %225 = tpu.matmul %223, %224, %cst_37 {dimension_numbers = #tpu.dot_dimension_numbers<[1], [0], [0], [1], [0, 0, 1, 1], [], []>} : vector<40x16xf32>, vector<16x64xf32>, vector<40x64xf32> -> vector<40x64xf32>
    %c72 = arith.constant 72 : index
    %c0_38 = arith.constant 0 : index
    %226 = vector.load %arg2[%c72, %c0_38] : memref<352x256xf32, #tpu.memory_space<vmem>>, vector<1x64xf32>
    %227 = vector.broadcast %226 : vector<1x64xf32> to vector<40x64xf32>
    %228 = arith.addf %225, %227 : vector<40x64xf32>
    %c56 = arith.constant 56 : index
    %c0_39 = arith.constant 0 : index
    %229 = vector.load %arg2[%c56, %c0_39] : memref<352x256xf32, #tpu.memory_space<vmem>>, vector<16x64xf32>
    %cst_40 = arith.constant 0.000000e+00 : f32
    %230 = vector.broadcast %cst_40 : f32 to vector<8x16xf32>
    %cst_41 = arith.constant 0.000000e+00 : f32
    %231 = vector.broadcast %cst_41 : f32 to vector<8x16xf32>
    %cst_42 = arith.constant 0.000000e+00 : f32
    %232 = vector.broadcast %cst_42 : f32 to vector<8x16xf32>
    %233 = vector.extract_strided_slice %228 {offsets = [0, 0], sizes = [8, 64], strides = [1, 1]} : vector<40x64xf32> to vector<8x64xf32>
    %234 = vector.extract_strided_slice %228 {offsets = [32, 0], sizes = [8, 64], strides = [1, 1]} : vector<40x64xf32> to vector<8x64xf32>
    %235 = vector.shape_cast %5 : vector<1x64xi1> to vector<1x64xi1>
    %236 = vector.broadcast %235 : vector<1x64xi1> to vector<8x64xi1>
    %237 = arith.select %236, %233, %234 : vector<8x64xi1>, vector<8x64xf32>
    %cst_43 = arith.constant dense<0.000000e+00> : vector<8x64xf32>
    %238 = tpu.matmul %230, %229, %cst_43 {dimension_numbers = #tpu.dot_dimension_numbers<[1], [0], [0], [1], [0, 0, 1, 1], [], []>} : vector<8x16xf32>, vector<16x64xf32>, vector<8x64xf32> -> vector<8x64xf32>
    %239 = arith.addf %237, %238 : vector<8x64xf32>
    %c0_i32_44 = arith.constant 0 : i32
    %240 = vector.broadcast %c0_i32_44 : i32 to vector<8x1xi32>
    %241 = arith.cmpi sgt, %1, %240 : vector<8x1xi32>
    %242 = vector.broadcast %8 : vector<1x16xi1> to vector<8x16xi1>
    %243 = vector.broadcast %241 : vector<8x1xi1> to vector<8x16xi1>
    %244 = arith.andi %242, %243 : vector<8x16xi1>
    %cst_45 = arith.constant dense<true> : vector<1x16xi1>
    %245 = arith.xori %8, %cst_45 : vector<1x16xi1>
    %c4_i32_46 = arith.constant 4 : i32
    %246 = vector.broadcast %c4_i32_46 : i32 to vector<8x1xi32>
    %247 = arith.cmpi sgt, %1, %246 : vector<8x1xi32>
    %248 = vector.broadcast %245 : vector<1x16xi1> to vector<8x16xi1>
    %249 = vector.broadcast %247 : vector<8x1xi1> to vector<8x16xi1>
    %250 = arith.andi %248, %249 : vector<8x16xi1>
    %251 = arith.ori %244, %250 : vector<8x16xi1>
    %252 = vector.extract_strided_slice %239 {offsets = [0, 0], sizes = [8, 48], strides = [1, 1]} : vector<8x64xf32> to vector<8x48xf32>
    %253 = arith.negf %252 : vector<8x48xf32>
    %254 = math.exp %253 : vector<8x48xf32>
    %cst_47 = arith.constant 1.000000e+00 : f32
    %255 = vector.broadcast %cst_47 : f32 to vector<8x48xf32>
    %256 = arith.addf %255, %254 : vector<8x48xf32>
    %257 = arith.divf %255, %256 : vector<8x48xf32>
    %258 = vector.extract_strided_slice %239 {offsets = [0, 48], sizes = [8, 16], strides = [1, 1]} : vector<8x64xf32> to vector<8x16xf32>
    %259 = math.tanh %258 : vector<8x16xf32>
    %260 = vector.extract_strided_slice %257 {offsets = [0, 16], sizes = [8, 16], strides = [1, 1]} : vector<8x48xf32> to vector<8x16xf32>
    %261 = arith.mulf %260, %231 : vector<8x16xf32>
    %262 = vector.extract_strided_slice %257 {offsets = [0, 0], sizes = [8, 16], strides = [1, 1]} : vector<8x48xf32> to vector<8x16xf32>
    %263 = arith.mulf %262, %259 : vector<8x16xf32>
    %264 = arith.addf %261, %263 : vector<8x16xf32>
    %265 = vector.extract_strided_slice %257 {offsets = [0, 32], sizes = [8, 16], strides = [1, 1]} : vector<8x48xf32> to vector<8x16xf32>
    %266 = math.tanh %264 : vector<8x16xf32>
    %267 = arith.mulf %265, %266 : vector<8x16xf32>
    %268 = arith.select %251, %267, %230 : vector<8x16xi1>, vector<8x16xf32>
    %269 = arith.select %251, %264, %231 : vector<8x16xi1>, vector<8x16xf32>
    %cst_48 = arith.constant 0.000000e+00 : f32
    %270 = vector.broadcast %cst_48 : f32 to vector<8x16xf32>
    %271 = arith.select %251, %267, %270 : vector<8x16xi1>, vector<8x16xf32>
    %c1_i32_49 = arith.constant 1 : i32
    %272 = vector.broadcast %c1_i32_49 : i32 to vector<8x1xi32>
    %273 = arith.cmpi eq, %1, %272 : vector<8x1xi32>
    %274 = vector.broadcast %8 : vector<1x16xi1> to vector<8x16xi1>
    %275 = vector.broadcast %273 : vector<8x1xi1> to vector<8x16xi1>
    %276 = arith.andi %274, %275 : vector<8x16xi1>
    %cst_50 = arith.constant dense<true> : vector<1x16xi1>
    %277 = arith.xori %8, %cst_50 : vector<1x16xi1>
    %c5_i32 = arith.constant 5 : i32
    %278 = vector.broadcast %c5_i32 : i32 to vector<8x1xi32>
    %279 = arith.cmpi eq, %1, %278 : vector<8x1xi32>
    %280 = vector.broadcast %277 : vector<1x16xi1> to vector<8x16xi1>
    %281 = vector.broadcast %279 : vector<8x1xi1> to vector<8x16xi1>
    %282 = arith.andi %280, %281 : vector<8x16xi1>
    %283 = arith.ori %276, %282 : vector<8x16xi1>
    %284 = arith.select %283, %271, %232 : vector<8x16xi1>, vector<8x16xf32>
    %285 = vector.extract_strided_slice %228 {offsets = [8, 0], sizes = [8, 64], strides = [1, 1]} : vector<40x64xf32> to vector<8x64xf32>
    %286 = vector.extract_strided_slice %228 {offsets = [24, 0], sizes = [8, 64], strides = [1, 1]} : vector<40x64xf32> to vector<8x64xf32>
    %287 = vector.shape_cast %5 : vector<1x64xi1> to vector<1x64xi1>
    %288 = vector.broadcast %287 : vector<1x64xi1> to vector<8x64xi1>
    %289 = arith.select %288, %285, %286 : vector<8x64xi1>, vector<8x64xf32>
    %cst_51 = arith.constant dense<0.000000e+00> : vector<8x64xf32>
    %290 = tpu.matmul %268, %229, %cst_51 {dimension_numbers = #tpu.dot_dimension_numbers<[1], [0], [0], [1], [0, 0, 1, 1], [], []>} : vector<8x16xf32>, vector<16x64xf32>, vector<8x64xf32> -> vector<8x64xf32>
    %291 = arith.addf %289, %290 : vector<8x64xf32>
    %c1_i32_52 = arith.constant 1 : i32
    %292 = vector.broadcast %c1_i32_52 : i32 to vector<8x1xi32>
    %293 = arith.cmpi sgt, %1, %292 : vector<8x1xi32>
    %294 = vector.broadcast %8 : vector<1x16xi1> to vector<8x16xi1>
    %295 = vector.broadcast %293 : vector<8x1xi1> to vector<8x16xi1>
    %296 = arith.andi %294, %295 : vector<8x16xi1>
    %cst_53 = arith.constant dense<true> : vector<1x16xi1>
    %297 = arith.xori %8, %cst_53 : vector<1x16xi1>
    %c3_i32_54 = arith.constant 3 : i32
    %298 = vector.broadcast %c3_i32_54 : i32 to vector<8x1xi32>
    %299 = arith.cmpi sgt, %1, %298 : vector<8x1xi32>
    %300 = vector.broadcast %297 : vector<1x16xi1> to vector<8x16xi1>
    %301 = vector.broadcast %299 : vector<8x1xi1> to vector<8x16xi1>
    %302 = arith.andi %300, %301 : vector<8x16xi1>
    %303 = arith.ori %296, %302 : vector<8x16xi1>
    %304 = vector.extract_strided_slice %291 {offsets = [0, 0], sizes = [8, 48], strides = [1, 1]} : vector<8x64xf32> to vector<8x48xf32>
    %305 = arith.negf %304 : vector<8x48xf32>
    %306 = math.exp %305 : vector<8x48xf32>
    %cst_55 = arith.constant 1.000000e+00 : f32
    %307 = vector.broadcast %cst_55 : f32 to vector<8x48xf32>
    %308 = arith.addf %307, %306 : vector<8x48xf32>
    %309 = arith.divf %307, %308 : vector<8x48xf32>
    %310 = vector.extract_strided_slice %291 {offsets = [0, 48], sizes = [8, 16], strides = [1, 1]} : vector<8x64xf32> to vector<8x16xf32>
    %311 = math.tanh %310 : vector<8x16xf32>
    %312 = vector.extract_strided_slice %309 {offsets = [0, 16], sizes = [8, 16], strides = [1, 1]} : vector<8x48xf32> to vector<8x16xf32>
    %313 = arith.mulf %312, %269 : vector<8x16xf32>
    %314 = vector.extract_strided_slice %309 {offsets = [0, 0], sizes = [8, 16], strides = [1, 1]} : vector<8x48xf32> to vector<8x16xf32>
    %315 = arith.mulf %314, %311 : vector<8x16xf32>
    %316 = arith.addf %313, %315 : vector<8x16xf32>
    %317 = vector.extract_strided_slice %309 {offsets = [0, 32], sizes = [8, 16], strides = [1, 1]} : vector<8x48xf32> to vector<8x16xf32>
    %318 = math.tanh %316 : vector<8x16xf32>
    %319 = arith.mulf %317, %318 : vector<8x16xf32>
    %320 = arith.select %303, %319, %268 : vector<8x16xi1>, vector<8x16xf32>
    %321 = arith.select %303, %316, %269 : vector<8x16xi1>, vector<8x16xf32>
    %cst_56 = arith.constant 0.000000e+00 : f32
    %322 = vector.broadcast %cst_56 : f32 to vector<8x16xf32>
    %323 = arith.select %303, %319, %322 : vector<8x16xi1>, vector<8x16xf32>
    %c2_i32_57 = arith.constant 2 : i32
    %324 = vector.broadcast %c2_i32_57 : i32 to vector<8x1xi32>
    %325 = arith.cmpi eq, %1, %324 : vector<8x1xi32>
    %326 = vector.broadcast %8 : vector<1x16xi1> to vector<8x16xi1>
    %327 = vector.broadcast %325 : vector<8x1xi1> to vector<8x16xi1>
    %328 = arith.andi %326, %327 : vector<8x16xi1>
    %cst_58 = arith.constant dense<true> : vector<1x16xi1>
    %329 = arith.xori %8, %cst_58 : vector<1x16xi1>
    %c4_i32_59 = arith.constant 4 : i32
    %330 = vector.broadcast %c4_i32_59 : i32 to vector<8x1xi32>
    %331 = arith.cmpi eq, %1, %330 : vector<8x1xi32>
    %332 = vector.broadcast %329 : vector<1x16xi1> to vector<8x16xi1>
    %333 = vector.broadcast %331 : vector<8x1xi1> to vector<8x16xi1>
    %334 = arith.andi %332, %333 : vector<8x16xi1>
    %335 = arith.ori %328, %334 : vector<8x16xi1>
    %336 = arith.select %335, %323, %284 : vector<8x16xi1>, vector<8x16xf32>
    %337 = vector.extract_strided_slice %228 {offsets = [16, 0], sizes = [8, 64], strides = [1, 1]} : vector<40x64xf32> to vector<8x64xf32>
    %338 = vector.extract_strided_slice %228 {offsets = [16, 0], sizes = [8, 64], strides = [1, 1]} : vector<40x64xf32> to vector<8x64xf32>
    %339 = vector.shape_cast %5 : vector<1x64xi1> to vector<1x64xi1>
    %340 = vector.broadcast %339 : vector<1x64xi1> to vector<8x64xi1>
    %341 = arith.select %340, %337, %338 : vector<8x64xi1>, vector<8x64xf32>
    %cst_60 = arith.constant dense<0.000000e+00> : vector<8x64xf32>
    %342 = tpu.matmul %320, %229, %cst_60 {dimension_numbers = #tpu.dot_dimension_numbers<[1], [0], [0], [1], [0, 0, 1, 1], [], []>} : vector<8x16xf32>, vector<16x64xf32>, vector<8x64xf32> -> vector<8x64xf32>
    %343 = arith.addf %341, %342 : vector<8x64xf32>
    %c2_i32_61 = arith.constant 2 : i32
    %344 = vector.broadcast %c2_i32_61 : i32 to vector<8x1xi32>
    %345 = arith.cmpi sgt, %1, %344 : vector<8x1xi32>
    %346 = vector.broadcast %8 : vector<1x16xi1> to vector<8x16xi1>
    %347 = vector.broadcast %345 : vector<8x1xi1> to vector<8x16xi1>
    %348 = arith.andi %346, %347 : vector<8x16xi1>
    %cst_62 = arith.constant dense<true> : vector<1x16xi1>
    %349 = arith.xori %8, %cst_62 : vector<1x16xi1>
    %c2_i32_63 = arith.constant 2 : i32
    %350 = vector.broadcast %c2_i32_63 : i32 to vector<8x1xi32>
    %351 = arith.cmpi sgt, %1, %350 : vector<8x1xi32>
    %352 = vector.broadcast %349 : vector<1x16xi1> to vector<8x16xi1>
    %353 = vector.broadcast %351 : vector<8x1xi1> to vector<8x16xi1>
    %354 = arith.andi %352, %353 : vector<8x16xi1>
    %355 = arith.ori %348, %354 : vector<8x16xi1>
    %356 = vector.extract_strided_slice %343 {offsets = [0, 0], sizes = [8, 48], strides = [1, 1]} : vector<8x64xf32> to vector<8x48xf32>
    %357 = arith.negf %356 : vector<8x48xf32>
    %358 = math.exp %357 : vector<8x48xf32>
    %cst_64 = arith.constant 1.000000e+00 : f32
    %359 = vector.broadcast %cst_64 : f32 to vector<8x48xf32>
    %360 = arith.addf %359, %358 : vector<8x48xf32>
    %361 = arith.divf %359, %360 : vector<8x48xf32>
    %362 = vector.extract_strided_slice %343 {offsets = [0, 48], sizes = [8, 16], strides = [1, 1]} : vector<8x64xf32> to vector<8x16xf32>
    %363 = math.tanh %362 : vector<8x16xf32>
    %364 = vector.extract_strided_slice %361 {offsets = [0, 16], sizes = [8, 16], strides = [1, 1]} : vector<8x48xf32> to vector<8x16xf32>
    %365 = arith.mulf %364, %321 : vector<8x16xf32>
    %366 = vector.extract_strided_slice %361 {offsets = [0, 0], sizes = [8, 16], strides = [1, 1]} : vector<8x48xf32> to vector<8x16xf32>
    %367 = arith.mulf %366, %363 : vector<8x16xf32>
    %368 = arith.addf %365, %367 : vector<8x16xf32>
    %369 = vector.extract_strided_slice %361 {offsets = [0, 32], sizes = [8, 16], strides = [1, 1]} : vector<8x48xf32> to vector<8x16xf32>
    %370 = math.tanh %368 : vector<8x16xf32>
    %371 = arith.mulf %369, %370 : vector<8x16xf32>
    %372 = arith.select %355, %371, %320 : vector<8x16xi1>, vector<8x16xf32>
    %373 = arith.select %355, %368, %321 : vector<8x16xi1>, vector<8x16xf32>
    %cst_65 = arith.constant 0.000000e+00 : f32
    %374 = vector.broadcast %cst_65 : f32 to vector<8x16xf32>
    %375 = arith.select %355, %371, %374 : vector<8x16xi1>, vector<8x16xf32>
    %c3_i32_66 = arith.constant 3 : i32
    %376 = vector.broadcast %c3_i32_66 : i32 to vector<8x1xi32>
    %377 = arith.cmpi eq, %1, %376 : vector<8x1xi32>
    %378 = vector.broadcast %8 : vector<1x16xi1> to vector<8x16xi1>
    %379 = vector.broadcast %377 : vector<8x1xi1> to vector<8x16xi1>
    %380 = arith.andi %378, %379 : vector<8x16xi1>
    %cst_67 = arith.constant dense<true> : vector<1x16xi1>
    %381 = arith.xori %8, %cst_67 : vector<1x16xi1>
    %c3_i32_68 = arith.constant 3 : i32
    %382 = vector.broadcast %c3_i32_68 : i32 to vector<8x1xi32>
    %383 = arith.cmpi eq, %1, %382 : vector<8x1xi32>
    %384 = vector.broadcast %381 : vector<1x16xi1> to vector<8x16xi1>
    %385 = vector.broadcast %383 : vector<8x1xi1> to vector<8x16xi1>
    %386 = arith.andi %384, %385 : vector<8x16xi1>
    %387 = arith.ori %380, %386 : vector<8x16xi1>
    %388 = arith.select %387, %375, %336 : vector<8x16xi1>, vector<8x16xf32>
    %389 = vector.extract_strided_slice %228 {offsets = [24, 0], sizes = [8, 64], strides = [1, 1]} : vector<40x64xf32> to vector<8x64xf32>
    %390 = vector.extract_strided_slice %228 {offsets = [8, 0], sizes = [8, 64], strides = [1, 1]} : vector<40x64xf32> to vector<8x64xf32>
    %391 = vector.shape_cast %5 : vector<1x64xi1> to vector<1x64xi1>
    %392 = vector.broadcast %391 : vector<1x64xi1> to vector<8x64xi1>
    %393 = arith.select %392, %389, %390 : vector<8x64xi1>, vector<8x64xf32>
    %cst_69 = arith.constant dense<0.000000e+00> : vector<8x64xf32>
    %394 = tpu.matmul %372, %229, %cst_69 {dimension_numbers = #tpu.dot_dimension_numbers<[1], [0], [0], [1], [0, 0, 1, 1], [], []>} : vector<8x16xf32>, vector<16x64xf32>, vector<8x64xf32> -> vector<8x64xf32>
    %395 = arith.addf %393, %394 : vector<8x64xf32>
    %c3_i32_70 = arith.constant 3 : i32
    %396 = vector.broadcast %c3_i32_70 : i32 to vector<8x1xi32>
    %397 = arith.cmpi sgt, %1, %396 : vector<8x1xi32>
    %398 = vector.broadcast %8 : vector<1x16xi1> to vector<8x16xi1>
    %399 = vector.broadcast %397 : vector<8x1xi1> to vector<8x16xi1>
    %400 = arith.andi %398, %399 : vector<8x16xi1>
    %cst_71 = arith.constant dense<true> : vector<1x16xi1>
    %401 = arith.xori %8, %cst_71 : vector<1x16xi1>
    %c1_i32_72 = arith.constant 1 : i32
    %402 = vector.broadcast %c1_i32_72 : i32 to vector<8x1xi32>
    %403 = arith.cmpi sgt, %1, %402 : vector<8x1xi32>
    %404 = vector.broadcast %401 : vector<1x16xi1> to vector<8x16xi1>
    %405 = vector.broadcast %403 : vector<8x1xi1> to vector<8x16xi1>
    %406 = arith.andi %404, %405 : vector<8x16xi1>
    %407 = arith.ori %400, %406 : vector<8x16xi1>
    %408 = vector.extract_strided_slice %395 {offsets = [0, 0], sizes = [8, 48], strides = [1, 1]} : vector<8x64xf32> to vector<8x48xf32>
    %409 = arith.negf %408 : vector<8x48xf32>
    %410 = math.exp %409 : vector<8x48xf32>
    %cst_73 = arith.constant 1.000000e+00 : f32
    %411 = vector.broadcast %cst_73 : f32 to vector<8x48xf32>
    %412 = arith.addf %411, %410 : vector<8x48xf32>
    %413 = arith.divf %411, %412 : vector<8x48xf32>
    %414 = vector.extract_strided_slice %395 {offsets = [0, 48], sizes = [8, 16], strides = [1, 1]} : vector<8x64xf32> to vector<8x16xf32>
    %415 = math.tanh %414 : vector<8x16xf32>
    %416 = vector.extract_strided_slice %413 {offsets = [0, 16], sizes = [8, 16], strides = [1, 1]} : vector<8x48xf32> to vector<8x16xf32>
    %417 = arith.mulf %416, %373 : vector<8x16xf32>
    %418 = vector.extract_strided_slice %413 {offsets = [0, 0], sizes = [8, 16], strides = [1, 1]} : vector<8x48xf32> to vector<8x16xf32>
    %419 = arith.mulf %418, %415 : vector<8x16xf32>
    %420 = arith.addf %417, %419 : vector<8x16xf32>
    %421 = vector.extract_strided_slice %413 {offsets = [0, 32], sizes = [8, 16], strides = [1, 1]} : vector<8x48xf32> to vector<8x16xf32>
    %422 = math.tanh %420 : vector<8x16xf32>
    %423 = arith.mulf %421, %422 : vector<8x16xf32>
    %424 = arith.select %407, %423, %372 : vector<8x16xi1>, vector<8x16xf32>
    %425 = arith.select %407, %420, %373 : vector<8x16xi1>, vector<8x16xf32>
    %cst_74 = arith.constant 0.000000e+00 : f32
    %426 = vector.broadcast %cst_74 : f32 to vector<8x16xf32>
    %427 = arith.select %407, %423, %426 : vector<8x16xi1>, vector<8x16xf32>
    %c4_i32_75 = arith.constant 4 : i32
    %428 = vector.broadcast %c4_i32_75 : i32 to vector<8x1xi32>
    %429 = arith.cmpi eq, %1, %428 : vector<8x1xi32>
    %430 = vector.broadcast %8 : vector<1x16xi1> to vector<8x16xi1>
    %431 = vector.broadcast %429 : vector<8x1xi1> to vector<8x16xi1>
    %432 = arith.andi %430, %431 : vector<8x16xi1>
    %cst_76 = arith.constant dense<true> : vector<1x16xi1>
    %433 = arith.xori %8, %cst_76 : vector<1x16xi1>
    %c2_i32_77 = arith.constant 2 : i32
    %434 = vector.broadcast %c2_i32_77 : i32 to vector<8x1xi32>
    %435 = arith.cmpi eq, %1, %434 : vector<8x1xi32>
    %436 = vector.broadcast %433 : vector<1x16xi1> to vector<8x16xi1>
    %437 = vector.broadcast %435 : vector<8x1xi1> to vector<8x16xi1>
    %438 = arith.andi %436, %437 : vector<8x16xi1>
    %439 = arith.ori %432, %438 : vector<8x16xi1>
    %440 = arith.select %439, %427, %388 : vector<8x16xi1>, vector<8x16xf32>
    %441 = vector.extract_strided_slice %228 {offsets = [32, 0], sizes = [8, 64], strides = [1, 1]} : vector<40x64xf32> to vector<8x64xf32>
    %442 = vector.extract_strided_slice %228 {offsets = [0, 0], sizes = [8, 64], strides = [1, 1]} : vector<40x64xf32> to vector<8x64xf32>
    %443 = vector.shape_cast %5 : vector<1x64xi1> to vector<1x64xi1>
    %444 = vector.broadcast %443 : vector<1x64xi1> to vector<8x64xi1>
    %445 = arith.select %444, %441, %442 : vector<8x64xi1>, vector<8x64xf32>
    %cst_78 = arith.constant dense<0.000000e+00> : vector<8x64xf32>
    %446 = tpu.matmul %424, %229, %cst_78 {dimension_numbers = #tpu.dot_dimension_numbers<[1], [0], [0], [1], [0, 0, 1, 1], [], []>} : vector<8x16xf32>, vector<16x64xf32>, vector<8x64xf32> -> vector<8x64xf32>
    %447 = arith.addf %445, %446 : vector<8x64xf32>
    %c4_i32_79 = arith.constant 4 : i32
    %448 = vector.broadcast %c4_i32_79 : i32 to vector<8x1xi32>
    %449 = arith.cmpi sgt, %1, %448 : vector<8x1xi32>
    %450 = vector.broadcast %8 : vector<1x16xi1> to vector<8x16xi1>
    %451 = vector.broadcast %449 : vector<8x1xi1> to vector<8x16xi1>
    %452 = arith.andi %450, %451 : vector<8x16xi1>
    %cst_80 = arith.constant dense<true> : vector<1x16xi1>
    %453 = arith.xori %8, %cst_80 : vector<1x16xi1>
    %c0_i32_81 = arith.constant 0 : i32
    %454 = vector.broadcast %c0_i32_81 : i32 to vector<8x1xi32>
    %455 = arith.cmpi sgt, %1, %454 : vector<8x1xi32>
    %456 = vector.broadcast %453 : vector<1x16xi1> to vector<8x16xi1>
    %457 = vector.broadcast %455 : vector<8x1xi1> to vector<8x16xi1>
    %458 = arith.andi %456, %457 : vector<8x16xi1>
    %459 = arith.ori %452, %458 : vector<8x16xi1>
    %460 = vector.extract_strided_slice %447 {offsets = [0, 0], sizes = [8, 48], strides = [1, 1]} : vector<8x64xf32> to vector<8x48xf32>
    %461 = arith.negf %460 : vector<8x48xf32>
    %462 = math.exp %461 : vector<8x48xf32>
    %cst_82 = arith.constant 1.000000e+00 : f32
    %463 = vector.broadcast %cst_82 : f32 to vector<8x48xf32>
    %464 = arith.addf %463, %462 : vector<8x48xf32>
    %465 = arith.divf %463, %464 : vector<8x48xf32>
    %466 = vector.extract_strided_slice %447 {offsets = [0, 48], sizes = [8, 16], strides = [1, 1]} : vector<8x64xf32> to vector<8x16xf32>
    %467 = math.tanh %466 : vector<8x16xf32>
    %468 = vector.extract_strided_slice %465 {offsets = [0, 16], sizes = [8, 16], strides = [1, 1]} : vector<8x48xf32> to vector<8x16xf32>
    %469 = arith.mulf %468, %425 : vector<8x16xf32>
    %470 = vector.extract_strided_slice %465 {offsets = [0, 0], sizes = [8, 16], strides = [1, 1]} : vector<8x48xf32> to vector<8x16xf32>
    %471 = arith.mulf %470, %467 : vector<8x16xf32>
    %472 = arith.addf %469, %471 : vector<8x16xf32>
    %473 = vector.extract_strided_slice %465 {offsets = [0, 32], sizes = [8, 16], strides = [1, 1]} : vector<8x48xf32> to vector<8x16xf32>
    %474 = math.tanh %472 : vector<8x16xf32>
    %475 = arith.mulf %473, %474 : vector<8x16xf32>
    %cst_83 = arith.constant 0.000000e+00 : f32
    %476 = vector.broadcast %cst_83 : f32 to vector<8x16xf32>
    %477 = arith.select %459, %475, %476 : vector<8x16xi1>, vector<8x16xf32>
    %c5_i32_84 = arith.constant 5 : i32
    %478 = vector.broadcast %c5_i32_84 : i32 to vector<8x1xi32>
    %479 = arith.cmpi eq, %1, %478 : vector<8x1xi32>
    %480 = vector.broadcast %8 : vector<1x16xi1> to vector<8x16xi1>
    %481 = vector.broadcast %479 : vector<8x1xi1> to vector<8x16xi1>
    %482 = arith.andi %480, %481 : vector<8x16xi1>
    %cst_85 = arith.constant dense<true> : vector<1x16xi1>
    %483 = arith.xori %8, %cst_85 : vector<1x16xi1>
    %c1_i32_86 = arith.constant 1 : i32
    %484 = vector.broadcast %c1_i32_86 : i32 to vector<8x1xi32>
    %485 = arith.cmpi eq, %1, %484 : vector<8x1xi32>
    %486 = vector.broadcast %483 : vector<1x16xi1> to vector<8x16xi1>
    %487 = vector.broadcast %485 : vector<8x1xi1> to vector<8x16xi1>
    %488 = arith.andi %486, %487 : vector<8x16xi1>
    %489 = arith.ori %482, %488 : vector<8x16xi1>
    %490 = arith.select %489, %477, %440 : vector<8x16xi1>, vector<8x16xf32>
    %491 = tpu.iota {dimensions = array<i32: 0>} : vector<8x8xi32>
    %492 = tpu.iota {dimensions = array<i32: 1>} : vector<8x8xi32>
    %c6_i32 = arith.constant 6 : i32
    %493 = vector.broadcast %c6_i32 : i32 to vector<8x8xi32>
    %494 = arith.cmpi slt, %491, %493 : vector<8x8xi32>
    %c1_i32_87 = arith.constant 1 : i32
    %495 = vector.broadcast %c1_i32_87 : i32 to vector<8x8xi32>
    %496 = arith.subi %491, %495 : vector<8x8xi32>
    %c0_i32_88 = arith.constant 0 : i32
    %497 = vector.broadcast %c0_i32_88 : i32 to vector<8x8xi32>
    %498 = arith.maxsi %496, %497 : vector<8x8xi32>
    %499 = arith.cmpi eq, %492, %498 : vector<8x8xi32>
    %500 = arith.andi %499, %494 : vector<8x8xi1>
    %cst_89 = arith.constant 1.000000e+00 : f32
    %cst_90 = arith.constant 0.000000e+00 : f32
    %501 = vector.broadcast %cst_89 : f32 to vector<8x8xf32>
    %502 = vector.broadcast %cst_90 : f32 to vector<8x8xf32>
    %503 = arith.select %500, %501, %502 : vector<8x8xi1>, vector<8x8xf32>
    %504 = vector.broadcast %2 : vector<1x1xi32> to vector<8x8xi32>
    %505 = arith.cmpi slt, %491, %504 : vector<8x8xi32>
    %c1_i32_91 = arith.constant 1 : i32
    %506 = vector.broadcast %c1_i32_91 : i32 to vector<1x1xi32>
    %507 = arith.subi %2, %506 : vector<1x1xi32>
    %508 = vector.broadcast %507 : vector<1x1xi32> to vector<8x8xi32>
    %509 = arith.subi %508, %491 : vector<8x8xi32>
    %510 = arith.select %505, %509, %491 : vector<8x8xi1>, vector<8x8xi32>
    %511 = arith.cmpi eq, %492, %510 : vector<8x8xi32>
    %512 = arith.andi %511, %494 : vector<8x8xi1>
    %cst_92 = arith.constant 1.000000e+00 : f32
    %cst_93 = arith.constant 0.000000e+00 : f32
    %513 = vector.broadcast %cst_92 : f32 to vector<8x8xf32>
    %514 = vector.broadcast %cst_93 : f32 to vector<8x8xf32>
    %515 = arith.select %512, %513, %514 : vector<8x8xi1>, vector<8x8xf32>
    %cst_94 = arith.constant dense<0.000000e+00> : vector<8x16xf32>
    %516 = tpu.matmul %515, %490, %cst_94 {dimension_numbers = #tpu.dot_dimension_numbers<[1], [0], [0], [1], [0, 0, 1, 1], [], []>} : vector<8x8xf32>, vector<8x16xf32>, vector<8x16xf32> -> vector<8x16xf32>
    %517 = tpu.concatenate %490, %516 in 1 : vector<8x16xf32>, vector<8x16xf32> -> vector<8x32xf32>
    %cst_95 = arith.constant dense<0.000000e+00> : vector<8x32xf32>
    %518 = tpu.matmul %503, %517, %cst_95 {dimension_numbers = #tpu.dot_dimension_numbers<[1], [0], [0], [1], [0, 0, 1, 1], [], []>} : vector<8x8xf32>, vector<8x32xf32>, vector<8x32xf32> -> vector<8x32xf32>
    %519 = vector.extract_strided_slice %518 {offsets = [0, 0], sizes = [8, 16], strides = [1, 1]} : vector<8x32xf32> to vector<8x16xf32>
    %520 = vector.extract_strided_slice %518 {offsets = [0, 16], sizes = [8, 16], strides = [1, 1]} : vector<8x32xf32> to vector<8x16xf32>
    %c80 = arith.constant 80 : index
    %c0_96 = arith.constant 0 : index
    %521 = vector.load %arg2[%c80, %c0_96] : memref<352x256xf32, #tpu.memory_space<vmem>>, vector<16x32xf32>
    %c96 = arith.constant 96 : index
    %c0_97 = arith.constant 0 : index
    %522 = vector.load %arg2[%c96, %c0_97] : memref<352x256xf32, #tpu.memory_space<vmem>>, vector<16x32xf32>
    %c112 = arith.constant 112 : index
    %c0_98 = arith.constant 0 : index
    %523 = vector.load %arg2[%c112, %c0_98] : memref<352x256xf32, #tpu.memory_space<vmem>>, vector<1x32xf32>
    %cst_99 = arith.constant dense<0.000000e+00> : vector<8x32xf32>
    %524 = tpu.matmul %519, %521, %cst_99 {dimension_numbers = #tpu.dot_dimension_numbers<[1], [0], [0], [1], [0, 0, 1, 1], [], []>} : vector<8x16xf32>, vector<16x32xf32>, vector<8x32xf32> -> vector<8x32xf32>
    %cst_100 = arith.constant dense<0.000000e+00> : vector<8x32xf32>
    %525 = tpu.matmul %490, %522, %cst_100 {dimension_numbers = #tpu.dot_dimension_numbers<[1], [0], [0], [1], [0, 0, 1, 1], [], []>} : vector<8x16xf32>, vector<16x32xf32>, vector<8x32xf32> -> vector<8x32xf32>
    %526 = arith.addf %524, %525 : vector<8x32xf32>
    %527 = vector.broadcast %523 : vector<1x32xf32> to vector<8x32xf32>
    %528 = arith.addf %526, %527 : vector<8x32xf32>
    %cst_101 = arith.constant 0.000000e+00 : f32
    %529 = vector.broadcast %cst_101 : f32 to vector<8x32xf32>
    %530 = arith.maximumf %528, %529 : vector<8x32xf32>
    %cst_102 = arith.constant dense<0.000000e+00> : vector<8x32xf32>
    %531 = tpu.matmul %520, %521, %cst_102 {dimension_numbers = #tpu.dot_dimension_numbers<[1], [0], [0], [1], [0, 0, 1, 1], [], []>} : vector<8x16xf32>, vector<16x32xf32>, vector<8x32xf32> -> vector<8x32xf32>
    %cst_103 = arith.constant dense<0.000000e+00> : vector<8x32xf32>
    %532 = tpu.matmul %516, %522, %cst_103 {dimension_numbers = #tpu.dot_dimension_numbers<[1], [0], [0], [1], [0, 0, 1, 1], [], []>} : vector<8x16xf32>, vector<16x32xf32>, vector<8x32xf32> -> vector<8x32xf32>
    %533 = arith.addf %531, %532 : vector<8x32xf32>
    %534 = vector.broadcast %523 : vector<1x32xf32> to vector<8x32xf32>
    %535 = arith.addf %533, %534 : vector<8x32xf32>
    %cst_104 = arith.constant 0.000000e+00 : f32
    %536 = vector.broadcast %cst_104 : f32 to vector<8x32xf32>
    %537 = arith.maximumf %535, %536 : vector<8x32xf32>
    %c344 = arith.constant 344 : index
    %c0_105 = arith.constant 0 : index
    %538 = vector.load %arg2[%c344, %c0_105] : memref<352x256xf32, #tpu.memory_space<vmem>>, vector<1x256xf32>
    %cst_106 = arith.constant 5.000000e-01 : f32
    %539 = vector.broadcast %cst_106 : f32 to vector<1x256xf32>
    %540 = arith.cmpf ogt, %538, %539 : vector<1x256xf32>
    %c120 = arith.constant 120 : index
    %c0_107 = arith.constant 0 : index
    %541 = vector.load %arg2[%c120, %c0_107] : memref<352x256xf32, #tpu.memory_space<vmem>>, vector<32x256xf32>
    %cst_108 = arith.constant dense<0.000000e+00> : vector<8x256xf32>
    %542 = tpu.matmul %530, %541, %cst_108 {dimension_numbers = #tpu.dot_dimension_numbers<[1], [0], [0], [1], [0, 0, 1, 1], [], []>} : vector<8x32xf32>, vector<32x256xf32>, vector<8x256xf32> -> vector<8x256xf32>
    %c152 = arith.constant 152 : index
    %c0_109 = arith.constant 0 : index
    %543 = vector.load %arg2[%c152, %c0_109] : memref<352x256xf32, #tpu.memory_space<vmem>>, vector<32x256xf32>
    %cst_110 = arith.constant dense<0.000000e+00> : vector<8x256xf32>
    %544 = tpu.matmul %537, %543, %cst_110 {dimension_numbers = #tpu.dot_dimension_numbers<[1], [0], [0], [1], [0, 0, 1, 1], [], []>} : vector<8x32xf32>, vector<32x256xf32>, vector<8x256xf32> -> vector<8x256xf32>
    %545 = arith.addf %542, %544 : vector<8x256xf32>
    %c184 = arith.constant 184 : index
    %c0_111 = arith.constant 0 : index
    %546 = vector.load %arg2[%c184, %c0_111] : memref<352x256xf32, #tpu.memory_space<vmem>>, vector<1x256xf32>
    %547 = vector.broadcast %546 : vector<1x256xf32> to vector<8x256xf32>
    %548 = arith.addf %545, %547 : vector<8x256xf32>
    %c192 = arith.constant 192 : index
    %c0_112 = arith.constant 0 : index
    %549 = vector.load %arg2[%c192, %c0_112] : memref<352x256xf32, #tpu.memory_space<vmem>>, vector<64x256xf32>
    %cst_113 = arith.constant 0.000000e+00 : f32
    %550 = vector.broadcast %cst_113 : f32 to vector<1x64xf32>
    %cst_114 = arith.constant 0.000000e+00 : f32
    %551 = vector.broadcast %cst_114 : f32 to vector<1x64xf32>
    %552 = vector.extract_strided_slice %548 {offsets = [0, 0], sizes = [1, 256], strides = [1, 1]} : vector<8x256xf32> to vector<1x256xf32>
    %553 = vector.extract_strided_slice %548 {offsets = [5, 0], sizes = [1, 256], strides = [1, 1]} : vector<8x256xf32> to vector<1x256xf32>
    %554 = arith.select %540, %552, %553 : vector<1x256xi1>, vector<1x256xf32>
    %cst_115 = arith.constant dense<0.000000e+00> : vector<1x256xf32>
    %555 = tpu.matmul %550, %549, %cst_115 {dimension_numbers = #tpu.dot_dimension_numbers<[1], [0], [0], [1], [0, 0, 1, 1], [], []>} : vector<1x64xf32>, vector<64x256xf32>, vector<1x256xf32> -> vector<1x256xf32>
    %556 = arith.addf %554, %555 : vector<1x256xf32>
    %557 = vector.extract_strided_slice %556 {offsets = [0, 0], sizes = [1, 192], strides = [1, 1]} : vector<1x256xf32> to vector<1x192xf32>
    %558 = arith.negf %557 : vector<1x192xf32>
    %559 = math.exp %558 : vector<1x192xf32>
    %cst_116 = arith.constant 1.000000e+00 : f32
    %560 = vector.broadcast %cst_116 : f32 to vector<1x192xf32>
    %561 = arith.addf %560, %559 : vector<1x192xf32>
    %562 = arith.divf %560, %561 : vector<1x192xf32>
    %563 = vector.extract_strided_slice %556 {offsets = [0, 192], sizes = [1, 64], strides = [1, 1]} : vector<1x256xf32> to vector<1x64xf32>
    %564 = math.tanh %563 : vector<1x64xf32>
    %565 = vector.extract_strided_slice %562 {offsets = [0, 64], sizes = [1, 64], strides = [1, 1]} : vector<1x192xf32> to vector<1x64xf32>
    %566 = arith.mulf %565, %551 : vector<1x64xf32>
    %567 = vector.extract_strided_slice %562 {offsets = [0, 0], sizes = [1, 64], strides = [1, 1]} : vector<1x192xf32> to vector<1x64xf32>
    %568 = arith.mulf %567, %564 : vector<1x64xf32>
    %569 = arith.addf %566, %568 : vector<1x64xf32>
    %570 = vector.extract_strided_slice %562 {offsets = [0, 128], sizes = [1, 64], strides = [1, 1]} : vector<1x192xf32> to vector<1x64xf32>
    %571 = math.tanh %569 : vector<1x64xf32>
    %572 = arith.mulf %570, %571 : vector<1x64xf32>
    %573 = vector.extract_strided_slice %572 {offsets = [0, 0], sizes = [1, 32], strides = [1, 1]} : vector<1x64xf32> to vector<1x32xf32>
    %574 = vector.extract_strided_slice %572 {offsets = [0, 32], sizes = [1, 32], strides = [1, 1]} : vector<1x64xf32> to vector<1x32xf32>
    %575 = vector.extract_strided_slice %548 {offsets = [1, 0], sizes = [1, 256], strides = [1, 1]} : vector<8x256xf32> to vector<1x256xf32>
    %576 = vector.extract_strided_slice %548 {offsets = [4, 0], sizes = [1, 256], strides = [1, 1]} : vector<8x256xf32> to vector<1x256xf32>
    %577 = arith.select %540, %575, %576 : vector<1x256xi1>, vector<1x256xf32>
    %cst_117 = arith.constant dense<0.000000e+00> : vector<1x256xf32>
    %578 = tpu.matmul %572, %549, %cst_117 {dimension_numbers = #tpu.dot_dimension_numbers<[1], [0], [0], [1], [0, 0, 1, 1], [], []>} : vector<1x64xf32>, vector<64x256xf32>, vector<1x256xf32> -> vector<1x256xf32>
    %579 = arith.addf %577, %578 : vector<1x256xf32>
    %580 = vector.extract_strided_slice %579 {offsets = [0, 0], sizes = [1, 192], strides = [1, 1]} : vector<1x256xf32> to vector<1x192xf32>
    %581 = arith.negf %580 : vector<1x192xf32>
    %582 = math.exp %581 : vector<1x192xf32>
    %cst_118 = arith.constant 1.000000e+00 : f32
    %583 = vector.broadcast %cst_118 : f32 to vector<1x192xf32>
    %584 = arith.addf %583, %582 : vector<1x192xf32>
    %585 = arith.divf %583, %584 : vector<1x192xf32>
    %586 = vector.extract_strided_slice %579 {offsets = [0, 192], sizes = [1, 64], strides = [1, 1]} : vector<1x256xf32> to vector<1x64xf32>
    %587 = math.tanh %586 : vector<1x64xf32>
    %588 = vector.extract_strided_slice %585 {offsets = [0, 64], sizes = [1, 64], strides = [1, 1]} : vector<1x192xf32> to vector<1x64xf32>
    %589 = arith.mulf %588, %569 : vector<1x64xf32>
    %590 = vector.extract_strided_slice %585 {offsets = [0, 0], sizes = [1, 64], strides = [1, 1]} : vector<1x192xf32> to vector<1x64xf32>
    %591 = arith.mulf %590, %587 : vector<1x64xf32>
    %592 = arith.addf %589, %591 : vector<1x64xf32>
    %593 = vector.extract_strided_slice %585 {offsets = [0, 128], sizes = [1, 64], strides = [1, 1]} : vector<1x192xf32> to vector<1x64xf32>
    %594 = math.tanh %592 : vector<1x64xf32>
    %595 = arith.mulf %593, %594 : vector<1x64xf32>
    %596 = vector.extract_strided_slice %595 {offsets = [0, 0], sizes = [1, 32], strides = [1, 1]} : vector<1x64xf32> to vector<1x32xf32>
    %597 = vector.extract_strided_slice %595 {offsets = [0, 32], sizes = [1, 32], strides = [1, 1]} : vector<1x64xf32> to vector<1x32xf32>
    %598 = vector.extract_strided_slice %548 {offsets = [2, 0], sizes = [1, 256], strides = [1, 1]} : vector<8x256xf32> to vector<1x256xf32>
    %599 = vector.extract_strided_slice %548 {offsets = [3, 0], sizes = [1, 256], strides = [1, 1]} : vector<8x256xf32> to vector<1x256xf32>
    %600 = arith.select %540, %598, %599 : vector<1x256xi1>, vector<1x256xf32>
    %cst_119 = arith.constant dense<0.000000e+00> : vector<1x256xf32>
    %601 = tpu.matmul %595, %549, %cst_119 {dimension_numbers = #tpu.dot_dimension_numbers<[1], [0], [0], [1], [0, 0, 1, 1], [], []>} : vector<1x64xf32>, vector<64x256xf32>, vector<1x256xf32> -> vector<1x256xf32>
    %602 = arith.addf %600, %601 : vector<1x256xf32>
    %603 = vector.extract_strided_slice %602 {offsets = [0, 0], sizes = [1, 192], strides = [1, 1]} : vector<1x256xf32> to vector<1x192xf32>
    %604 = arith.negf %603 : vector<1x192xf32>
    %605 = math.exp %604 : vector<1x192xf32>
    %cst_120 = arith.constant 1.000000e+00 : f32
    %606 = vector.broadcast %cst_120 : f32 to vector<1x192xf32>
    %607 = arith.addf %606, %605 : vector<1x192xf32>
    %608 = arith.divf %606, %607 : vector<1x192xf32>
    %609 = vector.extract_strided_slice %602 {offsets = [0, 192], sizes = [1, 64], strides = [1, 1]} : vector<1x256xf32> to vector<1x64xf32>
    %610 = math.tanh %609 : vector<1x64xf32>
    %611 = vector.extract_strided_slice %608 {offsets = [0, 64], sizes = [1, 64], strides = [1, 1]} : vector<1x192xf32> to vector<1x64xf32>
    %612 = arith.mulf %611, %592 : vector<1x64xf32>
    %613 = vector.extract_strided_slice %608 {offsets = [0, 0], sizes = [1, 64], strides = [1, 1]} : vector<1x192xf32> to vector<1x64xf32>
    %614 = arith.mulf %613, %610 : vector<1x64xf32>
    %615 = arith.addf %612, %614 : vector<1x64xf32>
    %616 = vector.extract_strided_slice %608 {offsets = [0, 128], sizes = [1, 64], strides = [1, 1]} : vector<1x192xf32> to vector<1x64xf32>
    %617 = math.tanh %615 : vector<1x64xf32>
    %618 = arith.mulf %616, %617 : vector<1x64xf32>
    %619 = vector.extract_strided_slice %618 {offsets = [0, 0], sizes = [1, 32], strides = [1, 1]} : vector<1x64xf32> to vector<1x32xf32>
    %620 = vector.extract_strided_slice %618 {offsets = [0, 32], sizes = [1, 32], strides = [1, 1]} : vector<1x64xf32> to vector<1x32xf32>
    %621 = vector.extract_strided_slice %548 {offsets = [3, 0], sizes = [1, 256], strides = [1, 1]} : vector<8x256xf32> to vector<1x256xf32>
    %622 = vector.extract_strided_slice %548 {offsets = [2, 0], sizes = [1, 256], strides = [1, 1]} : vector<8x256xf32> to vector<1x256xf32>
    %623 = arith.select %540, %621, %622 : vector<1x256xi1>, vector<1x256xf32>
    %cst_121 = arith.constant dense<0.000000e+00> : vector<1x256xf32>
    %624 = tpu.matmul %618, %549, %cst_121 {dimension_numbers = #tpu.dot_dimension_numbers<[1], [0], [0], [1], [0, 0, 1, 1], [], []>} : vector<1x64xf32>, vector<64x256xf32>, vector<1x256xf32> -> vector<1x256xf32>
    %625 = arith.addf %623, %624 : vector<1x256xf32>
    %626 = vector.extract_strided_slice %625 {offsets = [0, 0], sizes = [1, 192], strides = [1, 1]} : vector<1x256xf32> to vector<1x192xf32>
    %627 = arith.negf %626 : vector<1x192xf32>
    %628 = math.exp %627 : vector<1x192xf32>
    %cst_122 = arith.constant 1.000000e+00 : f32
    %629 = vector.broadcast %cst_122 : f32 to vector<1x192xf32>
    %630 = arith.addf %629, %628 : vector<1x192xf32>
    %631 = arith.divf %629, %630 : vector<1x192xf32>
    %632 = vector.extract_strided_slice %625 {offsets = [0, 192], sizes = [1, 64], strides = [1, 1]} : vector<1x256xf32> to vector<1x64xf32>
    %633 = math.tanh %632 : vector<1x64xf32>
    %634 = vector.extract_strided_slice %631 {offsets = [0, 64], sizes = [1, 64], strides = [1, 1]} : vector<1x192xf32> to vector<1x64xf32>
    %635 = arith.mulf %634, %615 : vector<1x64xf32>
    %636 = vector.extract_strided_slice %631 {offsets = [0, 0], sizes = [1, 64], strides = [1, 1]} : vector<1x192xf32> to vector<1x64xf32>
    %637 = arith.mulf %636, %633 : vector<1x64xf32>
    %638 = arith.addf %635, %637 : vector<1x64xf32>
    %639 = vector.extract_strided_slice %631 {offsets = [0, 128], sizes = [1, 64], strides = [1, 1]} : vector<1x192xf32> to vector<1x64xf32>
    %640 = math.tanh %638 : vector<1x64xf32>
    %641 = arith.mulf %639, %640 : vector<1x64xf32>
    %642 = vector.extract_strided_slice %641 {offsets = [0, 0], sizes = [1, 32], strides = [1, 1]} : vector<1x64xf32> to vector<1x32xf32>
    %643 = vector.extract_strided_slice %641 {offsets = [0, 32], sizes = [1, 32], strides = [1, 1]} : vector<1x64xf32> to vector<1x32xf32>
    %644 = vector.extract_strided_slice %548 {offsets = [4, 0], sizes = [1, 256], strides = [1, 1]} : vector<8x256xf32> to vector<1x256xf32>
    %645 = vector.extract_strided_slice %548 {offsets = [1, 0], sizes = [1, 256], strides = [1, 1]} : vector<8x256xf32> to vector<1x256xf32>
    %646 = arith.select %540, %644, %645 : vector<1x256xi1>, vector<1x256xf32>
    %cst_123 = arith.constant dense<0.000000e+00> : vector<1x256xf32>
    %647 = tpu.matmul %641, %549, %cst_123 {dimension_numbers = #tpu.dot_dimension_numbers<[1], [0], [0], [1], [0, 0, 1, 1], [], []>} : vector<1x64xf32>, vector<64x256xf32>, vector<1x256xf32> -> vector<1x256xf32>
    %648 = arith.addf %646, %647 : vector<1x256xf32>
    %649 = vector.extract_strided_slice %648 {offsets = [0, 0], sizes = [1, 192], strides = [1, 1]} : vector<1x256xf32> to vector<1x192xf32>
    %650 = arith.negf %649 : vector<1x192xf32>
    %651 = math.exp %650 : vector<1x192xf32>
    %cst_124 = arith.constant 1.000000e+00 : f32
    %652 = vector.broadcast %cst_124 : f32 to vector<1x192xf32>
    %653 = arith.addf %652, %651 : vector<1x192xf32>
    %654 = arith.divf %652, %653 : vector<1x192xf32>
    %655 = vector.extract_strided_slice %648 {offsets = [0, 192], sizes = [1, 64], strides = [1, 1]} : vector<1x256xf32> to vector<1x64xf32>
    %656 = math.tanh %655 : vector<1x64xf32>
    %657 = vector.extract_strided_slice %654 {offsets = [0, 64], sizes = [1, 64], strides = [1, 1]} : vector<1x192xf32> to vector<1x64xf32>
    %658 = arith.mulf %657, %638 : vector<1x64xf32>
    %659 = vector.extract_strided_slice %654 {offsets = [0, 0], sizes = [1, 64], strides = [1, 1]} : vector<1x192xf32> to vector<1x64xf32>
    %660 = arith.mulf %659, %656 : vector<1x64xf32>
    %661 = arith.addf %658, %660 : vector<1x64xf32>
    %662 = vector.extract_strided_slice %654 {offsets = [0, 128], sizes = [1, 64], strides = [1, 1]} : vector<1x192xf32> to vector<1x64xf32>
    %663 = math.tanh %661 : vector<1x64xf32>
    %664 = arith.mulf %662, %663 : vector<1x64xf32>
    %665 = vector.extract_strided_slice %664 {offsets = [0, 0], sizes = [1, 32], strides = [1, 1]} : vector<1x64xf32> to vector<1x32xf32>
    %666 = vector.extract_strided_slice %664 {offsets = [0, 32], sizes = [1, 32], strides = [1, 1]} : vector<1x64xf32> to vector<1x32xf32>
    %667 = vector.extract_strided_slice %548 {offsets = [5, 0], sizes = [1, 256], strides = [1, 1]} : vector<8x256xf32> to vector<1x256xf32>
    %668 = vector.extract_strided_slice %548 {offsets = [0, 0], sizes = [1, 256], strides = [1, 1]} : vector<8x256xf32> to vector<1x256xf32>
    %669 = arith.select %540, %667, %668 : vector<1x256xi1>, vector<1x256xf32>
    %cst_125 = arith.constant dense<0.000000e+00> : vector<1x256xf32>
    %670 = tpu.matmul %664, %549, %cst_125 {dimension_numbers = #tpu.dot_dimension_numbers<[1], [0], [0], [1], [0, 0, 1, 1], [], []>} : vector<1x64xf32>, vector<64x256xf32>, vector<1x256xf32> -> vector<1x256xf32>
    %671 = arith.addf %669, %670 : vector<1x256xf32>
    %672 = vector.extract_strided_slice %671 {offsets = [0, 0], sizes = [1, 192], strides = [1, 1]} : vector<1x256xf32> to vector<1x192xf32>
    %673 = arith.negf %672 : vector<1x192xf32>
    %674 = math.exp %673 : vector<1x192xf32>
    %cst_126 = arith.constant 1.000000e+00 : f32
    %675 = vector.broadcast %cst_126 : f32 to vector<1x192xf32>
    %676 = arith.addf %675, %674 : vector<1x192xf32>
    %677 = arith.divf %675, %676 : vector<1x192xf32>
    %678 = vector.extract_strided_slice %671 {offsets = [0, 192], sizes = [1, 64], strides = [1, 1]} : vector<1x256xf32> to vector<1x64xf32>
    %679 = math.tanh %678 : vector<1x64xf32>
    %680 = vector.extract_strided_slice %677 {offsets = [0, 64], sizes = [1, 64], strides = [1, 1]} : vector<1x192xf32> to vector<1x64xf32>
    %681 = arith.mulf %680, %661 : vector<1x64xf32>
    %682 = vector.extract_strided_slice %677 {offsets = [0, 0], sizes = [1, 64], strides = [1, 1]} : vector<1x192xf32> to vector<1x64xf32>
    %683 = arith.mulf %682, %679 : vector<1x64xf32>
    %684 = arith.addf %681, %683 : vector<1x64xf32>
    %685 = vector.extract_strided_slice %677 {offsets = [0, 128], sizes = [1, 64], strides = [1, 1]} : vector<1x192xf32> to vector<1x64xf32>
    %686 = math.tanh %684 : vector<1x64xf32>
    %687 = arith.mulf %685, %686 : vector<1x64xf32>
    %688 = vector.extract_strided_slice %687 {offsets = [0, 0], sizes = [1, 32], strides = [1, 1]} : vector<1x64xf32> to vector<1x32xf32>
    %689 = vector.extract_strided_slice %687 {offsets = [0, 32], sizes = [1, 32], strides = [1, 1]} : vector<1x64xf32> to vector<1x32xf32>
    %cst_127 = arith.constant 0.000000e+00 : f32
    %690 = vector.broadcast %cst_127 : f32 to vector<2x32xf32>
    %691 = tpu.concatenate %573, %596, %619, %642, %665, %688, %690 in 0 : vector<1x32xf32>, vector<1x32xf32>, vector<1x32xf32>, vector<1x32xf32>, vector<1x32xf32>, vector<1x32xf32>, vector<2x32xf32> -> vector<8x32xf32>
    %692 = tpu.concatenate %689, %666, %643, %620, %597, %574, %690 in 0 : vector<1x32xf32>, vector<1x32xf32>, vector<1x32xf32>, vector<1x32xf32>, vector<1x32xf32>, vector<1x32xf32>, vector<2x32xf32> -> vector<8x32xf32>
    %693 = tpu.concatenate %691, %692 in 1 : vector<8x32xf32>, vector<8x32xf32> -> vector<8x64xf32>
    %cst_128 = arith.constant dense<0.000000e+00> : vector<8x64xf32>
    %694 = tpu.matmul %515, %693, %cst_128 {dimension_numbers = #tpu.dot_dimension_numbers<[1], [0], [0], [1], [0, 0, 1, 1], [], []>} : vector<8x8xf32>, vector<8x64xf32>, vector<8x64xf32> -> vector<8x64xf32>
    %695 = vector.extract_strided_slice %694 {offsets = [0, 0], sizes = [8, 32], strides = [1, 1]} : vector<8x64xf32> to vector<8x32xf32>
    %696 = vector.extract_strided_slice %694 {offsets = [0, 32], sizes = [8, 32], strides = [1, 1]} : vector<8x64xf32> to vector<8x32xf32>
    %697 = vector.extract_strided_slice %691 {offsets = [0, 0], sizes = [8, 8], strides = [1, 1]} : vector<8x32xf32> to vector<8x8xf32>
    %698 = vector.extract_strided_slice %692 {offsets = [0, 0], sizes = [8, 8], strides = [1, 1]} : vector<8x32xf32> to vector<8x8xf32>
    %699 = vector.extract_strided_slice %695 {offsets = [0, 8], sizes = [8, 8], strides = [1, 1]} : vector<8x32xf32> to vector<8x8xf32>
    %700 = vector.extract_strided_slice %696 {offsets = [0, 8], sizes = [8, 8], strides = [1, 1]} : vector<8x32xf32> to vector<8x8xf32>
    %701 = tpu.concatenate %697, %698, %699, %700 in 1 : vector<8x8xf32>, vector<8x8xf32>, vector<8x8xf32>, vector<8x8xf32> -> vector<8x32xf32>
    %702 = vector.extract_strided_slice %691 {offsets = [0, 16], sizes = [8, 8], strides = [1, 1]} : vector<8x32xf32> to vector<8x8xf32>
    %703 = vector.extract_strided_slice %692 {offsets = [0, 16], sizes = [8, 8], strides = [1, 1]} : vector<8x32xf32> to vector<8x8xf32>
    %704 = vector.extract_strided_slice %695 {offsets = [0, 24], sizes = [8, 8], strides = [1, 1]} : vector<8x32xf32> to vector<8x8xf32>
    %705 = vector.extract_strided_slice %696 {offsets = [0, 24], sizes = [8, 8], strides = [1, 1]} : vector<8x32xf32> to vector<8x8xf32>
    %706 = tpu.concatenate %702, %703, %704, %705 in 1 : vector<8x8xf32>, vector<8x8xf32>, vector<8x8xf32>, vector<8x8xf32> -> vector<8x32xf32>
    %707 = tpu.concatenate %701, %706 in 0 : vector<8x32xf32>, vector<8x32xf32> -> vector<16x32xf32>
    %708 = tpu.iota {dimensions = array<i32: 0>} : vector<16x16xi32>
    %709 = tpu.iota {dimensions = array<i32: 1>} : vector<16x16xi32>
    %c8_i32_129 = arith.constant 8 : i32
    %710 = vector.broadcast %c8_i32_129 : i32 to vector<16x16xi32>
    %711 = arith.cmpi sge, %708, %710 : vector<16x16xi32>
    %c8_i32_130 = arith.constant 8 : i32
    %712 = vector.broadcast %c8_i32_130 : i32 to vector<16x16xi32>
    %713 = arith.cmpi sge, %709, %712 : vector<16x16xi32>
    %c8_i32_131 = arith.constant 8 : i32
    %c0_i32_132 = arith.constant 0 : i32
    %714 = vector.broadcast %c8_i32_131 : i32 to vector<16x16xi32>
    %715 = vector.broadcast %c0_i32_132 : i32 to vector<16x16xi32>
    %716 = arith.select %711, %714, %715 : vector<16x16xi1>, vector<16x16xi32>
    %717 = arith.subi %708, %716 : vector<16x16xi32>
    %c8_i32_133 = arith.constant 8 : i32
    %c0_i32_134 = arith.constant 0 : i32
    %718 = vector.broadcast %c8_i32_133 : i32 to vector<16x16xi32>
    %719 = vector.broadcast %c0_i32_134 : i32 to vector<16x16xi32>
    %720 = arith.select %713, %718, %719 : vector<16x16xi1>, vector<16x16xi32>
    %721 = arith.subi %709, %720 : vector<16x16xi32>
    %c6_i32_135 = arith.constant 6 : i32
    %c0_i32_136 = arith.constant 0 : i32
    %722 = vector.broadcast %c6_i32_135 : i32 to vector<16x16xi32>
    %723 = vector.broadcast %c0_i32_136 : i32 to vector<16x16xi32>
    %724 = arith.select %711, %722, %723 : vector<16x16xi1>, vector<16x16xi32>
    %725 = arith.addi %717, %724 : vector<16x16xi32>
    %c6_i32_137 = arith.constant 6 : i32
    %c0_i32_138 = arith.constant 0 : i32
    %726 = vector.broadcast %c6_i32_137 : i32 to vector<16x16xi32>
    %727 = vector.broadcast %c0_i32_138 : i32 to vector<16x16xi32>
    %728 = arith.select %713, %726, %727 : vector<16x16xi1>, vector<16x16xi32>
    %729 = arith.addi %721, %728 : vector<16x16xi32>
    %730 = arith.subi %725, %729 : vector<16x16xi32>
    %c10_i32 = arith.constant 10 : i32
    %731 = vector.broadcast %c10_i32 : i32 to vector<16x16xi32>
    %732 = arith.cmpi sle, %730, %731 : vector<16x16xi32>
    %c-10_i32 = arith.constant -10 : i32
    %733 = vector.broadcast %c-10_i32 : i32 to vector<16x16xi32>
    %734 = arith.cmpi sge, %730, %733 : vector<16x16xi32>
    %735 = arith.andi %732, %734 : vector<16x16xi1>
    %c6_i32_139 = arith.constant 6 : i32
    %736 = vector.broadcast %c6_i32_139 : i32 to vector<16x16xi32>
    %737 = arith.cmpi slt, %717, %736 : vector<16x16xi32>
    %c6_i32_140 = arith.constant 6 : i32
    %738 = vector.broadcast %c6_i32_140 : i32 to vector<16x16xi32>
    %739 = arith.cmpi slt, %721, %738 : vector<16x16xi32>
    %740 = arith.andi %737, %739 : vector<16x16xi1>
    %c6_i32_141 = arith.constant 6 : i32
    %741 = vector.broadcast %c6_i32_141 : i32 to vector<16x16xi32>
    %742 = arith.cmpi sge, %725, %741 : vector<16x16xi32>
    %c6_i32_142 = arith.constant 6 : i32
    %743 = vector.broadcast %c6_i32_142 : i32 to vector<16x16xi32>
    %744 = arith.cmpi slt, %729, %743 : vector<16x16xi32>
    %745 = arith.andi %742, %744 : vector<16x16xi1>
    %746 = arith.andi %735, %745 : vector<16x16xi1>
    %747 = arith.andi %746, %740 : vector<16x16xi1>
    %cst_143 = arith.constant 1.000000e+00 : f32
    %cst_144 = arith.constant 0.000000e+00 : f32
    %748 = vector.broadcast %cst_143 : f32 to vector<16x16xf32>
    %749 = vector.broadcast %cst_144 : f32 to vector<16x16xf32>
    %750 = arith.select %747, %748, %749 : vector<16x16xi1>, vector<16x16xf32>
    %cst_145 = arith.constant dense<true> : vector<16x16xi1>
    %751 = arith.xori %745, %cst_145 : vector<16x16xi1>
    %752 = arith.andi %735, %751 : vector<16x16xi1>
    %753 = arith.andi %752, %740 : vector<16x16xi1>
    %cst_146 = arith.constant 1.000000e+00 : f32
    %cst_147 = arith.constant 0.000000e+00 : f32
    %754 = vector.broadcast %cst_146 : f32 to vector<16x16xf32>
    %755 = vector.broadcast %cst_147 : f32 to vector<16x16xf32>
    %756 = arith.select %753, %754, %755 : vector<16x16xi1>, vector<16x16xf32>
    %c256 = arith.constant 256 : index
    %c0_148 = arith.constant 0 : index
    %757 = vector.load %arg2[%c256, %c0_148] : memref<352x256xf32, #tpu.memory_space<vmem>>, vector<32x96xf32>
    %cst_149 = arith.constant dense<0.000000e+00> : vector<16x96xf32>
    %758 = tpu.matmul %707, %757, %cst_149 {dimension_numbers = #tpu.dot_dimension_numbers<[1], [0], [0], [1], [0, 0, 1, 1], [], []>} : vector<16x32xf32>, vector<32x96xf32>, vector<16x96xf32> -> vector<16x96xf32>
    %759 = vector.extract_strided_slice %758 {offsets = [0, 0], sizes = [16, 32], strides = [1, 1]} : vector<16x96xf32> to vector<16x32xf32>
    %cst_150 = arith.constant dense<0.000000e+00> : vector<16x32xf32>
    %760 = tpu.matmul %756, %759, %cst_150 {dimension_numbers = #tpu.dot_dimension_numbers<[1], [0], [0], [1], [0, 0, 1, 1], [], []>} : vector<16x16xf32>, vector<16x32xf32>, vector<16x32xf32> -> vector<16x32xf32>
    %761 = vector.extract_strided_slice %758 {offsets = [0, 32], sizes = [16, 32], strides = [1, 1]} : vector<16x96xf32> to vector<16x32xf32>
    %cst_151 = arith.constant dense<0.000000e+00> : vector<16x32xf32>
    %762 = tpu.matmul %750, %761, %cst_151 {dimension_numbers = #tpu.dot_dimension_numbers<[1], [0], [0], [1], [0, 0, 1, 1], [], []>} : vector<16x16xf32>, vector<16x32xf32>, vector<16x32xf32> -> vector<16x32xf32>
    %763 = arith.addf %760, %762 : vector<16x32xf32>
    %764 = vector.extract_strided_slice %758 {offsets = [0, 64], sizes = [16, 32], strides = [1, 1]} : vector<16x96xf32> to vector<16x32xf32>
    %765 = arith.addf %763, %764 : vector<16x32xf32>
    %c288 = arith.constant 288 : index
    %c0_152 = arith.constant 0 : index
    %766 = vector.load %arg2[%c288, %c0_152] : memref<352x256xf32, #tpu.memory_space<vmem>>, vector<1x32xf32>
    %767 = vector.broadcast %766 : vector<1x32xf32> to vector<16x32xf32>
    %768 = arith.addf %765, %767 : vector<16x32xf32>
    %c296 = arith.constant 296 : index
    %c0_153 = arith.constant 0 : index
    %769 = vector.load %arg2[%c296, %c0_153] : memref<352x256xf32, #tpu.memory_space<vmem>>, vector<32x256xf32>
    %cst_154 = arith.constant dense<0.000000e+00> : vector<16x256xf32>
    %770 = tpu.matmul %768, %769, %cst_154 {dimension_numbers = #tpu.dot_dimension_numbers<[1], [0], [0], [1], [0, 0, 1, 1], [], []>} : vector<16x32xf32>, vector<32x256xf32>, vector<16x256xf32> -> vector<16x256xf32>
    %c328 = arith.constant 328 : index
    %c0_155 = arith.constant 0 : index
    %771 = vector.load %arg2[%c328, %c0_155] : memref<352x256xf32, #tpu.memory_space<vmem>>, vector<1x256xf32>
    %772 = vector.broadcast %771 : vector<1x256xf32> to vector<16x256xf32>
    %773 = arith.addf %770, %772 : vector<16x256xf32>
    %774 = vector.extract_strided_slice %773 {offsets = [0, 0], sizes = [8, 128], strides = [1, 1]} : vector<16x256xf32> to vector<8x128xf32>
    %775 = tpu.iota {dimensions = array<i32: 1>} : vector<8x128xi32>
    %c4_i32_156 = arith.constant 4 : i32
    %776 = vector.broadcast %c4_i32_156 : i32 to vector<8x128xi32>
    %777 = arith.cmpi slt, %775, %776 : vector<8x128xi32>
    %cst_157 = arith.constant -1.000000e+30 : f32
    %778 = vector.broadcast %cst_157 : f32 to vector<8x128xf32>
    %779 = arith.select %777, %774, %778 : vector<8x128xi1>, vector<8x128xf32>
    %cst_158 = arith.constant dense<0xFF800000> : vector<8xf32>
    %780 = vector.multi_reduction <maximumf>, %779, %cst_158 [1] : vector<8x128xf32> to vector<8xf32>
    %781 = vector.shape_cast %780 : vector<8xf32> to vector<8x1xf32>
    %782 = vector.broadcast %781 : vector<8x1xf32> to vector<8x128xf32>
    %783 = arith.subf %779, %782 : vector<8x128xf32>
    %784 = math.exp %783 : vector<8x128xf32>
    %cst_159 = arith.constant 0.000000e+00 : f32
    %785 = vector.broadcast %cst_159 : f32 to vector<8x128xf32>
    %786 = arith.select %777, %784, %785 : vector<8x128xi1>, vector<8x128xf32>
    %cst_160 = arith.constant dense<0.000000e+00> : vector<8xf32>
    %787 = vector.multi_reduction <add>, %786, %cst_160 [1] : vector<8x128xf32> to vector<8xf32>
    %788 = vector.shape_cast %787 : vector<8xf32> to vector<8x1xf32>
    %789 = vector.broadcast %781 : vector<8x1xf32> to vector<8x128xf32>
    %790 = arith.subf %774, %789 : vector<8x128xf32>
    %791 = math.log %788 : vector<8x1xf32>
    %792 = vector.broadcast %791 : vector<8x1xf32> to vector<8x128xf32>
    %793 = arith.subf %790, %792 : vector<8x128xf32>
    %c0_161 = arith.constant 0 : index
    %c0_162 = arith.constant 0 : index
    %794 = vector.load %arg3[%c0_161, %c0_162] : memref<16x128xf32, #tpu.memory_space<vmem>>, vector<8x128xf32>
    tpu.vector_store %arg3[%c0_161, %c0_162], %793 {strides = array<i32>} : memref<16x128xf32, #tpu.memory_space<vmem>>, vector<8x128xf32>,
    %795 = vector.extract_strided_slice %773 {offsets = [8, 128], sizes = [8, 128], strides = [1, 1]} : vector<16x256xf32> to vector<8x128xf32>
    %796 = tpu.iota {dimensions = array<i32: 1>} : vector<8x128xi32>
    %c4_i32_163 = arith.constant 4 : i32
    %797 = vector.broadcast %c4_i32_163 : i32 to vector<8x128xi32>
    %798 = arith.cmpi slt, %796, %797 : vector<8x128xi32>
    %cst_164 = arith.constant -1.000000e+30 : f32
    %799 = vector.broadcast %cst_164 : f32 to vector<8x128xf32>
    %800 = arith.select %798, %795, %799 : vector<8x128xi1>, vector<8x128xf32>
    %cst_165 = arith.constant dense<0xFF800000> : vector<8xf32>
    %801 = vector.multi_reduction <maximumf>, %800, %cst_165 [1] : vector<8x128xf32> to vector<8xf32>
    %802 = vector.shape_cast %801 : vector<8xf32> to vector<8x1xf32>
    %803 = vector.broadcast %802 : vector<8x1xf32> to vector<8x128xf32>
    %804 = arith.subf %800, %803 : vector<8x128xf32>
    %805 = math.exp %804 : vector<8x128xf32>
    %cst_166 = arith.constant 0.000000e+00 : f32
    %806 = vector.broadcast %cst_166 : f32 to vector<8x128xf32>
    %807 = arith.select %798, %805, %806 : vector<8x128xi1>, vector<8x128xf32>
    %cst_167 = arith.constant dense<0.000000e+00> : vector<8xf32>
    %808 = vector.multi_reduction <add>, %807, %cst_167 [1] : vector<8x128xf32> to vector<8xf32>
    %809 = vector.shape_cast %808 : vector<8xf32> to vector<8x1xf32>
    %810 = vector.broadcast %802 : vector<8x1xf32> to vector<8x128xf32>
    %811 = arith.subf %795, %810 : vector<8x128xf32>
    %812 = math.log %809 : vector<8x1xf32>
    %813 = vector.broadcast %812 : vector<8x1xf32> to vector<8x128xf32>
    %814 = arith.subf %811, %813 : vector<8x128xf32>
    %c8 = arith.constant 8 : index
    %c0_168 = arith.constant 0 : index
    %815 = vector.load %arg3[%c8, %c0_168] : memref<16x128xf32, #tpu.memory_space<vmem>>, vector<8x128xf32>
    tpu.vector_store %arg3[%c8, %c0_168], %814 {strides = array<i32>} : memref<16x128xf32, #tpu.memory_space<vmem>>, vector<8x128xf32>,
    return
  }
}

</mosaic_0001>

<bundles_post_ra>
// kernel: ecpec_forward.1
= control target key start
LH: loop header
LB: loop body
LE: loop exit
PB: predicated region body
PF: predicated region fallthrough
CT: control target
= control target key end

     0   :  { %8 = vsyncpa [#allocation3], 0  ;;  %s4036_s12 = smov [#allocation2]   ;;  %s4940_s0 = inlined_call_operand.vmem [shape: f32[40,16], index: 0, kind: input, shape index: {}]   ;;  %s4941_s1 = inlined_call_operand.vmem [shape: s32[8,2], index: 1, kind: input, shape index: {}]   ;;  %s4942_s2 = inlined_call_operand.hbm [shape: f32[352,256], index: 2, kind: input, shape index: {}]   ;;  %s4943_s3 = inlined_call_operand.vmem [shape: f32[16,128], index: 3, kind: output, shape index: {}]  }
   0x1   :  { %s18_s13 = sshll.u32 %s4036_s12, 4  ;;  %s19_s13 = int_to_ptr.vmem [resolvable:$true] %s18_s13 }
   0x2   :  { %s4022_s14 = scalar_lea.vmem %s19_s13, 11264  ;;  %p4027_p1 = scmp.lt.s32.totalorder %s19_s13, %s19_s13 }
   0x3   :  { %p4023_p0 = scmp.ne.s32.totalorder %s19_s13, %s4022_s14  ;;  %p4028_p2 = scmp.lt.s32.totalorder %s4022_s14, %s4022_s14 }
   0x5   :  { %p4029_p3 = por %p4028_p2, %p4027_p1 }
   0x7   :  { %p4030_p4 = pnand %p4029_p3, %p4023_p0 }
   0x9   :  { %4033 = shalt.err (!%p4030_p4)
}
   0xa   :  { %s4037_s15 = smov 256   ;;  %s4038_s16 = smov 16  }
   0xb   :  { %24 = dma.hbm_to_vmem [thread:$0]  %s4942_s2, 11264, %s19_s13, [#allocation3], %s4037_s15, %s4037_s15, %s4038_s16  }
   0xc   :  { %4034 = dma.done.wait [#allocation3], 11264  }
   0xd   :  { %4035 = vsyncadd [#allocation3], 4294956032  ;;  %v4039_v0 = vmov 0.0   ;;  %vm4947_vm0 = vmmov 0   ;;  %v40_v1 = vld [vmem:[#allocation2 + $0x10] sm:$0xff]  ;;  %v39_v2 = vld [vmem:[#allocation2] sm:$0xff]  ;;  %v31_v51 = vlaneseq }
   0xe   :  { %3679 = vmatprep.subr.mxu0 %v4039_v0  ;;  %3683 = vmatprep.mubr.msk.f32.mxu0 %vm4947_vm0, %v4039_v0  ;;  %v34_v3 = vld [vmem:[%s4940_s0] sm:$0xff]  ;;  %vm4946_vm1 = vcmask 130048   ;;  %v4087_v4 = vld [vmem:[#allocation2 + $0x30] sm:$0xff]  ;;  %v35_v6 = vld [vmem:[%s4940_s0 + $0x8] sm:$0xff]  ;;  %v4042_v42 = vmov 0   ;;  %s4044_s30 = smov 112  }
   0xf   :  { %3705 = vmatprep.subr.mxu1 %v4039_v0  ;;  %3709 = vmatprep.mubr.msk.f32.mxu1 %vm4947_vm0, %v4039_v0  ;;  %v4092_v5 = vld [vmem:[#allocation2 + $0x20] sm:$0xff]  ;;  %v36_v7 = vld [vmem:[%s4940_s0 + $0x10] sm:$0xff]  ;;  %v37_v8 = vld [vmem:[%s4940_s0 + $0x18] sm:$0xff]  ;;  %v4166_v52 = vand.u32 127, %v31_v51  ;;  %vm4944_vm6 = vmmov 1   ;;  %s4046_s4 = smov 127  }
  0x10   :  { %3680 = vmatpush3.msra.mxu0 %v40_v1  ;;  %3706 = vmatpush3.msra.mxu1 %v4087_v4  ;;  %v38_v9 = vld [vmem:[%s4940_s0 + $0x20] sm:$0xff]  ;;  %s4041_s0 = smov 80   ;;  %s4048_s7 = smov 64  }
  0x11   :  { %3681 = vmatprep.subr.mxu0 %v4039_v0  ;;  %3707 = vmatprep.subr.mxu1 %v4039_v0  ;;  %v41_v12 = vld [vmem:[#allocation2 + $0x40] ss:$0 sm:$0xff]  ;;  %vm4954_vm5 = vcmp.lt.s32.totalorder %v4166_v52, 8  ;;  %s4049_s8 = smov 88   ;;  %s4050_s9 = smov 104  }
  0x12   :  { %3682 = vmatpush3.msra.mxu0 %v39_v2  ;;  %3708 = vmatpush3.msra.mxu1 %v4092_v5  ;;  %v4132_v18 = vld [vmem:[#allocation2 + $0x2a0] ss:$0 sm:$0xff]  ;;  %vm4176_vm7 = vmxor %vm4954_vm5, %vm4944_vm6  ;;  %s4051_s10 = smov 8   ;;  %s4052_s11 = smov 120  }
  0x13   :  { %3684 = vmatmul.mubr.msk.f32.vlgmr.msra.gmra.mxu0 %vm4946_vm1, %v34_v3  ;;  %3698 = vmatprep.subr.mxu0 %v4039_v0  ;;  %vm30_vm2 = vcmp.gt.f32.partialorder %v4132_v18, 0.5  ;;  %v4154_v41 = vld [vmem:[%s4941_s1] sm:$0xff]  ;;  %s4043_s1 = smov 96  }
  0x14   :  { %3686 = vmatprep.mubr.msk.f32.mxu0 %vm4947_vm0, %v4039_v0  ;;  %3699 = vmatpush3.msra.mxu0 %v4087_v4  ;;  %vm237_vm3 = vcmp.gt.s32.totalorder %v4154_v41, 4  ;;  %vm227_vm4 = vcmp.gt.s32.totalorder %v4154_v41, 0  ;;  %vm356_vm13 = vcmp.gt.s32.totalorder %v4154_v41, 1  ;;  %vm363_vm14 = vcmp.gt.s32.totalorder %v4154_v41, 3 }
  0x15   :  { %3700 = vmatprep.subr.mxu0 %v4039_v0  ;;  %3712 = vmatprep.subr.mxu1 %v4039_v0  ;;  %v240_v43 = vsel %vm237_vm3, 1, %v4042_v42  ;;  %v230_v48 = vsel %vm227_vm4, 1, %v4042_v42 }
  0x16   :  { %3701 = vmatpush3.msra.mxu0 %v4092_v5  ;;  %3877 = vset.pattern.permute.xlu0 %v4042_v42 }
  0x17   :  { %3687 = vmatmul.mubr.msk.f32.gmra.mxu0 %vm4946_vm1, %v35_v6  ;;  %3733 = vmatprep.subr.mxu0 %v4039_v0 }
  0x18   :  { %3689 = vmatprep.mubr.msk.f32.mxu0 %vm4947_vm0, %v4039_v0  ;;  %3876 = vset.pattern.permute.xlu1 %v4042_v42 }
  0x1b   :  { %3690 = vmatmul.mubr.msk.f32.gmra.mxu0 %vm4946_vm1, %v36_v7 }
  0x1c   :  { %3692 = vmatprep.mubr.msk.f32.mxu0 %vm4947_vm0, %v4039_v0 }
  0x1f   :  { %3693 = vmatmul.mubr.msk.f32.gmra.mxu0 %vm4946_vm1, %v37_v8 }
  0x20   :  { %3695 = vmatprep.mubr.msk.f32.mxu0 %vm4947_vm0, %v4039_v0 }
  0x23   :  { %3696 = vmatmul.mubr.msk.f32.gmra.mxu0 %vm4946_vm1, %v38_v9 }
  0x24   :  { %3702 = vmatprep.mubr.msk.f32.mxu0 %vm4947_vm0, %v4039_v0 }
  0x27   :  { %3703 = vmatmul.mubr.f32.vlgmr.msra.gmra.mxu0 %v4039_v0 }
  0x28   :  { %3737 = vmatprep.mubr.msk.f32.mxu0 %vm4947_vm0, %v4039_v0 }
  0xd3   :  { %v124_v10 = vpop.f32.mrf.mxu0 }
  0xd4   :  { %v125_v26 = vadd.f32 %v124_v10, %v41_v12  ;;  %v357_v10 = vsel %vm356_vm13, 1, %v4042_v42 }
  0xd5   :  { %v3685_v11 = vpop.f32.mrf.mxu0 }
  0xd7   :  { %v129_v13 = vpop.f32.mrf.mxu0 }
  0xd8   :  { %v130_v14 = vadd.f32 %v129_v13, %v41_v12 }
  0xd9   :  { %v3688_v15 = vpop.f32.mrf.mxu0 }
  0xdb   :  { %v134_v16 = vpop.f32.mrf.mxu0 }
  0xdc   :  { %v4130_v17 = vadd.f32 %v134_v16, %v41_v12  ;;  %v364_v16 = vsel %vm363_vm14, 1, %v4042_v42 }
  0xdd   :  { %v3691_v19 = vpop.f32.mrf.mxu0 }
  0xdf   :  { %v139_v20 = vpop.f32.mrf.mxu0 }
  0xe0   :  { %v140_v21 = vadd.f32 %v139_v20, %v41_v12 }
  0xe1   :  { %v3694_v22 = vpop.f32.mrf.mxu0 }
  0xe2   :  { %v4137_v23 = vsel %vm30_vm2, %v130_v14, %v140_v21  ;;  %v4141_v24 = vsel %vm30_vm2, %v140_v21, %v130_v14 }
  0xe3   :  { %v144_v25 = vpop.f32.mrf.mxu0 }
  0xe4   :  { %v145_v27 = vadd.f32 %v144_v25, %v41_v12 }
  0xe5   :  { %v3697_v28 = vpop.f32.mrf.mxu0 }
  0xe6   :  { %v152_v29 = vsel %vm30_vm2, %v125_v26, %v145_v27  ;;  %v4147_v30 = vsel %vm30_vm2, %v145_v27, %v125_v26  ;;  %v1657_v26 = vld [vmem:[#allocation2 + $0xc0] sm:$0xff] }
  0xe7   :  { %v222_v31 = vpop.f32.mrf.mxu0 }
  0xe8   :  { %v226_v32 = vadd.f32 %v222_v31, %v152_v29 }
  0xe9   :  { %v3704_v33 = vpop.f32.mrf.mxu0 }
  0xea   :  { %3878 = vtanh.f32 %v226_v32  ;;  %v3549_v35 = vmul.f32 -1.442695, %v226_v32 }
  0xec   :  { %3880 = vpow2.f32 %v3549_v35 }
  0xf7   :  { %v3879_v34 = vpop.eup %3878 }
  0xf8   :  { %256 = vrot.lane.b32.xlu0 %v3879_v34, %s4041_s0 }
  0xf9   :  { %v3881_v36 = vpop.eup %3880 }
  0xfa   :  { %v250_v37 = vadd.f32 1.0, %v3881_v36 }
  0xfc   :  { %3882 = vrcp.f32 %v250_v37 }
 0x109   :  { %v3883_v38 = vpop.eup %3882 }
 0x10a   :  { %v254_v44 = vmul.f32 0.0, %v3883_v38 }
 0x16a   :  { %v257_v39 = vpop.permute.xlu0 %256 }
 0x16b   :  { %v259_v40 = vmul.f32 %v3883_v38, %v257_v39 }
 0x16d   :  { %261 = vrot.lane.b32.xlu0 %v259_v40, %s4038_s16 }
 0x171   :  { %242 = vperm.xlu0 %3877, %v240_v43  }
 0x1df   :  { %v262_v45 = vpop.permute.xlu0 %261 }
 0x1e0   :  { %v264_v46 = vadd.f32 %v262_v45, %v254_v44 }
 0x1e2   :  { %3884 = vtanh.f32 %v264_v46 }
 0x1ec   :  { %v4169_v53 = vpop.permute.xlu0 %242 }
 0x1ed   :  { %vm244_vm8 = vcmp.eq.s32.totalorder %v4169_v53, 1 }
 0x1ee   :  { %vm245_vm10 = vmand %vm4176_vm7, %vm244_vm8 }
 0x1ef   :  { %v3885_v47 = vpop.eup %3884 }
 0x1f0   :  { %267 = vrot.lane.b32.xlu1 %v3885_v47, %s4038_s16 }
 0x1f4   :  { %232 = vperm.xlu1 %3876, %v230_v48  }
 0x262   :  { %v268_v49 = vpop.permute.xlu1 %267 }
 0x263   :  { %v270_v50 = vmul.f32 %v3883_v38, %v268_v49 }
 0x265   :  { %272 = vrot.lane.b32.xlu1 %v270_v50, %s4043_s1 }
 0x269   :  { %277 = vrot.lane.b32.xlu1 %v264_v46, %s4044_s30 }
 0x26f   :  { %v4171_v54 = vpop.permute.xlu1 %232 }
 0x270   :  { %vm234_vm9 = vcmp.eq.s32.totalorder %v4171_v54, 1 }
 0x271   :  { %vm235_vm11 = vmand %vm4954_vm5, %vm234_vm9 }
 0x272   :  { %vm4190_vm12 = vmor %vm235_vm11, %vm245_vm10 }
 0x2d7   :  { %v273_v57 = vpop.permute.xlu1 %272 }
 0x2d8   :  { %v4196_v58 = vsel %vm4190_vm12, %v273_v57, 0.0 }
 0x2d9   :  { %3710 = vmatmul.mubr.msk.f32.vlgmr.msra.gmra.mxu1 %vm4946_vm1, %v4196_v58 }
 0x2da   :  { %3713 = vmatpush3.msra.mxu1 %v4087_v4  ;;  %3716 = vmatprep.mubr.msk.f32.mxu1 %vm4947_vm0, %v4039_v0 }
 0x2db   :  { %v278_v59 = vpop.permute.xlu1 %277  ;;  %3714 = vmatprep.subr.mxu1 %v4039_v0 }
 0x2dc   :  { %v280_v60 = vsel %vm4190_vm12, %v278_v59, 0.0  ;;  %3715 = vmatpush3.msra.mxu1 %v4092_v5 }
 0x2dd   :  { %379 = vrot.lane.b32.xlu1 %v280_v60, %s4038_s16  ;;  %3719 = vmatprep.subr.mxu1 %v4039_v0 }
 0x34f   :  { %v380_v11 = vpop.permute.xlu1 %379 }
 0x399   :  { %v351_v61 = vpop.f32.mrf.mxu1 }
 0x39a   :  { %v355_v62 = vadd.f32 %v351_v61, %v4137_v23 }
 0x39b   :  { %v3711_v63 = vpop.f32.mrf.mxu1 }
 0x39c   :  { %3886 = vtanh.f32 %v355_v62  ;;  %v3551_v2 = vmul.f32 -1.442695, %v355_v62 }
 0x39e   :  { %3888 = vpow2.f32 %v3551_v2 }
 0x3a9   :  { %v3887_v1 = vpop.eup %3886 }
 0x3aa   :  { %384 = vrot.lane.b32.xlu0 %v3887_v1, %s4041_s0 }
 0x3ab   :  { %v3889_v3 = vpop.eup %3888 }
 0x3ac   :  { %v374_v6 = vadd.f32 1.0, %v3889_v3 }
 0x3ae   :  { %3890 = vrcp.f32 %v374_v6 }
 0x3bb   :  { %v3891_v7 = vpop.eup %3890 }
 0x3bc   :  { %v382_v12 = vmul.f32 %v3891_v7, %v380_v11 }
 0x41c   :  { %v385_v8 = vpop.permute.xlu0 %384 }
 0x41d   :  { %v387_v9 = vmul.f32 %v3891_v7, %v385_v8 }
 0x41f   :  { %389 = vrot.lane.b32.xlu0 %v387_v9, %s4038_s16 }
 0x423   :  { %359 = vperm.xlu0 %3877, %v357_v10  }
 0x491   :  { %v390_v13 = vpop.permute.xlu0 %389 }
 0x492   :  { %v392_v14 = vadd.f32 %v390_v13, %v382_v12 }
 0x494   :  { %3892 = vtanh.f32 %v392_v14 }
 0x49e   :  { %v360_v21 = vpop.permute.xlu0 %359 }
 0x49f   :  { %vm361_vm15 = vcmp.eq.s32.totalorder %v360_v21, 1 }
 0x4a0   :  { %vm362_vm3 = vmand %vm4954_vm5, %vm361_vm15 }
 0x4a1   :  { %v3893_v15 = vpop.eup %3892  ;;  %vm608_vm4 = vmand %vm4176_vm7, %vm361_vm15  ;;  %vm484_vm15 = vcmp.gt.s32.totalorder %v4154_v41, 2 }
 0x4a2   :  { %395 = vrot.lane.b32.xlu1 %v3893_v15, %s4038_s16  ;;  %v485_v43 = vsel %vm484_vm15, 1, %v4042_v42  ;;  %vm4330_vm15 = vmand %vm4176_vm7, %vm234_vm9  ;;  %vm1240_vm9 = vcmp.eq.s32.totalorder %v4154_v41, 3 }
 0x4a6   :  { %366 = vperm.xlu1 %3876, %v364_v16  }
 0x4aa   :  { %405 = vrot.lane.b32.xlu1 %v392_v14, %s4044_s30 }
 0x514   :  { %v396_v19 = vpop.permute.xlu1 %395 }
 0x515   :  { %v398_v20 = vmul.f32 %v3891_v7, %v396_v19 }
 0x517   :  { %400 = vrot.lane.b32.xlu0 %v398_v20, %s4043_s1 }
 0x521   :  { %v367_v22 = vpop.permute.xlu1 %366 }
 0x522   :  { %vm368_vm10 = vcmp.eq.s32.totalorder %v367_v22, 1 }
 0x523   :  { %vm369_vm11 = vmand %vm4176_vm7, %vm368_vm10 }
 0x524   :  { %vm4225_vm13 = vmor %vm362_vm3, %vm369_vm11 }
 0x525   :  { %vm607_vm14 = vmand %vm4954_vm5, %vm368_vm10  ;;  %v406_v25 = vpop.permute.xlu1 %405 }
 0x526   :  { %vm4231_vm6 = vmor %vm607_vm14, %vm608_vm4  ;;  %v408_v27 = vsel %vm4225_vm13, %v406_v25, %v280_v60 }
 0x527   :  { %501 = vrot.lane.b32.xlu1 %v408_v27, %s4038_s16  ;;  %vm4322_vm14 = vmand %vm4954_vm5, %vm244_vm8  ;;  %vm1111_vm8 = vcmp.eq.s32.totalorder %v4154_v41, 2 }
 0x589   :  { %v4238_v28 = vpop.permute.xlu0 %400 }
 0x58a   :  { %v403_v29 = vsel %vm4225_vm13, %v4238_v28, %v4196_v58 }
 0x58b   :  { %3717 = vmatmul.mubr.msk.f32.vlgmr.msra.gmra.mxu1 %vm4946_vm1, %v403_v29 }
 0x58c   :  { %3720 = vmatpush3.msra.mxu1 %v4087_v4  ;;  %3723 = vmatprep.mubr.msk.f32.mxu1 %vm4947_vm0, %v4039_v0 }
 0x58d   :  { %3721 = vmatprep.subr.mxu1 %v4039_v0 }
 0x58e   :  { %3722 = vmatpush3.msra.mxu1 %v4092_v5 }
 0x58f   :  { %3726 = vmatprep.subr.mxu1 %v4039_v0 }
 0x64b   :  { %v479_v31 = vpop.f32.mrf.mxu1 }
 0x64c   :  { %v483_v32 = vadd.f32 %v479_v31, %v4130_v17  ;;  %v502_v17 = vpop.permute.xlu1 %501 }
 0x64d   :  { %v3718_v33 = vpop.f32.mrf.mxu1 }
 0x64e   :  { %3894 = vtanh.f32 %v483_v32  ;;  %v3553_v35 = vmul.f32 -1.442695, %v483_v32 }
 0x650   :  { %3896 = vpow2.f32 %v3553_v35 }
 0x65b   :  { %v3895_v34 = vpop.eup %3894 }
 0x65c   :  { %506 = vrot.lane.b32.xlu0 %v3895_v34, %s4041_s0 }
 0x65d   :  { %v3897_v36 = vpop.eup %3896 }
 0x65e   :  { %v496_v37 = vadd.f32 1.0, %v3897_v36 }
 0x660   :  { %3898 = vrcp.f32 %v496_v37 }
 0x66d   :  { %v3899_v38 = vpop.eup %3898 }
 0x66e   :  { %v504_v44 = vmul.f32 %v3899_v38, %v502_v17  ;;  %v765_v17 = vld [vmem:[#allocation2 + $0x50] sm:$0xff] }
 0x6ce   :  { %v507_v39 = vpop.permute.xlu0 %506 }
 0x6cf   :  { %v509_v40 = vmul.f32 %v3899_v38, %v507_v39 }
 0x6d1   :  { %511 = vrot.lane.b32.xlu0 %v509_v40, %s4038_s16 }
 0x6d5   :  { %487 = vperm.xlu0 %3877, %v485_v43  }
 0x743   :  { %v512_v45 = vpop.permute.xlu0 %511 }
 0x744   :  { %v514_v46 = vadd.f32 %v512_v45, %v504_v44 }
 0x746   :  { %3900 = vtanh.f32 %v514_v46  ;;  %527 = vrot.lane.b32.xlu0 %v514_v46, %s4044_s30  ;;  %v4303_v46 = vld [vmem:[#allocation2 + $0x80] sm:$0xff] }
 0x750   :  { %v488_v48 = vpop.permute.xlu0 %487 }
 0x751   :  { %vm489_vm3 = vcmp.eq.s32.totalorder %v488_v48, 1  ;;  %v4969_v48 = vmov 0 }
 0x752   :  { %vm490_vm4 = vmand %vm4954_vm5, %vm489_vm3  ;;  %v4970_v48 = vsel %vm4322_vm14, 4294967295, %v4969_v48 }
 0x753   :  { %v3901_v47 = vpop.eup %3900  ;;  %vm491_vm10 = vmand %vm4176_vm7, %vm489_vm3 }
 0x754   :  { %517 = vrot.lane.b32.xlu1 %v3901_v47, %s4038_s16  ;;  %vm4262_vm11 = vmor %vm490_vm4, %vm491_vm10  ;;  %v4307_v47 = vld [vmem:[#allocation2 + $0x70] sm:$0xff]  ;;  %vm4949_vm4 = vcmask 64512   ;;  %vm1118_vm10 = vcmp.eq.s32.totalorder %v4154_v41, 4 }
 0x755   :  { %vm4950_vm3 = vmor %vm4322_vm14, %vm4330_vm15 }
 0x7b8   :  { %v528_v50 = vpop.permute.xlu0 %527 }
 0x7b9   :  { %v530_v57 = vsel %vm4262_vm11, %v528_v50, %v408_v27  ;;  %v4971_v50 = vmov 0 }
 0x7ba   :  { %618 = vrot.lane.b32.xlu0 %v530_v57, %s4038_s16  ;;  %v4972_v50 = vsel %vm4330_vm15, 4294967295, %v4971_v50 }
 0x7c6   :  { %v518_v59 = vpop.permute.xlu1 %517 }
 0x7c7   :  { %v520_v60 = vmul.f32 %v3899_v38, %v518_v59 }
 0x7c9   :  { %522 = vrot.lane.b32.xlu1 %v520_v60, %s4043_s1  ;;  %v409_v60 = vsel %vm4225_vm13, %v4238_v28, 0.0 }
 0x83b   :  { %v4270_v61 = vpop.permute.xlu1 %522 }
 0x83c   :  { %v525_v62 = vsel %vm4262_vm11, %v4270_v61, %v403_v29 }
 0x83d   :  { %3724 = vmatmul.mubr.msk.f32.vlgmr.msra.gmra.mxu1 %vm4946_vm1, %v525_v62 }
 0x83e   :  { %3727 = vmatpush3.msra.mxu1 %v4087_v4  ;;  %3730 = vmatprep.mubr.msk.f32.mxu1 %vm4947_vm0, %v4039_v0 }
 0x83f   :  { %3728 = vmatprep.subr.mxu1 %v4039_v0 }
 0x840   :  { %3729 = vmatpush3.msra.mxu1 %v4092_v5  ;;  %v619_v5 = vpop.permute.xlu0 %618 }
 0x841   :  { %3752 = vmatprep.subr.mxu1 %v4039_v0 }
 0x8fd   :  { %v602_v63 = vpop.f32.mrf.mxu1 }
 0x8fe   :  { %v606_v1 = vadd.f32 %v602_v63, %v4141_v24  ;;  %v531_v63 = vsel %vm4262_vm11, %v4270_v61, 0.0 }
 0x8ff   :  { %v3725_v2 = vpop.f32.mrf.mxu1 }
 0x900   :  { %3902 = vtanh.f32 %v606_v1  ;;  %v3555_v6 = vmul.f32 -1.442695, %v606_v1 }
 0x902   :  { %3904 = vpow2.f32 %v3555_v6 }
 0x90d   :  { %v3903_v3 = vpop.eup %3902 }
 0x90e   :  { %623 = vrot.lane.b32.xlu1 %v3903_v3, %s4041_s0 }
 0x90f   :  { %v3905_v4 = vpop.eup %3904 }
 0x910   :  { %v613_v7 = vadd.f32 1.0, %v3905_v4  ;;  %v767_v4 = vld [vmem:[#allocation2 + $0x90] ss:$0 sm:$0xff] }
 0x912   :  { %3906 = vrcp.f32 %v613_v7 }
 0x91f   :  { %v3907_v8 = vpop.eup %3906 }
 0x920   :  { %v621_v11 = vmul.f32 %v3907_v8, %v619_v5 }
 0x980   :  { %v624_v9 = vpop.permute.xlu1 %623 }
 0x981   :  { %v626_v10 = vmul.f32 %v3907_v8, %v624_v9 }
 0x983   :  { %628 = vrot.lane.b32.xlu1 %v626_v10, %s4038_s16 }
 0x9f5   :  { %v629_v12 = vpop.permute.xlu1 %628 }
 0x9f6   :  { %v631_v13 = vadd.f32 %v629_v12, %v621_v11 }
 0x9f8   :  { %3908 = vtanh.f32 %v631_v13 }
 0xa05   :  { %v3909_v24 = vpop.eup %3908 }
 0xa06   :  { %634 = vrot.lane.b32.xlu0 %v3909_v24, %s4038_s16 }
 0xa0a   :  { %644 = vrot.lane.b32.xlu0 %v631_v13, %s4044_s30 }
 0xa78   :  { %v635_v14 = vpop.permute.xlu0 %634 }
 0xa79   :  { %v637_v15 = vmul.f32 %v3907_v8, %v635_v14 }
 0xa7b   :  { %639 = vrot.lane.b32.xlu1 %v637_v15, %s4043_s1 }
 0xa7c   :  { %v645_v16 = vpop.permute.xlu0 %644 }
 0xa7d   :  { %v647_v19 = vsel %vm4231_vm6, %v645_v16, %v530_v57 }
 0xa7e   :  { %735 = vrot.lane.b32.xlu0 %v647_v19, %s4038_s16 }
 0xaed   :  { %v640_v20 = vpop.permute.xlu1 %639 }
 0xaee   :  { %v642_v21 = vsel %vm4231_vm6, %v640_v20, %v525_v62  ;;  %v648_v59 = vsel %vm4231_vm6, %v640_v20, 0.0 }
 0xaef   :  { %3731 = vmatmul.mubr.msk.f32.vlgmr.msra.gmra.mxu1 %vm4946_vm1, %v642_v21  ;;  %v762_v62 = vsel %vm4949_vm4, %v409_v60, %v648_v59  ;;  %v763_v1 = vsel %vm4949_vm4, %v648_v59, %v409_v60 }
 0xaf0   :  { %3756 = vmatprep.mubr.msk.f32.mxu1 %vm4947_vm0, %v4039_v0  ;;  %v736_v37 = vpop.permute.xlu0 %735  ;;  %3753 = vmatpush3.msra.mxu1 %v4303_v46 }
 0xaf1   :  { %3754 = vmatprep.subr.mxu1 %v4039_v0 }
 0xaf2   :  { %3755 = vmatpush3.msra.mxu1 %v4307_v47 }
 0xaf3   :  { %3757 = vmatmul.mubr.f32.vlgmr.msra.gmra.mxu1 %v4039_v0  ;;  %3759 = vmatprep.subr.mxu1 %v4039_v0 }
 0xaf4   :  { %3760 = vmatpush3.msra.mxu1 %v4303_v46  ;;  %3763 = vmatprep.mubr.msk.f32.mxu1 %vm4947_vm0, %v4039_v0 }
 0xaf5   :  { %3761 = vmatprep.subr.mxu1 %v4039_v0 }
 0xaf6   :  { %3762 = vmatpush3.msra.mxu1 %v4307_v47 }
 0xaf7   :  { %3766 = vmatprep.subr.mxu1 %v4039_v0 }
 0xbaf   :  { %v719_v22 = vpop.f32.mrf.mxu1 }
 0xbb0   :  { %v723_v25 = vadd.f32 %v719_v22, %v4147_v30  ;;  %v766_v30 = vld [vmem:[#allocation2 + $0x60] sm:$0xff] }
 0xbb1   :  { %v3732_v27 = vpop.f32.mrf.mxu1  ;;  %3734 = vmatpush3.msra.mxu0 %v766_v30 }
 0xbb2   :  { %3910 = vtanh.f32 %v723_v25  ;;  %v3557_v31 = vmul.f32 -1.442695, %v723_v25  ;;  %3735 = vmatprep.subr.mxu0 %v4039_v0 }
 0xbb3   :  { %3736 = vmatpush3.msra.mxu0 %v765_v17  ;;  %v942_v61 = vpop.f32.mrf.mxu1 }
 0xbb4   :  { %3912 = vpow2.f32 %v3557_v31  ;;  %3787 = vmatprep.subr.mxu0 %v4039_v0 }
 0xbb5   :  { %v3758_v2 = vpop.f32.mrf.mxu1 }
 0xbbf   :  { %v3911_v29 = vpop.eup %3910 }
 0xbc0   :  { %740 = vrot.lane.b32.xlu1 %v3911_v29, %s4041_s0 }
 0xbc1   :  { %v3913_v32 = vpop.eup %3912 }
 0xbc2   :  { %v730_v33 = vadd.f32 1.0, %v3913_v32 }
 0xbc4   :  { %3914 = vrcp.f32 %v730_v33 }
 0xbd1   :  { %v3915_v34 = vpop.eup %3914 }
 0xbd2   :  { %v738_v38 = vmul.f32 %v3915_v34, %v736_v37 }
 0xc32   :  { %v741_v35 = vpop.permute.xlu1 %740 }
 0xc33   :  { %v743_v36 = vmul.f32 %v3915_v34, %v741_v35 }
 0xc35   :  { %745 = vrot.lane.b32.xlu1 %v743_v36, %s4038_s16 }
 0xca7   :  { %v746_v39 = vpop.permute.xlu1 %745 }
 0xca8   :  { %v748_v40 = vadd.f32 %v746_v39, %v738_v38 }
 0xcaa   :  { %3916 = vtanh.f32 %v748_v40 }
 0xcb7   :  { %v3917_v43 = vpop.eup %3916 }
 0xcb8   :  { %751 = vrot.lane.b32.xlu0 %v3917_v43, %s4038_s16 }
 0xd2a   :  { %v752_v44 = vpop.permute.xlu0 %751 }
 0xd2b   :  { %v754_v45 = vmul.f32 %v3915_v34, %v752_v44 }
 0xd2d   :  { %756 = vrot.lane.b32.xlu1 %v754_v45, %s4043_s1 }
 0xd9f   :  { %v757_v53 = vpop.permute.xlu1 %756 }
 0xda0   :  { %v759_v57 = vsel %vm4950_vm3, %v757_v53, 0.0 }
 0xda1   :  { %v761_v54 = vsel %vm4949_vm4, %v4196_v58, %v759_v57  ;;  %v764_v28 = vsel %vm4949_vm4, %v759_v57, %v4196_v58 }
 0xda2   :  { %3738 = vmatmul.mubr.msk.f32.vlgmr.msra.gmra.mxu0 %vm4946_vm1, %v761_v54 }
 0xda3   :  { %3740 = vmatprep.mubr.msk.f32.mxu0 %vm4947_vm0, %v4039_v0 }
 0xda6   :  { %3741 = vmatmul.mubr.msk.f32.gmra.mxu0 %vm4946_vm1, %v762_v62 }
 0xda7   :  { %3743 = vmatprep.mubr.msk.f32.mxu0 %vm4947_vm0, %v4039_v0 }
 0xdaa   :  { %3744 = vmatmul.mubr.msk.f32.gmra.mxu0 %vm4946_vm1, %v531_v63 }
 0xdab   :  { %3746 = vmatprep.mubr.msk.f32.mxu0 %vm4947_vm0, %v4039_v0 }
 0xdae   :  { %3747 = vmatmul.mubr.msk.f32.gmra.mxu0 %vm4946_vm1, %v763_v1 }
 0xdaf   :  { %3749 = vmatprep.mubr.msk.f32.mxu0 %vm4947_vm0, %v4039_v0 }
 0xdb2   :  { %3750 = vmatmul.mubr.msk.f32.gmra.mxu0 %vm4946_vm1, %v764_v28 }
 0xdb3   :  { %3789 = vmatprep.mubr.msk.f32.mxu0 %vm4947_vm0, %v4039_v0 }
 0xe62   :  { %v849_v3 = vpop.f32.mrf.mxu0 }
 0xe63   :  { %v850_v16 = vadd.f32 %v849_v3, %v767_v4 }
 0xe64   :  { %v3739_v6 = vpop.f32.mrf.mxu0 }
 0xe66   :  { %v854_v7 = vpop.f32.mrf.mxu0 }
 0xe67   :  { %v855_v8 = vadd.f32 %v854_v7, %v767_v4 }
 0xe68   :  { %v3742_v9 = vpop.f32.mrf.mxu0 }
 0xe6a   :  { %v859_v10 = vpop.f32.mrf.mxu0 }
 0xe6b   :  { %v4372_v5 = vadd.f32 %v859_v10, %v767_v4 }
 0xe6c   :  { %v3745_v11 = vpop.f32.mrf.mxu0 }
 0xe6e   :  { %v864_v12 = vpop.f32.mrf.mxu0 }
 0xe6f   :  { %v865_v13 = vadd.f32 %v864_v12, %v767_v4 }
 0xe70   :  { %v3748_v58 = vpop.f32.mrf.mxu0 }
 0xe71   :  { %v997_v24 = vsel %vm30_vm2, %v855_v8, %v865_v13  ;;  %v4378_v14 = vsel %vm30_vm2, %v865_v13, %v855_v8 }
 0xe72   :  { %v869_v15 = vpop.f32.mrf.mxu0 }
 0xe73   :  { %v870_v19 = vadd.f32 %v869_v15, %v767_v4 }
 0xe74   :  { %v3751_v20 = vpop.f32.mrf.mxu0 }
 0xe75   :  { %v875_v21 = vsel %vm30_vm2, %v850_v16, %v870_v19  ;;  %v4384_v22 = vsel %vm30_vm2, %v870_v19, %v850_v16  ;;  %vm981_vm2 = vcmp.eq.s32.totalorder %v4154_v41, 1 }
 0xe76   :  { %v946_v25 = vadd.f32 %v942_v61, %v875_v21 }
 0xe78   :  { %3918 = vtanh.f32 %v946_v25  ;;  %v3563_v29 = vmul.f32 -1.442695, %v946_v25 }
 0xe7a   :  { %3920 = vpow2.f32 %v3563_v29 }
 0xe85   :  { %v3919_v27 = vpop.eup %3918 }
 0xe86   :  { %956 = vrot.lane.b32.xlu0 %v3919_v27, %s4041_s0 }
 0xe87   :  { %v3921_v31 = vpop.eup %3920 }
 0xe88   :  { %v950_v32 = vadd.f32 1.0, %v3921_v31 }
 0xe8a   :  { %3922 = vrcp.f32 %v950_v32 }
 0xe97   :  { %v3923_v33 = vpop.eup %3922 }
 0xe98   :  { %v954_v36 = vmul.f32 0.0, %v3923_v33 }
 0xef8   :  { %v957_v34 = vpop.permute.xlu0 %956 }
 0xef9   :  { %v959_v35 = vmul.f32 %v3923_v33, %v957_v34 }
 0xefb   :  { %961 = vrot.lane.b32.xlu1 %v959_v35, %s4038_s16 }
 0xf6d   :  { %v962_v37 = vpop.permute.xlu1 %961 }
 0xf6e   :  { %v964_v18 = vadd.f32 %v962_v37, %v954_v36 }
 0xf70   :  { %3924 = vtanh.f32 %v964_v18 }
 0xf7d   :  { %v3925_v38 = vpop.eup %3924 }
 0xf7e   :  { %967 = vrot.lane.b32.xlu0 %v3925_v38, %s4038_s16 }
 0xf82   :  { %977 = vrot.lane.b32.xlu0 %v964_v18, %s4044_s30 }
 0xff0   :  { %v968_v39 = vpop.permute.xlu0 %967 }
 0xff1   :  { %v970_v40 = vmul.f32 %v3923_v33, %v968_v39 }
 0xff3   :  { %972 = vrot.lane.b32.xlu1 %v970_v40, %s4043_s1 }
 0xff4   :  { %v978_v30 = vpop.permute.xlu0 %977 }
 0xff5   :  { %v980_v43 = vsel %vm4190_vm12, %v978_v30, 0.0 }
 0xff6   :  { %1080 = vrot.lane.b32.xlu0 %v980_v43, %s4038_s16 }
0x1065   :  { %v973_v17 = vpop.permute.xlu1 %972 }
0x1066   :  { %v4396_v44 = vsel %vm4190_vm12, %v973_v17, 0.0  ;;  %vm988_vm12 = vcmp.eq.s32.totalorder %v4154_v41, 5 }
0x1067   :  { %3764 = vmatmul.mubr.msk.f32.vlgmr.msra.gmra.mxu1 %vm4946_vm1, %v4396_v44 }
0x1068   :  { %3767 = vmatpush3.msra.mxu1 %v4303_v46  ;;  %3770 = vmatprep.mubr.msk.f32.mxu1 %vm4947_vm0, %v4039_v0  ;;  %v1081_v28 = vpop.permute.xlu0 %1080 }
0x1069   :  { %3768 = vmatprep.subr.mxu1 %v4039_v0 }
0x106a   :  { %3769 = vmatpush3.msra.mxu1 %v4307_v47 }
0x106b   :  { %3773 = vmatprep.subr.mxu1 %v4039_v0 }
0x1127   :  { %v1067_v45 = vpop.f32.mrf.mxu1 }
0x1128   :  { %v1071_v53 = vadd.f32 %v1067_v45, %v997_v24 }
0x1129   :  { %v3765_v57 = vpop.f32.mrf.mxu1 }
0x112a   :  { %3926 = vtanh.f32 %v1071_v53  ;;  %v3565_v54 = vmul.f32 -1.442695, %v1071_v53 }
0x112c   :  { %3928 = vpow2.f32 %v3565_v54 }
0x1137   :  { %v3927_v56 = vpop.eup %3926 }
0x1138   :  { %1085 = vrot.lane.b32.xlu1 %v3927_v56, %s4041_s0 }
0x1139   :  { %v3929_v59 = vpop.eup %3928 }
0x113a   :  { %v1075_v60 = vadd.f32 1.0, %v3929_v59 }
0x113c   :  { %3930 = vrcp.f32 %v1075_v60 }
0x1149   :  { %v3931_v62 = vpop.eup %3930 }
0x114a   :  { %v1083_v61 = vmul.f32 %v3931_v62, %v1081_v28 }
0x11aa   :  { %v1086_v63 = vpop.permute.xlu1 %1085 }
0x11ab   :  { %v1088_v1 = vmul.f32 %v3931_v62, %v1086_v63 }
0x11ad   :  { %1090 = vrot.lane.b32.xlu1 %v1088_v1, %s4038_s16 }
0x121f   :  { %v1091_v2 = vpop.permute.xlu1 %1090 }
0x1220   :  { %v1093_v3 = vadd.f32 %v1091_v2, %v1083_v61 }
0x1222   :  { %3932 = vtanh.f32 %v1093_v3 }
0x122f   :  { %v3933_v6 = vpop.eup %3932 }
0x1230   :  { %1096 = vrot.lane.b32.xlu0 %v3933_v6, %s4038_s16 }
0x1234   :  { %1106 = vrot.lane.b32.xlu0 %v1093_v3, %s4044_s30 }
0x12a2   :  { %v1097_v4 = vpop.permute.xlu0 %1096 }
0x12a3   :  { %v1099_v7 = vmul.f32 %v3931_v62, %v1097_v4 }
0x12a5   :  { %1101 = vrot.lane.b32.xlu1 %v1099_v7, %s4043_s1 }
0x12a6   :  { %v1107_v8 = vpop.permute.xlu0 %1106 }
0x12a7   :  { %v1109_v9 = vsel %vm4225_vm13, %v1107_v8, %v980_v43 }
0x12a8   :  { %1209 = vrot.lane.b32.xlu0 %v1109_v9, %s4038_s16 }
0x1317   :  { %v4414_v10 = vpop.permute.xlu1 %1101 }
0x1318   :  { %v1104_v11 = vsel %vm4225_vm13, %v4414_v10, %v4396_v44 }
0x1319   :  { %3771 = vmatmul.mubr.msk.f32.vlgmr.msra.gmra.mxu1 %vm4946_vm1, %v1104_v11 }
0x131a   :  { %3774 = vmatpush3.msra.mxu1 %v4303_v46  ;;  %3777 = vmatprep.mubr.msk.f32.mxu1 %vm4947_vm0, %v4039_v0  ;;  %v1210_v27 = vpop.permute.xlu0 %1209 }
0x131b   :  { %3775 = vmatprep.subr.mxu1 %v4039_v0 }
0x131c   :  { %3776 = vmatpush3.msra.mxu1 %v4307_v47 }
0x131d   :  { %3780 = vmatprep.subr.mxu1 %v4039_v0 }
0x13d9   :  { %v1196_v12 = vpop.f32.mrf.mxu1 }
0x13da   :  { %v1200_v13 = vadd.f32 %v1196_v12, %v4372_v5 }
0x13db   :  { %v3772_v58 = vpop.f32.mrf.mxu1 }
0x13dc   :  { %3934 = vtanh.f32 %v1200_v13  ;;  %v3567_v15 = vmul.f32 -1.442695, %v1200_v13  ;;  %v1112_v58 = vsel %vm1111_vm8, 1, %v4042_v42 }
0x13de   :  { %3936 = vpow2.f32 %v3567_v15 }
0x13e9   :  { %v3935_v24 = vpop.eup %3934 }
0x13ea   :  { %1214 = vrot.lane.b32.xlu1 %v3935_v24, %s4041_s0  ;;  %v1241_v24 = vsel %vm1240_vm9, 1, %v4042_v42 }
0x13eb   :  { %v3937_v16 = vpop.eup %3936 }
0x13ec   :  { %v1204_v19 = vadd.f32 1.0, %v3937_v16 }
0x13ee   :  { %3938 = vrcp.f32 %v1204_v19 }
0x13fb   :  { %v3939_v20 = vpop.eup %3938 }
0x13fc   :  { %v1212_v29 = vmul.f32 %v3939_v20, %v1210_v27  ;;  %v3573_v27 = vadd.s32 4294967295, %v4154_v41 }
0x145c   :  { %v1215_v21 = vpop.permute.xlu1 %1214 }
0x145d   :  { %v1217_v25 = vmul.f32 %v3939_v20, %v1215_v21 }
0x145f   :  { %1219 = vrot.lane.b32.xlu1 %v1217_v25, %s4038_s16 }
0x14d1   :  { %v1220_v31 = vpop.permute.xlu1 %1219 }
0x14d2   :  { %v1222_v32 = vadd.f32 %v1220_v31, %v1212_v29  ;;  %v989_v29 = vsel %vm988_vm12, 1, %v4042_v42  ;;  %v1119_v31 = vsel %vm1118_vm10, 1, %v4042_v42 }
0x14d4   :  { %3940 = vtanh.f32 %v1222_v32 }
0x14e1   :  { %v3941_v5 = vpop.eup %3940 }
0x14e2   :  { %1225 = vrot.lane.b32.xlu0 %v3941_v5, %s4038_s16 }
0x14e6   :  { %1235 = vrot.lane.b32.xlu0 %v1222_v32, %s4044_s30 }
0x1554   :  { %v1226_v33 = vpop.permute.xlu0 %1225 }
0x1555   :  { %v1228_v34 = vmul.f32 %v3939_v20, %v1226_v33 }
0x1557   :  { %1230 = vrot.lane.b32.xlu1 %v1228_v34, %s4043_s1 }
0x1558   :  { %v1236_v35 = vpop.permute.xlu0 %1235 }
0x1559   :  { %v1238_v36 = vsel %vm4262_vm11, %v1236_v35, %v1109_v9 }
0x155a   :  { %1333 = vrot.lane.b32.xlu0 %v1238_v36, %s4038_s16 }
0x15c9   :  { %v4436_v37 = vpop.permute.xlu1 %1230 }
0x15ca   :  { %v1233_v18 = vsel %vm4262_vm11, %v4436_v37, %v1104_v11  ;;  %v1239_v23 = vsel %vm4262_vm11, %v4436_v37, 0.0 }
0x15cb   :  { %3778 = vmatmul.mubr.msk.f32.vlgmr.msra.gmra.mxu1 %vm4946_vm1, %v1233_v18 }
0x15cc   :  { %3781 = vmatpush3.msra.mxu1 %v4303_v46  ;;  %3784 = vmatprep.mubr.msk.f32.mxu1 %vm4947_vm0, %v4039_v0 }
0x15cd   :  { %3782 = vmatprep.subr.mxu1 %v4039_v0 }
0x15ce   :  { %3783 = vmatpush3.msra.mxu1 %v4307_v47  ;;  %v1334_v47 = vpop.permute.xlu0 %1333 }
0x15cf   :  { %3792 = vmatprep.subr.mxu1 %v4039_v0 }
0x168b   :  { %v1320_v38 = vpop.f32.mrf.mxu1 }
0x168c   :  { %v1324_v39 = vadd.f32 %v1320_v38, %v4378_v14 }
0x168d   :  { %v3779_v40 = vpop.f32.mrf.mxu1 }
0x168e   :  { %3942 = vtanh.f32 %v1324_v39  ;;  %v3569_v43 = vmul.f32 -1.442695, %v1324_v39  ;;  %v4605_v39 = vld [vmem:[#allocation2 + $0x1f0] sm:$0xff] }
0x1690   :  { %3944 = vpow2.f32 %v3569_v43 }
0x169b   :  { %v3943_v30 = vpop.eup %3942 }
0x169c   :  { %1338 = vrot.lane.b32.xlu1 %v3943_v30, %s4041_s0  ;;  %v4611_v30 = vld [vmem:[#allocation2 + $0x1e0] sm:$0xff] }
0x169d   :  { %v3945_v46 = vpop.eup %3944 }
0x169e   :  { %v1328_v17 = vadd.f32 1.0, %v3945_v46 }
0x16a0   :  { %3946 = vrcp.f32 %v1328_v17 }
0x16ad   :  { %v3947_v45 = vpop.eup %3946 }
0x16ae   :  { %v1336_v56 = vmul.f32 %v3947_v45, %v1334_v47 }
0x170e   :  { %v1339_v53 = vpop.permute.xlu1 %1338 }
0x170f   :  { %v1341_v57 = vmul.f32 %v3947_v45, %v1339_v53  ;;  %v4629_v53 = vld [vmem:[#allocation2 + $0x1b0] sm:$0xff] }
0x1711   :  { %1343 = vrot.lane.b32.xlu1 %v1341_v57, %s4038_s16 }
0x1783   :  { %v1344_v54 = vpop.permute.xlu1 %1343 }
0x1784   :  { %v1346_v59 = vadd.f32 %v1344_v54, %v1336_v56 }
0x1786   :  { %3948 = vtanh.f32 %v1346_v59 }
0x1793   :  { %v3949_v14 = vpop.eup %3948 }
0x1794   :  { %1349 = vrot.lane.b32.xlu0 %v3949_v14, %s4038_s16 }
0x1798   :  { %1359 = vrot.lane.b32.xlu0 %v1346_v59, %s4044_s30  ;;  %v1658_v59 = vld [vmem:[#allocation2 + $0xd0] sm:$0xff] }
0x1806   :  { %v1350_v60 = vpop.permute.xlu0 %1349 }
0x1807   :  { %v1352_v62 = vmul.f32 %v3947_v45, %v1350_v60  ;;  %v1110_v45 = vsel %vm4225_vm13, %v4414_v10, 0.0  ;;  %vm4983_vm13 = vcmp.lt.s32.totalorder %v4166_v52, 8 }
0x1809   :  { %1354 = vrot.lane.b32.xlu1 %v1352_v62, %s4043_s1 }
0x180a   :  { %v1360_v63 = vpop.permute.xlu0 %1359 }
0x180b   :  { %v1362_v1 = vsel %vm4231_vm6, %v1360_v63, %v1238_v36 }
0x180c   :  { %1451 = vrot.lane.b32.xlu0 %v1362_v1, %s4038_s16 }
0x187b   :  { %v4457_v28 = vpop.permute.xlu1 %1354 }
0x187c   :  { %v1357_v61 = vsel %vm4231_vm6, %v4457_v28, %v1233_v18  ;;  %v1363_v10 = vsel %vm4231_vm6, %v4457_v28, 0.0  ;;  %vm4990_vm6 = vcmask 64512  }
0x187d   :  { %3785 = vmatmul.mubr.msk.f32.vlgmr.msra.gmra.mxu1 %vm4946_vm1, %v1357_v61 }
0x187e   :  { %3794 = vmatprep.mubr.msk.f32.mxu1 %vm4947_vm0, %v4039_v0  ;;  %v1452_v15 = vpop.permute.xlu0 %1451 }
0x193d   :  { %v1438_v2 = vpop.f32.mrf.mxu1 }
0x193e   :  { %v1442_v3 = vadd.f32 %v1438_v2, %v4384_v22  ;;  %v982_v22 = vsel %vm981_vm2, 1, %v4042_v42  ;;  %v1656_v2 = vld [vmem:[#allocation2 + $0xb0] sm:$0xff] }
0x193f   :  { %v3786_v6 = vpop.f32.mrf.mxu1 }
0x1940   :  { %3950 = vtanh.f32 %v1442_v3  ;;  %v3571_v7 = vmul.f32 -1.442695, %v1442_v3  ;;  %v1655_v3 = vld [vmem:[#allocation2 + $0xa0] sm:$0xff] }
0x1942   :  { %3952 = vpow2.f32 %v3571_v7 }
0x194d   :  { %v3951_v4 = vpop.eup %3950 }
0x194e   :  { %1456 = vrot.lane.b32.xlu1 %v3951_v4, %s4041_s0 }
0x194f   :  { %v3953_v8 = vpop.eup %3952 }
0x1950   :  { %v1446_v9 = vadd.f32 1.0, %v3953_v8 }
0x1952   :  { %3954 = vrcp.f32 %v1446_v9  ;;  %v1966_v9 = vld [vmem:[#allocation2 + $0x128] sm:$0xff] }
0x195f   :  { %v3955_v11 = vpop.eup %3954 }
0x1960   :  { %v1454_v16 = vmul.f32 %v3955_v11, %v1452_v15  ;;  %v1962_v15 = vld [vmem:[#allocation2 + $0x108] sm:$0xff] }
0x19c0   :  { %v1457_v12 = vpop.permute.xlu1 %1456 }
0x19c1   :  { %v1459_v13 = vmul.f32 %v3955_v11, %v1457_v12  ;;  %v1973_v12 = vld [vmem:[#allocation2 + $0x160] sm:$0xff] }
0x19c3   :  { %1461 = vrot.lane.b32.xlu1 %v1459_v13, %s4038_s16  ;;  %v1965_v13 = vld [vmem:[#allocation2 + $0x120] sm:$0xff] }
0x19c7   :  { %1489 = vrot.lane.b32.xlu1 %v4154_v41, %s4046_s4  ;;  %v4483_v41 = vshrl.u32 %v31_v51, 7  ;;  %v4617_v51 = vld [vmem:[#allocation2 + $0x1d0] sm:$0xff] }
0x19c9   :  { %v3572_v62 = vadd.s32 4294967295, %v4483_v41 }
0x19cb   :  { %984 = vperm.xlu1 %3876, %v982_v22  }
0x19cf   :  { %1114 = vperm.xlu1 %3876, %v1112_v58   ;;  %v1964_v58 = vld [vmem:[#allocation2 + $0x118] sm:$0xff] }
0x19d3   :  { %1243 = vperm.xlu1 %3876, %v1241_v24   ;;  %v1963_v24 = vld [vmem:[#allocation2 + $0x110] sm:$0xff] }
0x1a35   :  { %v1462_v19 = vpop.permute.xlu1 %1461 }
0x1a36   :  { %v1464_v20 = vadd.f32 %v1462_v19, %v1454_v16  ;;  %v1961_v16 = vld [vmem:[#allocation2 + $0x100] sm:$0xff]  ;;  %v1960_v19 = vld [vmem:[#allocation2 + $0xf8] sm:$0xff] }
0x1a38   :  { %3956 = vtanh.f32 %v1464_v20  ;;  %v1959_v20 = vld [vmem:[#allocation2 + $0xf0] sm:$0xff] }
0x1a39   :  { %v1490_v21 = vpop.permute.xlu1 %1489 }
0x1a3a   :  { %3855 = vpush %v1490_v21  ;;  %v1972_v21 = vld [vmem:[#allocation2 + $0x158] sm:$0xff] }
0x1a45   :  { %v3957_v25 = vpop.eup %3956 }
0x1a46   :  { %1467 = vrot.lane.b32.xlu0 %v3957_v25, %s4038_s16  ;;  %v985_v34 = vpop.permute.xlu1 %984  ;;  %v1971_v25 = vld [vmem:[#allocation2 + $0x150] sm:$0xff] }
0x1a47   :  { %vm4952_vm2 = vcmp.eq.s32.totalorder %v985_v34, 1 }
0x1a48   :  { %vm4488_vm12 = vmand %vm4954_vm5, %vm4952_vm2 }
0x1a4a   :  { %1495 = vrot.lane.b32.xlu0 %v3573_v27, %s4046_s4  ;;  %v1115_v35 = vpop.permute.xlu1 %1114  ;;  %v1970_v27 = vld [vmem:[#allocation2 + $0x148] sm:$0xff] }
0x1a4b   :  { %vm4951_vm8 = vcmp.eq.s32.totalorder %v1115_v35, 1 }
0x1a4c   :  { %vm4495_vm1 = vmand %vm4954_vm5, %vm4951_vm8 }
0x1a4e   :  { %991 = vperm.xlu0 %3877, %v989_v29   ;;  %v1244_v18 = vpop.permute.xlu1 %1243  ;;  %v1969_v29 = vld [vmem:[#allocation2 + $0x140] sm:$0xff] }
0x1a4f   :  { %vm1245_vm9 = vcmp.eq.s32.totalorder %v1244_v18, 1 }
0x1a50   :  { %vm4501_vm4 = vmand %vm4954_vm5, %vm1245_vm9 }
0x1a51   :  { %vm1247_vm15 = vmand %vm4176_vm7, %vm1245_vm9 }
0x1a52   :  { %1121 = vperm.xlu0 %3877, %v1119_v31   ;;  %v1968_v31 = vld [vmem:[#allocation2 + $0x138] sm:$0xff] }
0x1a6b   :  { %s3856_s5 = spop %3855 }
0x1a6c   :  { %v1492_v43 = vstv %s3856_s5 }
0x1a6d   :  { %vm1493_vm2 = vcmp.lt.s32.totalorder %v4483_v41, %v1492_v43  ;;  %v4614_v43 = vld [vmem:[#allocation2 + $0x1d8] sm:$0xff] }
0x1ab8   :  { %v1468_v32 = vpop.permute.xlu0 %1467 }
0x1ab9   :  { %v1470_v5 = vmul.f32 %v3955_v11, %v1468_v32  ;;  %v1974_v11 = vld [vmem:[#allocation2 + $0x168] sm:$0xff]  ;;  %v1967_v32 = vld [vmem:[#allocation2 + $0x130] sm:$0xff] }
0x1abb   :  { %1472 = vrot.lane.b32.xlu0 %v1470_v5, %s4043_s1  ;;  %v4599_v5 = vld [vmem:[#allocation2 + $0x1f8] sm:$0xff] }
0x1abc   :  { %v1496_v33 = vpop.permute.xlu0 %1495 }
0x1abd   :  { %3857 = vpush %v1496_v33  ;;  %v1659_v33 = vld [vmem:[#allocation2 + $0xe0] ss:$0 sm:$0xff] }
0x1ac9   :  { %v992_v36 = vpop.permute.xlu0 %991 }
0x1aca   :  { %vm4956_vm10 = vcmp.eq.s32.totalorder %v992_v36, 1 }
0x1acb   :  { %vm994_vm3 = vmand %vm4176_vm7, %vm4956_vm10  ;;  %vm4979_vm10 = vcmp.eq.s32.totalorder %v985_v34, 1 }
0x1acc   :  { %vm995_vm5 = vmor %vm4488_vm12, %vm994_vm3 }
0x1acd   :  { %v1122_v38 = vpop.permute.xlu0 %1121  ;;  %v996_v57 = vsel %vm995_vm5, %v4396_v44, 0.0  ;;  %vm1248_vm3 = vmor %vm4501_vm4, %vm1247_vm15  ;;  %vm4986_vm15 = vcmp.eq.s32.totalorder %v1115_v35, 1 }
0x1ace   :  { %vm4957_vm0 = vcmp.eq.s32.totalorder %v1122_v38, 1  ;;  %vm4984_vm12 = vcmp.eq.s32.totalorder %v1122_v38, 1  ;;  %vm1365_vm4 = vmand %vm4176_vm7, %vm4986_vm15 }
0x1acf   :  { %vm1124_vm8 = vmand %vm4176_vm7, %vm4957_vm0 }
0x1ad0   :  { %vm1125_vm14 = vmor %vm4495_vm1, %vm1124_vm8  ;;  %vm1482_vm1 = vcmp.lt.s32.totalorder %v4483_v41, 6  ;;  %vm4982_vm8 = vcmp.eq.s32.totalorder %v992_v36, 1 }
0x1ad1   :  { %vm4526_vm0 = vmand %vm4176_vm7, %vm4979_vm10  ;;  %v1126_v47 = vsel %vm1125_vm14, %v1110_v45, %v996_v57  ;;  %vm4992_vm7 = vcmask 130048   ;;  %v4626_v45 = vld [vmem:[#allocation2 + $0x1b8] sm:$0xff]  ;;  %v4632_v57 = vld [vmem:[#allocation2 + $0x1a8] sm:$0xff] }
0x1ad2   :  { %vm1476_vm9 = vmand %vm4983_vm13, %vm4982_vm8  ;;  %v1249_v44 = vsel %vm1248_vm3, %v1239_v23, %v1126_v47  ;;  %vm4987_vm3 = vnez %v4970_v48  ;;  %v4635_v47 = vld [vmem:[#allocation2 + $0x1a0] sm:$0xff]  ;;  %v4638_v23 = vld [vmem:[#allocation2 + $0x198] sm:$0xff] }
0x1ad3   :  { %vm4985_vm10 = vmmov %vm4983_vm13 }
0x1ad4   :  { %vm1364_vm5 = vmand %vm4985_vm10, %vm4984_vm12  ;;  %vm1484_vm12 = vcmp.gt.s32.totalorder %v3572_v62, 0 }
0x1ad5   :  { %vm1366_vm8 = vmor %vm1364_vm5, %vm1365_vm4  ;;  %v1485_v63 = vsel %vm1484_vm12, %v3572_v62, 0  ;;  %vm2979_vm12 = vcmask 1045504  }
0x1ad6   :  { %vm1478_vm11 = vmor %vm1476_vm9, %vm4526_vm0  ;;  %v1367_v49 = vsel %vm1366_vm8, %v1363_v10, %v1249_v44  ;;  %vm4991_vm0 = vmmov 0   ;;  %vm1486_vm10 = vcmp.eq.s32.totalorder %v4166_v52, %v1485_v63  ;;  %v4641_v44 = vld [vmem:[#allocation2 + $0x190] sm:$0xff]  ;;  %v4644_v10 = vld [vmem:[#allocation2 + $0x188] sm:$0xff] }
0x1ad7   :  { %vm4993_vm9 = vmmov %vm4992_vm7  ;;  %v2125_v63 = vld [vmem:[#allocation2 + $0x170] ss:$8 sm:$0x3] }
0x1ad8   :  { %vm1487_vm5 = vmand %vm1486_vm10, %vm1482_vm1 }
0x1ad9   :  { %v1488_v28 = vsel %vm1487_vm5, 1.0, %v4039_v0  ;;  %vm4995_vm15 = vmmov %vm4990_vm6  ;;  %vm3076_vm5 = vcmask 195584  }
0x1ada   :  { %vm4996_vm4 = vmmov %vm4992_vm7 }
0x1adb   :  { %vm4997_vm8 = vmmov %vm4996_vm4 }
0x1adc   :  { %vm4998_vm10 = vmmov %vm4995_vm15 }
0x1aee   :  { %s3858_s6 = spop %3857 }
0x1aef   :  { %v1498_v40 = vstv %s3858_s6 }
0x1af0   :  { %v1499_v46 = vsub.s32 %v1498_v40, %v4483_v41  ;;  %v4607_v40 = vld [vmem:[#allocation2 + $0x1e8] sm:$0xff] }
0x1af2   :  { %v1500_v17 = vsel %vm1493_vm2, %v1499_v46, %v4483_v41  ;;  %v4620_v46 = vld [vmem:[#allocation2 + $0x1c8] sm:$0xff] }
0x1af3   :  { %vm1501_vm2 = vcmp.eq.s32.totalorder %v4166_v52, %v1500_v17  ;;  %v4623_v17 = vld [vmem:[#allocation2 + $0x1c0] sm:$0xff] }
0x1af4   :  { %vm1502_vm14 = vmand %vm1501_vm2, %vm1482_vm1  ;;  %vm4988_vm2 = vnez %v4972_v50 }
0x1af5   :  { %v4555_v37 = vsel %vm1502_vm14, 1.0, %v4039_v0  ;;  %vm4989_vm13 = vmor %vm4987_vm3, %vm4988_vm2  ;;  %vm2191_vm2 = vcmask 523264  }
0x1af6   :  { %vm4994_vm14 = vmmov %vm4992_vm7 }
0x1b2d   :  { %v1473_v56 = vpop.permute.xlu0 %1472 }
0x1b2e   :  { %v1475_v55 = vsel %vm4989_vm13, %v1473_v56, 0.0  ;;  %v4647_v56 = vld [vmem:[#allocation2 + $0x180] sm:$0xff]  ;;  %vm2969_vm13 = vcmask 1040384  }
0x1b2f   :  { %v1479_v54 = vsel %vm1478_vm11, %v1475_v55, %v1367_v49  ;;  %vm4958_vm11 = vcmask 261120  }
0x1b30   :  { %3788 = vmatpush3.msra.mxu0 %v1479_v54 }
0x1b31   :  { %3790 = vmatmul.mubr.msk.f32.vlgmr.msra.gmra.mxu0 %vm4990_vm6, %v4555_v37  ;;  %3797 = vmatprep.subr.mxu0 %v4039_v0  ;;  %vm2971_vm6 = vcmask 1041408  }
0x1b32   :  { %3798 = vmatpush3.msra.mxu0 %v1658_v59  ;;  %3801 = vmatprep.mubr.msk.f32.mxu0 %vm4991_vm0, %v4039_v0 }
0x1b33   :  { %3799 = vmatprep.subr.mxu0 %v4039_v0 }
0x1b34   :  { %3800 = vmatpush3.msra.mxu0 %v1657_v26 }
0x1b35   :  { %3802 = vmatmul.mubr.msk.f32.vlgmr.msra.gmra.mxu0 %vm4992_vm7, %v1479_v54  ;;  %3811 = vmatprep.subr.mxu0 %v4039_v0  ;;  %vm2973_vm7 = vcmask 1042432  }
0x1b36   :  { %3812 = vmatpush3.msra.mxu0 %v1658_v59  ;;  %3815 = vmatprep.mubr.msk.f32.mxu0 %vm4991_vm0, %v4039_v0 }
0x1b37   :  { %3813 = vmatprep.subr.mxu0 %v4039_v0 }
0x1b38   :  { %3814 = vmatpush3.msra.mxu0 %v1657_v26 }
0x1b39   :  { %2003 = vmatprep.subr.mxu0 %v1974_v11 }
0x1bf1   :  { %v1573_v48 = vpop.f32.mrf.mxu0 }
0x1bf2   :  { %1578 = vrot.lane.b32.xlu1 %v1573_v48, %s4038_s16  ;;  %3816 = vmatmul.mubr.msk.f32.vlgmr.msra.gmra.mxu0 %vm4993_vm9, %v1573_v48  ;;  %v4047_v48 = vmov 1966171168   ;;  %vm2977_vm9 = vcmask 1044480  }
0x1bf3   :  { %v3791_v50 = vpop.f32.mrf.mxu0  ;;  %2043 = vmatprep.mubr.f32.mxu0 %v4039_v0  ;;  %2004 = vmatpush1.msra.mxu0 %v1973_v12 }
0x1bf4   :  { %2005 = vmatprep.subr.mxu0 %v1972_v21  ;;  %v2159_v50 = vunpack.c.l.s4 %v4047_v48 }
0x1bf5   :  { %v4576_v14 = vpop.f32.mrf.mxu0  ;;  %2006 = vmatpush1.msra.mxu0 %v1971_v25 }
0x1bf6   :  { %2007 = vmatprep.subr.mxu0 %v1970_v27 }
0x1bf7   :  { %v3803_v60 = vpop.f32.mrf.mxu0  ;;  %2008 = vmatpush1.msra.mxu0 %v1969_v29 }
0x1bf8   :  { %2009 = vmatprep.subr.mxu0 %v1968_v31  ;;  %v2133_v60 = vsub.s32 1, %v4483_v41 }
0x1bf9   :  { %2010 = vmatpush1.msra.mxu0 %v1967_v32 }
0x1bfa   :  { %2210 = vmatprep.subr.mxu0 %v4599_v5 }
0x1c64   :  { %v1579_v1 = vpop.permute.xlu1 %1578 }
0x1c65   :  { %v1581_v61 = vsel %vm4994_vm14, %v1479_v54, %v1579_v1  ;;  %vm4999_vm14 = vmmov %vm4998_vm10 }
0x1c66   :  { %3793 = vmatpush3.msra.mxu1 %v1581_v61 }
0x1c67   :  { %3795 = vmatmul.mubr.msk.f32.vlgmr.msra.gmra.mxu1 %vm4995_vm15, %v1488_v28  ;;  %3804 = vmatprep.subr.mxu1 %v4039_v0  ;;  %v2160_v28 = vunpack.c.0.s8 %v2159_v50  ;;  %vm5000_vm15 = vmmov %vm4996_vm4 }
0x1c68   :  { %3805 = vmatpush3.msra.mxu1 %v1656_v2  ;;  %3808 = vmatprep.mubr.msk.f32.mxu1 %vm4991_vm0, %v4039_v0 }
0x1c69   :  { %3806 = vmatprep.subr.mxu1 %v4039_v0 }
0x1c6a   :  { %3807 = vmatpush3.msra.mxu1 %v1655_v3 }
0x1c6b   :  { %3818 = vmatprep.subr.mxu1 %v4039_v0 }
0x1cb2   :  { %v4590_v6 = vpop.f32.mrf.mxu0 }
0x1cb4   :  { %v3817_v4 = vpop.f32.mrf.mxu0 }
0x1d27   :  { %v1651_v7 = vpop.f32.mrf.mxu1 }
0x1d28   :  { %1880 = vrot.lane.b32.xlu0 %v1651_v7, %s4044_s30  ;;  %3809 = vmatmul.mubr.msk.f32.vlgmr.msra.gmra.mxu1 %vm4996_vm4, %v1651_v7  ;;  %vm5001_vm4 = vmmov %vm4998_vm10 }
0x1d29   :  { %v3796_v8 = vpop.f32.mrf.mxu1  ;;  %3819 = vmatpush3.msra.mxu1 %v1656_v2  ;;  %3822 = vmatprep.mubr.msk.f32.mxu1 %vm4991_vm0, %v4039_v0 }
0x1d2a   :  { %3820 = vmatprep.subr.mxu1 %v4039_v0  ;;  %v4697_v8 = vsub.s32 %v2160_v28, %v4483_v41 }
0x1d2b   :  { %3821 = vmatpush3.msra.mxu1 %v1655_v3  ;;  %v2134_v3 = vrot.slane %v2125_v63, %v2133_v60 }
0x1d2c   :  { %2077 = vmatprep.subr.mxu1 %v1966_v9 }
0x1d9a   :  { %v1881_v22 = vpop.permute.xlu0 %1880 }
0x1d9b   :  { %3823 = vmatmul.mubr.msk.f32.vlgmr.msra.gmra.mxu1 %vm4997_vm8, %v1881_v22 }
0x1d9c   :  { %2078 = vmatpush1.msra.mxu1 %v1965_v13  ;;  %2117 = vmatprep.mubr.f32.mxu1 %v4039_v0 }
0x1d9d   :  { %2079 = vmatprep.subr.mxu1 %v1964_v58 }
0x1d9e   :  { %2080 = vmatpush1.msra.mxu1 %v1963_v24  ;;  %v1957_v24 = vld [vmem:[#allocation2 + $0x2b0] ss:$8 sm:$0x3] }
0x1d9f   :  { %2081 = vmatprep.subr.mxu1 %v1962_v15  ;;  %vm1958_vm3 = vcmp.gt.f32.partialorder %v1957_v24, 0.5 }
0x1da0   :  { %2082 = vmatpush1.msra.mxu1 %v1961_v16 }
0x1da1   :  { %2083 = vmatprep.subr.mxu1 %v1960_v19 }
0x1da2   :  { %2084 = vmatpush1.msra.mxu1 %v1959_v20 }
0x1da3   :  { %2349 = vmatprep.subr.mxu1 %v4599_v5 }
0x1de8   :  { %v1802_v34 = vpop.f32.mrf.mxu1 }
0x1de9   :  { %v1803_v35 = vadd.f32 %v1802_v34, %v4576_v14  ;;  %v4690_v14 = vsub.s32 0, %v4483_v41 }
0x1dea   :  { %v3810_v36 = vpop.f32.mrf.mxu1 }
0x1deb   :  { %v1806_v18 = vadd.f32 %v1803_v35, %v1659_v33  ;;  %v2130_v2 = vrot.slane %v2125_v63, %v4690_v14 }
0x1ded   :  { %v1807_v38 = vmax.f32 %v1806_v18, 0.0 }
0x1def   :  { %3581 = vmatmul.mubr.msk.f32.vlgmr.msra.gmra.mxu1 %vm4958_vm11, %v1807_v38 }
0x1df0   :  { %2350 = vmatpush1.msra.mxu1 %v4605_v39  ;;  %2397 = vmatprep.mubr.f32.mxu1 %v4039_v0 }
0x1df1   :  { %2351 = vmatprep.subr.mxu1 %v4607_v40 }
0x1df2   :  { %2352 = vmatpush1.msra.mxu1 %v4611_v30 }
0x1df3   :  { %2353 = vmatprep.subr.mxu1 %v4614_v43 }
0x1df4   :  { %2354 = vmatpush1.msra.mxu1 %v4617_v51 }
0x1df5   :  { %2355 = vmatprep.subr.mxu1 %v4620_v46 }
0x1df6   :  { %2356 = vmatpush1.msra.mxu1 %v4623_v17 }
0x1df7   :  { %2357 = vmatprep.subr.mxu1 %v4626_v45 }
0x1df8   :  { %2358 = vmatpush1.msra.mxu1 %v4629_v53 }
0x1df9   :  { %2359 = vmatprep.subr.mxu1 %v4632_v57 }
0x1dfa   :  { %2360 = vmatpush1.msra.mxu1 %v4635_v47 }
0x1dfb   :  { %2361 = vmatprep.subr.mxu1 %v4638_v23 }
0x1dfc   :  { %2362 = vmatpush1.msra.mxu1 %v4641_v44 }
0x1dfd   :  { %2363 = vmatprep.subr.mxu1 %v4644_v10 }
0x1dfe   :  { %2364 = vmatpush1.msra.mxu1 %v4647_v56 }
0x1dff   :  { %2597 = vmatprep.subr.mxu1 %v4599_v5 }
0x1e5b   :  { %v1950_v49 = vpop.f32.mrf.mxu1 }
0x1e5c   :  { %v1951_v55 = vadd.f32 %v1950_v49, %v4590_v6 }
0x1e5d   :  { %v3824_v54 = vpop.f32.mrf.mxu1 }
0x1e5e   :  { %v1954_v59 = vadd.f32 %v1951_v55, %v1659_v33 }
0x1e60   :  { %v1955_v26 = vmax.f32 %v1954_v59, 0.0 }
0x1e62   :  { %3580 = vmatmul.mubr.msk.f32.vlgmr.msra.gmra.mxu0 %vm4958_vm11, %v1955_v26 }
0x1e63   :  { %2211 = vmatpush1.msra.mxu0 %v4605_v39  ;;  %2258 = vmatprep.mubr.f32.mxu0 %v4039_v0 }
0x1e64   :  { %2212 = vmatprep.subr.mxu0 %v4607_v40 }
0x1e65   :  { %2213 = vmatpush1.msra.mxu0 %v4611_v30 }
0x1e66   :  { %2214 = vmatprep.subr.mxu0 %v4614_v43 }
0x1e67   :  { %2215 = vmatpush1.msra.mxu0 %v4617_v51 }
0x1e68   :  { %2216 = vmatprep.subr.mxu0 %v4620_v46 }
0x1e69   :  { %2217 = vmatpush1.msra.mxu0 %v4623_v17 }
0x1e6a   :  { %2218 = vmatprep.subr.mxu0 %v4626_v45 }
0x1e6b   :  { %2219 = vmatpush1.msra.mxu0 %v4629_v53 }
0x1e6c   :  { %2220 = vmatprep.subr.mxu0 %v4632_v57 }
0x1e6d   :  { %2221 = vmatpush1.msra.mxu0 %v4635_v47 }
0x1e6e   :  { %2222 = vmatprep.subr.mxu0 %v4638_v23 }
0x1e6f   :  { %2223 = vmatpush1.msra.mxu0 %v4641_v44 }
0x1e70   :  { %2224 = vmatprep.subr.mxu0 %v4644_v10 }
0x1e71   :  { %2225 = vmatpush1.msra.mxu0 %v4647_v56 }
0x1e72   :  { %2259 = vmatmul.mubr.f32.vlgmr.msra.gmra.mxu0 %v4039_v0  ;;  %2475 = vmatprep.subr.mxu0 %v4599_v5 }
0x1e73   :  { %2476 = vmatpush1.msra.mxu0 %v4605_v39  ;;  %2523 = vmatprep.mubr.f32.mxu0 %v4039_v0 }
0x1e74   :  { %2477 = vmatprep.subr.mxu0 %v4607_v40 }
0x1e75   :  { %2478 = vmatpush1.msra.mxu0 %v4611_v30 }
0x1e76   :  { %2479 = vmatprep.subr.mxu0 %v4614_v43 }
0x1e77   :  { %2480 = vmatpush1.msra.mxu0 %v4617_v51 }
0x1e78   :  { %2481 = vmatprep.subr.mxu0 %v4620_v46 }
0x1e79   :  { %2482 = vmatpush1.msra.mxu0 %v4623_v17 }
0x1e7a   :  { %2483 = vmatprep.subr.mxu0 %v4626_v45 }
0x1e7b   :  { %2484 = vmatpush1.msra.mxu0 %v4629_v53 }
0x1e7c   :  { %2485 = vmatprep.subr.mxu0 %v4632_v57 }
0x1e7d   :  { %2486 = vmatpush1.msra.mxu0 %v4635_v47 }
0x1e7e   :  { %2487 = vmatprep.subr.mxu0 %v4638_v23 }
0x1e7f   :  { %2488 = vmatpush1.msra.mxu0 %v4641_v44 }
0x1e80   :  { %2489 = vmatprep.subr.mxu0 %v4644_v10 }
0x1e81   :  { %2490 = vmatpush1.msra.mxu0 %v4647_v56 }
0x1e82   :  { %2719 = vmatprep.subr.mxu0 %v4599_v5 }
0x1eaf   :  { %v2119_v62 = vpop.f32.mrf.mxu1 }
0x1eb1   :  { %v2121_v6 = vpop.f32.mrf.mxu1 }
0x1f22   :  { %v2045_v1 = vpop.f32.mrf.mxu0 }
0x1f23   :  { %v2120_v61 = vadd.f32 %v2119_v62, %v2045_v1 }
0x1f24   :  { %v2047_v4 = vpop.f32.mrf.mxu0 }
0x1f25   :  { %v2122_v7 = vadd.f32 %v2121_v6, %v2047_v4  ;;  %v2137_v9 = vadd.f32 %v2130_v2, %v2120_v61 }
0x1f27   :  { %v2138_v11 = vadd.f32 %v2134_v3, %v2122_v7 }
0x1f29   :  { %v2157_v12 = vcombine.low %v2137_v9, %v2138_v11  ;;  %v2173_v13 = vcombine.high %v2137_v9, %v2138_v11 }
0x1f2b   :  { %v2164_v22 = vrot.slane %v2157_v12, %v4697_v8  ;;  %v2180_v58 = vrot.slane %v2173_v13, %v4697_v8 }
0x1f2d   :  { %v2171_v15 = vrot.slane %v2164_v22, %v4697_v8  ;;  %v2181_v16 = vcombine.high %v2180_v58, %v2180_v58  ;;  %v2312_v19 = vcombine.high %v2164_v22, %v2164_v22  ;;  %v2327_v20 = vrot.slane %v2180_v58, %v4697_v8 }
0x1f2f   :  { %v2188_v21 = vrot.slane %v2181_v16, %v4697_v8  ;;  %v2319_v25 = vrot.slane %v2312_v19, %v4697_v8  ;;  %v2451_v29 = vcombine.high %v2171_v15, %v2171_v15 }
0x1f31   :  { %v2329_v27 = vsel %vm1958_vm3, %v2319_v25, %v2327_v20  ;;  %v2453_v31 = vcombine.high %v2319_v25, %v2319_v25  ;;  %v4707_v32 = vsel %vm1958_vm3, %v2327_v20, %v2319_v25  ;;  %v4710_v34 = vsel %vm1958_vm3, %v2188_v21, %v2171_v15 }
0x1f32   :  { %v2260_v33 = vpop.f32.mrf.mxu0  ;;  %v2190_v54 = vsel %vm1958_vm3, %v2171_v15, %v2188_v21 }
0x1f33   :  { %v4713_v35 = vsel %vm1958_vm3, %v2451_v29, %v2453_v31  ;;  %v4716_v36 = vsel %vm1958_vm3, %v2453_v31, %v2451_v29  ;;  %vm3097_vm3 = vcmp.ge.s32.totalorder %v4166_v52, 8 }
0x1f34   :  { %v2262_v18 = vpop.f32.mrf.mxu0 }
0x1f35   :  { %v2267_v38 = vcombine.low %v2260_v33, %v2262_v18 }
0x1f37   :  { %v2274_v49 = vrot.slane %v2267_v38, %v4697_v8 }
0x1f39   :  { %v2281_v55 = vrot.slane %v2274_v49, %v4697_v8 }
0x1f3b   :  { %v2283_v59 = vadd.f32 %v2281_v55, %v2190_v54 }
0x1f3d   :  { %2291 = vrot.lane.b32.xlu1 %v2283_v59, %s4048_s7  ;;  %v3582_v26 = vmul.f32 -1.442695, %v2283_v59 }
0x1f3f   :  { %3958 = vpow2.f32 %v3582_v26 }
0x1f4c   :  { %v3959_v48 = vpop.eup %3958 }
0x1f4d   :  { %v2287_v50 = vadd.f32 1.0, %v3959_v48 }
0x1f4f   :  { %3960 = vrcp.f32 %v2287_v50 }
0x1f5c   :  { %v3961_v1 = vpop.eup %3960 }
0x1f5d   :  { %v2296_v2 = vmul.f32 0.0, %v3961_v1  ;;  %v2305_v7 = vrot.slane %v3961_v1, 1 }
0x1faf   :  { %v2292_v62 = vpop.permute.xlu1 %2291 }
0x1fb0   :  { %v2293_v63 = vrot.slane %v2292_v62, 1 }
0x1fb2   :  { %3962 = vtanh.f32 %v2293_v63 }
0x1fbf   :  { %v3963_v28 = vpop.eup %3962 }
0x1fc0   :  { %v2297_v61 = vmul.f32 %v3963_v28, %v3961_v1 }
0x1fc2   :  { %2299 = vrot.lane.b32.xlu0 %v2297_v61, %s4048_s7 }
0x2034   :  { %v2300_v3 = vpop.permute.xlu0 %2299 }
0x2035   :  { %v2302_v6 = vadd.f32 %v2300_v3, %v2296_v2 }
0x2037   :  { %3964 = vtanh.f32 %v2302_v6 }
0x2044   :  { %v3965_v4 = vpop.eup %3964 }
0x2045   :  { %2308 = vrot.lane.b32.xlu1 %v3965_v4, %s4048_s7 }
0x20b7   :  { %v2309_v9 = vpop.permute.xlu1 %2308 }
0x20b8   :  { %v4724_v11 = vmul.f32 %v2309_v9, %v2305_v7 }
0x20ba   :  { %3583 = vmatmul.mubr.msk.f32.vlgmr.msra.gmra.mxu1 %vm2191_vm2, %v4724_v11 }
0x20bb   :  { %2598 = vmatpush1.msra.mxu1 %v4605_v39  ;;  %2645 = vmatprep.mubr.f32.mxu1 %v4039_v0 }
0x20bc   :  { %2599 = vmatprep.subr.mxu1 %v4607_v40 }
0x20bd   :  { %2600 = vmatpush1.msra.mxu1 %v4611_v30 }
0x20be   :  { %2601 = vmatprep.subr.mxu1 %v4614_v43 }
0x20bf   :  { %2602 = vmatpush1.msra.mxu1 %v4617_v51 }
0x20c0   :  { %2603 = vmatprep.subr.mxu1 %v4620_v46 }
0x20c1   :  { %2604 = vmatpush1.msra.mxu1 %v4623_v17 }
0x20c2   :  { %2605 = vmatprep.subr.mxu1 %v4626_v45 }
0x20c3   :  { %2606 = vmatpush1.msra.mxu1 %v4629_v53 }
0x20c4   :  { %2607 = vmatprep.subr.mxu1 %v4632_v57 }
0x20c5   :  { %2608 = vmatpush1.msra.mxu1 %v4635_v47 }
0x20c6   :  { %2609 = vmatprep.subr.mxu1 %v4638_v23 }
0x20c7   :  { %2610 = vmatpush1.msra.mxu1 %v4641_v44 }
0x20c8   :  { %2611 = vmatprep.subr.mxu1 %v4644_v10 }
0x20c9   :  { %2612 = vmatpush1.msra.mxu1 %v4647_v56 }
0x20ca   :  { %2841 = vmatprep.subr.mxu1 %v4599_v5 }
0x217a   :  { %v2399_v12 = vpop.f32.mrf.mxu1 }
0x217c   :  { %v2401_v13 = vpop.f32.mrf.mxu1 }
0x217d   :  { %v2406_v22 = vcombine.low %v2399_v12, %v2401_v13 }
0x217f   :  { %v2413_v58 = vrot.slane %v2406_v22, %v4697_v8 }
0x2181   :  { %v2420_v24 = vrot.slane %v2413_v58, %v4697_v8 }
0x2183   :  { %v2422_v15 = vadd.f32 %v2420_v24, %v2329_v27 }
0x2185   :  { %2430 = vrot.lane.b32.xlu0 %v2422_v15, %s4048_s7  ;;  %v3584_v16 = vmul.f32 -1.442695, %v2422_v15 }
0x2187   :  { %3966 = vpow2.f32 %v3584_v16 }
0x2194   :  { %v3967_v19 = vpop.eup %3966 }
0x2195   :  { %v2426_v20 = vadd.f32 1.0, %v3967_v19 }
0x2197   :  { %3968 = vrcp.f32 %v2426_v20 }
0x21a4   :  { %v3969_v29 = vpop.eup %3968 }
0x21a5   :  { %v2435_v33 = vmul.f32 %v3969_v29, %v2302_v6  ;;  %v2444_v49 = vrot.slane %v3969_v29, 1 }
0x21f7   :  { %v2431_v21 = vpop.permute.xlu0 %2430 }
0x21f8   :  { %v2432_v25 = vrot.slane %v2431_v21, 1 }
0x21fa   :  { %3970 = vtanh.f32 %v2432_v25 }
0x2207   :  { %v3971_v5 = vpop.eup %3970 }
0x2208   :  { %v2436_v31 = vmul.f32 %v3971_v5, %v3969_v29 }
0x220a   :  { %2438 = vrot.lane.b32.xlu1 %v2436_v31, %s4048_s7 }
0x227c   :  { %v2439_v18 = vpop.permute.xlu1 %2438 }
0x227d   :  { %v2441_v38 = vadd.f32 %v2439_v18, %v2435_v33 }
0x227f   :  { %3972 = vtanh.f32 %v2441_v38 }
0x228c   :  { %v3973_v27 = vpop.eup %3972 }
0x228d   :  { %2447 = vrot.lane.b32.xlu0 %v3973_v27, %s4048_s7 }
0x22ff   :  { %v2448_v55 = vpop.permute.xlu0 %2447 }
0x2300   :  { %v2450_v54 = vmul.f32 %v2448_v55, %v2444_v49 }
0x2302   :  { %3585 = vmatmul.mubr.msk.f32.vlgmr.msra.gmra.mxu0 %vm2191_vm2, %v2450_v54  ;;  %v4775_v58 = vrot.slane %v2450_v54, %v4690_v14 }
0x2303   :  { %2720 = vmatpush1.msra.mxu0 %v4605_v39  ;;  %2767 = vmatprep.mubr.f32.mxu0 %v4039_v0 }
0x2304   :  { %2721 = vmatprep.subr.mxu0 %v4607_v40  ;;  %v2970_v19 = vsel %vm2969_vm13, %v4724_v11, %v4775_v58 }
0x2305   :  { %2722 = vmatpush1.msra.mxu0 %v4611_v30 }
0x2306   :  { %2723 = vmatprep.subr.mxu0 %v4614_v43 }
0x2307   :  { %2724 = vmatpush1.msra.mxu0 %v4617_v51 }
0x2308   :  { %2725 = vmatprep.subr.mxu0 %v4620_v46 }
0x2309   :  { %2726 = vmatpush1.msra.mxu0 %v4623_v17 }
0x230a   :  { %2727 = vmatprep.subr.mxu0 %v4626_v45 }
0x230b   :  { %2728 = vmatpush1.msra.mxu0 %v4629_v53 }
0x230c   :  { %2729 = vmatprep.subr.mxu0 %v4632_v57 }
0x230d   :  { %2730 = vmatpush1.msra.mxu0 %v4635_v47 }
0x230e   :  { %2731 = vmatprep.subr.mxu0 %v4638_v23 }
0x230f   :  { %2732 = vmatpush1.msra.mxu0 %v4641_v44 }
0x2310   :  { %2733 = vmatprep.subr.mxu0 %v4644_v10 }
0x2311   :  { %2734 = vmatpush1.msra.mxu0 %v4647_v56 }
0x2312   :  { %3825 = vmatprep.subr.mxu0 %v4039_v0 }
0x23c2   :  { %v2525_v59 = vpop.f32.mrf.mxu0 }
0x23c4   :  { %v2527_v26 = vpop.f32.mrf.mxu0 }
0x23c5   :  { %v2532_v48 = vcombine.low %v2525_v59, %v2527_v26 }
0x23c7   :  { %v2539_v50 = vrot.slane %v2532_v48, %v4697_v8 }
0x23c9   :  { %v2546_v62 = vrot.slane %v2539_v50, %v4697_v8 }
0x23cb   :  { %v2548_v63 = vadd.f32 %v2546_v62, %v4713_v35 }
0x23cd   :  { %2556 = vrot.lane.b32.xlu1 %v2548_v63, %s4048_s7  ;;  %v3586_v1 = vmul.f32 -1.442695, %v2548_v63 }
0x23cf   :  { %3974 = vpow2.f32 %v3586_v1 }
0x23dc   :  { %v3975_v28 = vpop.eup %3974 }
0x23dd   :  { %v2552_v61 = vadd.f32 1.0, %v3975_v28 }
0x23df   :  { %3976 = vrcp.f32 %v2552_v61 }
0x23ec   :  { %v3977_v6 = vpop.eup %3976 }
0x23ed   :  { %v2561_v9 = vmul.f32 %v3977_v6, %v2441_v38  ;;  %v2570_v22 = vrot.slane %v3977_v6, 1 }
0x243f   :  { %v2557_v2 = vpop.permute.xlu1 %2556 }
0x2440   :  { %v2558_v3 = vrot.slane %v2557_v2, 1 }
0x2442   :  { %3978 = vtanh.f32 %v2558_v3 }
0x244f   :  { %v3979_v4 = vpop.eup %3978 }
0x2450   :  { %v2562_v7 = vmul.f32 %v3979_v4, %v3977_v6 }
0x2452   :  { %2564 = vrot.lane.b32.xlu0 %v2562_v7, %s4048_s7 }
0x24c4   :  { %v2565_v12 = vpop.permute.xlu0 %2564 }
0x24c5   :  { %v2567_v13 = vadd.f32 %v2565_v12, %v2561_v9 }
0x24c7   :  { %3980 = vtanh.f32 %v2567_v13 }
0x24d4   :  { %v3981_v35 = vpop.eup %3980 }
0x24d5   :  { %2573 = vrot.lane.b32.xlu1 %v3981_v35, %s4048_s7 }
0x2547   :  { %v2574_v24 = vpop.permute.xlu1 %2573 }
0x2548   :  { %v2576_v15 = vmul.f32 %v2574_v24, %v2570_v22 }
0x254a   :  { %v4778_v16 = vrot.slane %v2576_v15, %v4690_v14  ;;  %3587 = vmatmul.mubr.msk.f32.vlgmr.msra.gmra.mxu1 %vm2191_vm2, %v2576_v15 }
0x254b   :  { %2842 = vmatpush1.msra.mxu1 %v4605_v39  ;;  %2889 = vmatprep.mubr.f32.mxu1 %v4039_v0 }
0x254c   :  { %v2972_v20 = vsel %vm2971_vm6, %v2970_v19, %v4778_v16  ;;  %2843 = vmatprep.subr.mxu1 %v4607_v40 }
0x254d   :  { %2844 = vmatpush1.msra.mxu1 %v4611_v30 }
0x254e   :  { %2845 = vmatprep.subr.mxu1 %v4614_v43 }
0x254f   :  { %2846 = vmatpush1.msra.mxu1 %v4617_v51 }
0x2550   :  { %2847 = vmatprep.subr.mxu1 %v4620_v46 }
0x2551   :  { %2848 = vmatpush1.msra.mxu1 %v4623_v17 }
0x2552   :  { %2849 = vmatprep.subr.mxu1 %v4626_v45 }
0x2553   :  { %2850 = vmatpush1.msra.mxu1 %v4629_v53 }
0x2554   :  { %2851 = vmatprep.subr.mxu1 %v4632_v57 }
0x2555   :  { %2852 = vmatpush1.msra.mxu1 %v4635_v47 }
0x2556   :  { %2853 = vmatprep.subr.mxu1 %v4638_v23 }
0x2557   :  { %2854 = vmatpush1.msra.mxu1 %v4641_v44 }
0x2558   :  { %2855 = vmatprep.subr.mxu1 %v4644_v10 }
0x2559   :  { %2856 = vmatpush1.msra.mxu1 %v4647_v56 }
0x260a   :  { %v2647_v39 = vpop.f32.mrf.mxu1 }
0x260c   :  { %v2649_v40 = vpop.f32.mrf.mxu1 }
0x260d   :  { %v2654_v30 = vcombine.low %v2647_v39, %v2649_v40 }
0x260f   :  { %v2661_v43 = vrot.slane %v2654_v30, %v4697_v8 }
0x2611   :  { %v2668_v51 = vrot.slane %v2661_v43, %v4697_v8 }
0x2613   :  { %v2670_v46 = vadd.f32 %v2668_v51, %v4716_v36 }
0x2615   :  { %2678 = vrot.lane.b32.xlu0 %v2670_v46, %s4048_s7  ;;  %v3588_v17 = vmul.f32 -1.442695, %v2670_v46 }
0x2617   :  { %3982 = vpow2.f32 %v3588_v17 }
0x2624   :  { %v3983_v45 = vpop.eup %3982 }
0x2625   :  { %v2674_v53 = vadd.f32 1.0, %v3983_v45 }
0x2627   :  { %3984 = vrcp.f32 %v2674_v53 }
0x2634   :  { %v3985_v23 = vpop.eup %3984 }
0x2635   :  { %v2683_v56 = vmul.f32 %v3985_v23, %v2567_v13  ;;  %v2692_v29 = vrot.slane %v3985_v23, 1 }
0x2687   :  { %v2679_v57 = vpop.permute.xlu0 %2678 }
0x2688   :  { %v2680_v47 = vrot.slane %v2679_v57, 1 }
0x268a   :  { %3986 = vtanh.f32 %v2680_v47 }
0x2697   :  { %v3987_v44 = vpop.eup %3986 }
0x2698   :  { %v2684_v10 = vmul.f32 %v3987_v44, %v3985_v23 }
0x269a   :  { %2686 = vrot.lane.b32.xlu1 %v2684_v10, %s4048_s7 }
0x270c   :  { %v2687_v21 = vpop.permute.xlu1 %2686 }
0x270d   :  { %v2689_v25 = vadd.f32 %v2687_v21, %v2683_v56 }
0x270f   :  { %3988 = vtanh.f32 %v2689_v25 }
0x271c   :  { %v3989_v36 = vpop.eup %3988 }
0x271d   :  { %2695 = vrot.lane.b32.xlu0 %v3989_v36, %s4048_s7 }
0x278f   :  { %v2696_v5 = vpop.permute.xlu0 %2695 }
0x2790   :  { %v2698_v31 = vmul.f32 %v2696_v5, %v2692_v29 }
0x2792   :  { %v4809_v33 = vrot.slane %v2698_v31, %v4690_v14  ;;  %3589 = vmatmul.mubr.msk.f32.vlgmr.msra.gmra.mxu0 %vm2191_vm2, %v2698_v31 }
0x2793   :  { %3827 = vmatprep.mubr.msk.f32.mxu0 %vm4991_vm0, %v4039_v0  ;;  %vm2975_vm0 = vcmask 1043456  }
0x2794   :  { %v2974_v18 = vsel %vm2973_vm7, %v2972_v20, %v4809_v33 }
0x2852   :  { %v2769_v38 = vpop.f32.mrf.mxu0 }
0x2854   :  { %v2771_v27 = vpop.f32.mrf.mxu0 }
0x2855   :  { %v2776_v49 = vcombine.low %v2769_v38, %v2771_v27 }
0x2857   :  { %v2783_v55 = vrot.slane %v2776_v49, %v4697_v8 }
0x2859   :  { %v2790_v54 = vrot.slane %v2783_v55, %v4697_v8 }
0x285b   :  { %v2792_v59 = vadd.f32 %v2790_v54, %v4707_v32 }
0x285d   :  { %2800 = vrot.lane.b32.xlu1 %v2792_v59, %s4048_s7  ;;  %v3590_v26 = vmul.f32 -1.442695, %v2792_v59 }
0x285f   :  { %3990 = vpow2.f32 %v3590_v26 }
0x286c   :  { %v3991_v48 = vpop.eup %3990 }
0x286d   :  { %v2796_v50 = vadd.f32 1.0, %v3991_v48 }
0x286f   :  { %3992 = vrcp.f32 %v2796_v50 }
0x287c   :  { %v3993_v1 = vpop.eup %3992 }
0x287d   :  { %v2805_v2 = vmul.f32 %v3993_v1, %v2689_v25  ;;  %v2814_v4 = vrot.slane %v3993_v1, 1  ;;  %v2984_v25 = vrot.slane %v4724_v11, %v4690_v14  ;;  %v3145_v11 = vld [vmem:[#allocation2 + $0x230] sm:$0xff] }
0x287e   :  { %3830 = vmatprep.subr.mxu1 %v3145_v11 }
0x28cf   :  { %v2801_v62 = vpop.permute.xlu1 %2800 }
0x28d0   :  { %v2802_v63 = vrot.slane %v2801_v62, 1 }
0x28d2   :  { %3994 = vtanh.f32 %v2802_v63 }
0x28df   :  { %v3995_v28 = vpop.eup %3994 }
0x28e0   :  { %v2806_v61 = vmul.f32 %v3995_v28, %v3993_v1 }
0x28e2   :  { %2808 = vrot.lane.b32.xlu0 %v2806_v61, %s4048_s7 }
0x2954   :  { %v2809_v3 = vpop.permute.xlu0 %2808 }
0x2955   :  { %v2811_v6 = vadd.f32 %v2809_v3, %v2805_v2 }
0x2957   :  { %3996 = vtanh.f32 %v2811_v6 }
0x2964   :  { %v3997_v32 = vpop.eup %3996 }
0x2965   :  { %2817 = vrot.lane.b32.xlu1 %v3997_v32, %s4048_s7  ;;  %v3102_v32 = vsel %vm3097_vm3, 8, %v4042_v42 }
0x29d7   :  { %v2818_v7 = vpop.permute.xlu1 %2817 }
0x29d8   :  { %v2820_v9 = vmul.f32 %v2818_v7, %v2814_v4  ;;  %v3103_v4 = vsub.s32 %v4166_v52, %v3102_v32 }
0x29da   :  { %v2961_v12 = vrot.slane %v2820_v9, %v4690_v14  ;;  %3591 = vmatmul.mubr.msk.f32.vlgmr.msra.gmra.mxu1 %vm2191_vm2, %v2820_v9  ;;  %v3108_v9 = vsel %vm3097_vm3, 6, %v4042_v42 }
0x29db   :  { %3831 = vmatpush3.msra.mxu1 %v3145_v11 }
0x29dc   :  { %v2976_v13 = vsel %vm2975_vm0, %v2974_v18, %v2961_v12 }
0x2a9a   :  { %v2891_v35 = vpop.f32.mrf.mxu1 }
0x2a9c   :  { %v2893_v22 = vpop.f32.mrf.mxu1 }
0x2a9d   :  { %v2898_v24 = vcombine.low %v2891_v35, %v2893_v22 }
0x2a9f   :  { %v2905_v15 = vrot.slane %v2898_v24, %v4697_v8 }
0x2aa1   :  { %v2912_v19 = vrot.slane %v2905_v15, %v4697_v8 }
0x2aa3   :  { %v2914_v20 = vadd.f32 %v2912_v19, %v4710_v34 }
0x2aa5   :  { %2922 = vrot.lane.b32.xlu0 %v2914_v20, %s4048_s7  ;;  %v3592_v39 = vmul.f32 -1.442695, %v2914_v20 }
0x2aa7   :  { %3998 = vpow2.f32 %v3592_v39 }
0x2ab4   :  { %v3999_v40 = vpop.eup %3998 }
0x2ab5   :  { %v2918_v30 = vadd.f32 1.0, %v3999_v40 }
0x2ab7   :  { %4000 = vrcp.f32 %v2918_v30 }
0x2ac4   :  { %v4001_v46 = vpop.eup %4000 }
0x2ac5   :  { %v2927_v53 = vmul.f32 %v4001_v46, %v2811_v6  ;;  %v2936_v47 = vrot.slane %v4001_v46, 1  ;;  %v3094_v6 = vadd.s32 8, %v4483_v41 }
0x2ac7   :  { %v3594_v7 = vadd.s32 4294967288, %v3094_v6 }
0x2b17   :  { %v2923_v43 = vpop.permute.xlu0 %2922 }
0x2b18   :  { %v2924_v51 = vrot.slane %v2923_v43, 1 }
0x2b1a   :  { %4002 = vtanh.f32 %v2924_v51 }
0x2b27   :  { %v4003_v17 = vpop.eup %4002 }
0x2b28   :  { %v2928_v45 = vmul.f32 %v4003_v17, %v4001_v46 }
0x2b2a   :  { %2930 = vrot.lane.b32.xlu1 %v2928_v45, %s4048_s7 }
0x2b9c   :  { %v2931_v57 = vpop.permute.xlu1 %2930 }
0x2b9d   :  { %v2933_v8 = vadd.f32 %v2931_v57, %v2927_v53  ;;  %v3415_v53 = vld [vmem:[#allocation2 + $0x288] sm:$0xff]  ;;  %v3414_v57 = vld [vmem:[#allocation2 + $0x280] sm:$0xff] }
0x2b9f   :  { %4004 = vtanh.f32 %v2933_v8  ;;  %v3413_v8 = vld [vmem:[#allocation2 + $0x278] sm:$0xff] }
0x2bac   :  { %v4005_v34 = vpop.eup %4004 }
0x2bad   :  { %2939 = vrot.lane.b32.xlu0 %v4005_v34, %s4048_s7  ;;  %v3412_v34 = vld [vmem:[#allocation2 + $0x270] sm:$0xff] }
0x2c1f   :  { %v2940_v23 = vpop.permute.xlu0 %2939 }
0x2c20   :  { %v2942_v44 = vmul.f32 %v2940_v23, %v2936_v47  ;;  %v3411_v47 = vld [vmem:[#allocation2 + $0x268] sm:$0xff]  ;;  %v3410_v23 = vld [vmem:[#allocation2 + $0x260] sm:$0xff] }
0x2c22   :  { %v2967_v10 = vrot.slane %v2942_v44, %v4690_v14  ;;  %v2986_v56 = vsel %vm2969_vm13, %v2942_v44, %v2961_v12  ;;  %v3109_v12 = vadd.s32 %v3108_v9, %v3103_v4  ;;  %v3409_v44 = vld [vmem:[#allocation2 + $0x258] sm:$0xff] }
0x2c23   :  { %v2987_v21 = vsel %vm2971_vm6, %v2986_v56, %v4809_v33  ;;  %v3143_v33 = vld [vmem:[#allocation2 + $0x210] sm:$0xff] }
0x2c24   :  { %v2978_v36 = vsel %vm2977_vm9, %v2976_v13, %v2967_v10  ;;  %v2988_v29 = vsel %vm2973_vm7, %v2987_v21, %v4778_v16  ;;  %v3144_v16 = vld [vmem:[#allocation2 + $0x220] sm:$0xff]  ;;  %v3107_v13 = vadd.s32 6, %v3594_v7  ;;  %v3110_v35 = vsub.s32 %v4483_v41, %v3109_v12  ;;  %v3408_v10 = vld [vmem:[#allocation2 + $0x250] sm:$0xff] }
0x2c25   :  { %v2980_v5 = vsel %vm2979_vm12, %v2978_v36, 0.0  ;;  %v2989_v31 = vsel %vm2975_vm0, %v2988_v29, %v4775_v58  ;;  %3832 = vmatprep.subr.mxu1 %v3144_v16  ;;  %v3142_v58 = vld [vmem:[#allocation2 + $0x200] sm:$0xff]  ;;  %vm3120_vm7 = vcmp.lt.s32.totalorder %v3103_v4, 6  ;;  %vm3123_vm0 = vcmp.ge.s32.totalorder %v4483_v41, 6 }
0x2c26   :  { %3079 = vrot.lane.b32.xlu1 %v2980_v5, %s4044_s30  ;;  %v2990_v18 = vsel %vm2977_vm9, %v2989_v31, %v2984_v25  ;;  %3833 = vmatpush3.msra.mxu1 %v3144_v16  ;;  %vm3112_vm2 = vcmp.le.s32.totalorder %v3110_v35, 10  ;;  %vm3114_vm13 = vcmp.ge.s32.totalorder %v3110_v35, 4294967286  ;;  %v3111_v22 = vsub.s32 %v3107_v13, %v3109_v12 }
0x2c27   :  { %v2991_v38 = vsel %vm2979_vm12, %v2990_v18, 0.0  ;;  %3834 = vmatprep.subr.mxu1 %v3143_v33  ;;  %vm4860_vm6 = vmand %vm3112_vm2, %vm3114_vm13  ;;  %vm3125_vm9 = vcmp.lt.s32.totalorder %v3109_v12, 6  ;;  %vm3119_vm12 = vcmp.lt.s32.totalorder %v3594_v7, 6  ;;  %vm5006_vm13 = vcmask 130048  }
0x2c28   :  { %3082 = vrot.lane.b32.xlu0 %v2991_v38, %s4049_s8  ;;  %v2992_v27 = vsel %vm4958_vm11, %v2980_v5, %v2991_v38  ;;  %3835 = vmatpush3.msra.mxu1 %v3143_v33 }
0x2c29   :  { %3826 = vmatpush3.msra.mxu0 %v2992_v27  ;;  %3836 = vmatprep.subr.mxu1 %v3142_v58  ;;  %v3405_v27 = vld [vmem:[#allocation2 + $0x240] ss:$0 sm:$0xff] }
0x2c2a   :  { %3064 = vrot.lane.b32.xlu1 %v2991_v38, %s4050_s9  ;;  %3828 = vmatmul.mubr.msk.f32.vlgmr.msra.gmra.mxu0 %vm4998_vm10, %v4555_v37  ;;  %vm3121_vm10 = vmand %vm1482_vm1, %vm3120_vm7 }
0x2c2b   :  { %3837 = vmatpush3.msra.mxu1 %v3142_v58  ;;  %v3417_v58 = vld [vmem:[#allocation2 + $0x290] ss:$8 sm:$0x3] }
0x2c2c   :  { %3459 = vmatprep.subr.mxu1 %v3415_v53 }
0x2c98   :  { %v3080_v37 = vpop.permute.xlu1 %3079 }
0x2c9a   :  { %v3083_v54 = vpop.permute.xlu0 %3082 }
0x2c9b   :  { %v3091_v1 = vsel %vm5001_vm4, %v3080_v37, %v3083_v54  ;;  %vm3115_vm4 = vcmp.ge.s32.totalorder %v3111_v22, 4294967286 }
0x2c9c   :  { %v3065_v59 = vpop.permute.xlu1 %3064 }
0x2c9d   :  { %v3074_v26 = vsel %vm4999_vm14, %v2980_v5, %v3065_v59  ;;  %vm3126_vm14 = vmand %vm3123_vm0, %vm3125_vm9 }
0x2cea   :  { %v3059_v49 = vpop.f32.mrf.mxu0 }
0x2ceb   :  { %3071 = vrot.lane.b32.xlu1 %v3059_v49, %s4044_s30  ;;  %3068 = vrot.lane.b32.xlu0 %v3059_v49, %s4051_s10 }
0x2cec   :  { %v3829_v55 = vpop.f32.mrf.mxu0 }
0x2cef   :  { %3088 = vrot.lane.b32.xlu1 %v3059_v49, %s4043_s1  ;;  %3085 = vrot.lane.b32.xlu0 %v3059_v49, %s4052_s11  ;;  %v3422_v49 = vrot.slane %v3417_v58, %v4690_v14 }
0x2d5d   :  { %v3072_v48 = vpop.permute.xlu1 %3071  ;;  %v3069_v50 = vpop.permute.xlu0 %3068 }
0x2d5e   :  { %v3075_v62 = vsel %vm5000_vm15, %v3074_v26, %v3069_v50  ;;  %vm3113_vm15 = vcmp.le.s32.totalorder %v3111_v22, 10  ;;  %v3426_v26 = vrot.slane %v3417_v58, %v2133_v60 }
0x2d5f   :  { %v3077_v63 = vsel %vm3076_vm5, %v3075_v62, %v3072_v48  ;;  %vm3117_vm2 = vmand %vm3113_vm15, %vm3115_vm4 }
0x2d60   :  { %3838 = vmatprep.mubr.msk.f32.mxu1 %vm4958_vm11, %v3077_v63 }
0x2d61   :  { %v3089_v28 = vpop.permute.xlu1 %3088  ;;  %v3086_v61 = vpop.permute.xlu0 %3085 }
0x2d62   :  { %v3092_v2 = vsel %vm4997_vm8, %v3091_v1, %v3086_v61  ;;  %vm3128_vm8 = vmand %vm4860_vm6, %vm3126_vm14 }
0x2d63   :  { %v3093_v3 = vsel %vm3076_vm5, %v3092_v2, %v3089_v28  ;;  %vm4867_vm5 = vmand %vm3119_vm12, %vm3120_vm7  ;;  %vm5009_vm7 = vmmov 1  }
0x2d64   :  { %3839 = vmatmul.mubr.msk.f32.vlgmr.msra.gmra.mxu1 %vm4958_vm11, %v3093_v3  ;;  %vm3130_vm3 = vmand %vm3128_vm8, %vm3121_vm10 }
0x2d65   :  { %3499 = vmatprep.mubr.f32.mxu1 %v4039_v0  ;;  %v3132_v15 = vsel %vm3130_vm3, 1.0, %v4039_v0  ;;  %vm4877_vm11 = vmand %vm3117_vm2, %vm3125_vm9  ;;  %3460 = vmatpush1.msra.mxu1 %v3414_v57 }
0x2d66   :  { %3845 = vmatprep.mubr.msk.f32.mxu0 %vm5006_vm13, %v3132_v15  ;;  %vm3131_vm1 = vmand %vm4877_vm11, %vm4867_vm5  ;;  %3461 = vmatprep.subr.mxu1 %v3413_v8 }
0x2d67   :  { %vm3134_vm0 = vmxor %vm3126_vm14, %vm5009_vm7  ;;  %v3133_v46 = vsel %vm3131_vm1, 1.0, %v4039_v0  ;;  %3462 = vmatpush1.msra.mxu1 %v3412_v34  ;;  %vm3510_vm14 = vcmp.lt.s32.totalorder %v4166_v52, 4 }
0x2d68   :  { %vm3136_vm12 = vmand %vm4860_vm6, %vm3134_vm0  ;;  %3463 = vmatprep.subr.mxu1 %v3411_v47 }
0x2d69   :  { %vm4888_vm8 = vmand %vm3136_vm12, %vm3121_vm10  ;;  %3464 = vmatpush1.msra.mxu1 %v3410_v23  ;;  %vm5017_vm10 = vcmask 261120  }
0x2d6a   :  { %vm3135_vm15 = vmxor %vm3125_vm9, %vm5009_vm7  ;;  %v3140_v17 = vsel %vm4888_vm8, 1.0, %v4039_v0  ;;  %3465 = vmatprep.subr.mxu1 %v3409_v44 }
0x2d6b   :  { %vm3137_vm4 = vmand %vm3117_vm2, %vm3135_vm15  ;;  %3466 = vmatpush1.msra.mxu1 %v3408_v10 }
0x2d6c   :  { %vm4897_vm3 = vmand %vm3137_vm4, %vm4867_vm5 }
0x2d6d   :  { %vm5014_vm6 = vmmov %vm5006_vm13  ;;  %v3141_v45 = vsel %vm4897_vm3, 1.0, %v4039_v0 }
0x2d6e   :  { %vm5015_vm9 = vmmov %vm5014_vm6 }
0x2d6f   :  { %vm5016_vm11 = vmmov %vm5014_vm6 }
0x2d70   :  { %vm5018_vm5 = vmmov %vm5017_vm10 }
0x2e24   :  { %v3840_v39 = vpop.f32.mrf.mxu1 }
0x2e25   :  { %3231 = vrot.lane.b32.xlu0 %v3840_v39, %s4043_s1 }
0x2e26   :  { %v3218_v40 = vpop.f32.mrf.mxu1 }
0x2e27   :  { %3229 = vrot.lane.b32.xlu1 %v3218_v40, %s4043_s1 }
0x2e29   :  { %3397 = vrot.lane.b32.xlu0 %v3218_v40, %s4048_s7 }
0x2e2b   :  { %3399 = vrot.lane.b32.xlu1 %v3840_v39, %s4048_s7 }
0x2e97   :  { %v3232_v43 = vpop.permute.xlu0 %3231 }
0x2e98   :  { %3841 = vmatprep.subr.mxu0 %v3232_v43 }
0x2e99   :  { %3842 = vmatpush3.msra.mxu0 %v3232_v43  ;;  %v3230_v51 = vpop.permute.xlu1 %3229 }
0x2e9a   :  { %3843 = vmatprep.subr.mxu0 %v3230_v51 }
0x2e9b   :  { %3844 = vmatpush3.msra.mxu0 %v3230_v51  ;;  %v3398_v31 = vpop.permute.xlu0 %3397 }
0x2e9c   :  { %3846 = vmatmul.mubr.msk.f32.vlgmr.msra.gmra.mxu0 %vm5014_vm6, %v3133_v46  ;;  %3848 = vmatprep.subr.mxu0 %v3840_v39 }
0x2e9d   :  { %3849 = vmatpush3.msra.mxu0 %v3840_v39  ;;  %3852 = vmatprep.mubr.msk.f32.mxu0 %vm5015_vm9, %v3140_v17  ;;  %v3400_v38 = vpop.permute.xlu1 %3399 }
0x2e9e   :  { %3850 = vmatprep.subr.mxu0 %v3218_v40 }
0x2e9f   :  { %3851 = vmatpush3.msra.mxu0 %v3218_v40 }
0x2ea0   :  { %3853 = vmatmul.mubr.msk.f32.vlgmr.msra.gmra.mxu0 %vm5016_vm11, %v3141_v45 }
0x2f5c   :  { %v3847_v56 = vpop.f32.mrf.mxu0 }
0x2f5e   :  { %v3307_v21 = vpop.f32.mrf.mxu0 }
0x2f60   :  { %v3854_v25 = vpop.f32.mrf.mxu0 }
0x2f61   :  { %v3394_v29 = vadd.f32 %v3854_v25, %v3847_v56 }
0x2f62   :  { %v3388_v36 = vpop.f32.mrf.mxu0 }
0x2f63   :  { %v3389_v5 = vadd.f32 %v3388_v36, %v3307_v21  ;;  %v3404_v11 = vadd.f32 %v3400_v38, %v3394_v29 }
0x2f65   :  { %v3403_v18 = vadd.f32 %v3398_v31, %v3389_v5  ;;  %v3407_v33 = vadd.f32 %v3405_v27, %v3404_v11 }
0x2f67   :  { %v3406_v16 = vadd.f32 %v3405_v27, %v3403_v18 }
0x2f69   :  { %3601 = vmatmul.mubr.msk.f32.vlgmr.msra.gmra.mxu1 %vm5017_vm10, %v3406_v16 }
0x2f6a   :  { %3504 = vmatprep.mubr.f32.mxu1 %v4039_v0 }
0x2f6d   :  { %3602 = vmatmul.mubr.msk.f32.gmra.mxu1 %vm5018_vm5, %v3407_v33 }
0x3029   :  { %v3501_v55 = vpop.f32.mrf.mxu1 }
0x302a   :  { %v3502_v37 = vadd.f32 %v3501_v55, %v3422_v49 }
0x302b   :  { %v3503_v54 = vpop.f32.mrf.mxu1 }
0x302c   :  { %v3511_v59 = vsel %vm3510_vm14, %v3502_v37, -1e+30 }
0x302d   :  { %v3506_v48 = vpop.f32.mrf.mxu1  ;;  %3512 = vmax.xlane.f32.xlu0 %v3511_v59 }
0x302f   :  { %v3507_v0 = vpop.f32.mrf.mxu1 }
0x3030   :  { %v3508_v50 = vadd.f32 %v3507_v0, %v3426_v26 }
0x3032   :  { %v3525_v62 = vsel %vm3510_vm14, %v3508_v50, -1e+30 }
0x3033   :  { %3526 = vmax.xlane.f32.xlu1 %v3525_v62 }
0x30b6   :  { %v3513_v14 = vpop.xlane.xlu0 %3512 }
0x30b7   :  { %v3514_v63 = vsub.f32 %v3511_v59, %v3513_v14  ;;  %v3520_v9 = vsub.f32 %v3502_v37, %v3513_v14 }
0x30b9   :  { %v3515_v1 = vmul.f32 1.442695, %v3514_v63 }
0x30bb   :  { %4006 = vpow2.f32 %v3515_v1 }
0x30bc   :  { %v3527_v28 = vpop.xlane.xlu1 %3526 }
0x30bd   :  { %v3528_v61 = vsub.f32 %v3525_v62, %v3527_v28  ;;  %v3534_v22 = vsub.f32 %v3508_v50, %v3527_v28 }
0x30bf   :  { %v3529_v2 = vmul.f32 1.442695, %v3528_v61 }
0x30c1   :  { %4008 = vpow2.f32 %v3529_v2 }
0x30c8   :  { %v4007_v3 = vpop.eup %4006 }
0x30c9   :  { %v3517_v41 = vsel %vm3510_vm14, %v4007_v3, 0.0 }
0x30ca   :  { %3518 = vadd.xlane.f32.xlu0 %v3517_v41 }
0x30ce   :  { %v4009_v60 = vpop.eup %4008 }
0x30cf   :  { %v3531_v6 = vsel %vm3510_vm14, %v4009_v60, 0.0 }
0x30d0   :  { %3532 = vadd.xlane.f32.xlu0 %v3531_v6 }
0x3153   :  { %v3519_v32 = vpop.xlane.xlu0 %3518 }
0x3154   :  { %4010 = vlog2.f32 %v3519_v32 }
0x3159   :  { %v3533_v4 = vpop.xlane.xlu0 %3532 }
0x315a   :  { %4012 = vlog2.f32 %v3533_v4 }
0x3161   :  { %v4011_v7 = vpop.eup %4010 }
0x3162   :  { %v3522_v12 = vmul.f32 0.6931472, %v4011_v7 }
0x3164   :  { %v3523_v13 = vsub.f32 %v3520_v9, %v3522_v12 }
0x3166   :  { %3524 = vst [vmem:[%s4943_s3] sm:$0xff] %v3523_v13 }
0x3167   :  { %v4013_v35 = vpop.eup %4012 }
0x3168   :  { %v3536_v24 = vmul.f32 0.6931472, %v4013_v35 }
0x316a   :  { %v3537_v42 = vsub.f32 %v3534_v22, %v3536_v24 }
0x316c   :  { %3538 = vst [vmem:[%s4943_s3 + $0x8] sm:$0xff] %v3537_v42 }
0x316d   :  { %3543 = vsyncpa [#allocation3], 1 }

</bundles_post_ra>
